<compile_context>
chip_gen: v5e
topology: v5e:2x2
jax: 0.10.0
libtpu: 0.0.40
codegen_flags: <defaults>
</compile_context>

<pallas_src>
import functools

import jax
import jax.numpy as jnp
from jax import lax
from jax.experimental import pallas as pl
from jax.experimental.pallas import tpu as pltpu

BN_EPS = 1e-5
LANE = 128                      # channel dims padded to a multiple of the lane width
ROW_TILE = 256                  # row tile (multiple of 8 sublanes); tune 512 on v6e
VMEM_LIMIT = 48 * 1024 * 1024   # explicit scoped-VMEM cap (safe on v5e/v6e/v7x)


def _rup(n, m):
    return ((n + m - 1) // m) * m


# ------------------------------ Pallas kernels ------------------------------

def _stats_kernel(x_ref, sum_ref, sq_ref, *, tm, rows_true):
    """Accumulate per-channel sum / sum-of-squares over all row tiles."""
    i = pl.program_id(0)

    @pl.when(i == 0)
    def _():
        sum_ref[...] = jnp.zeros_like(sum_ref)
        sq_ref[...] = jnp.zeros_like(sq_ref)

    x = x_ref[...].astype(jnp.float32)
    ridx = lax.broadcasted_iota(jnp.int32, x.shape, 0) + i * tm
    m = (ridx < rows_true).astype(jnp.float32)          # mask padded rows
    xm = x * m
    sum_ref[...] = sum_ref[...] + jnp.sum(xm, axis=0, keepdims=True)
    sq_ref[...] = sq_ref[...] + jnp.sum(xm * x, axis=0, keepdims=True)


def _bn_relu_matmul_stats_kernel(x_ref, mean_ref, rstd_ref, g_ref, b_ref,
                                 w_ref, y_ref, sum_ref, sq_ref, *,
                                 tm, rows_true):
    """y = relu(bn(x)) @ w  (1x1 conv), plus per-channel stats of y."""
    i = pl.program_id(0)

    @pl.when(i == 0)
    def _():
        sum_ref[...] = jnp.zeros_like(sum_ref)
        sq_ref[...] = jnp.zeros_like(sq_ref)

    x = x_ref[...].astype(jnp.float32)
    xn = (x - mean_ref[...]) * rstd_ref[...] * g_ref[...] + b_ref[...]
    xn = jnp.maximum(xn, 0.0)
    z = jnp.dot(xn.astype(jnp.bfloat16), w_ref[...],
                preferred_element_type=jnp.float32)
    y_ref[...] = z.astype(y_ref.dtype)

    ridx = lax.broadcasted_iota(jnp.int32, z.shape, 0) + i * tm
    m = (ridx < rows_true).astype(jnp.float32)
    zm = z * m
    sum_ref[...] = sum_ref[...] + jnp.sum(zm, axis=0, keepdims=True)
    sq_ref[...] = sq_ref[...] + jnp.sum(zm * z, axis=0, keepdims=True)


def _bn_relu_conv3x3_stats_kernel(xp_ref, mask_ref, mean_ref, rstd_ref,
                                  g_ref, b_ref, w_ref, y_ref, sum_ref, sq_ref,
                                  *, ho, wo, stride):
    """3x3 conv (pad=1, stride) of relu(bn(x)) for one sample + output stats.

    xp_ref : (1, H+2, W+2, Cp) raw input, spatially zero-padded (bf16)
    mask   : (1, H+2, W+2, 1)  1 on the interior, 0 on the padding ring
    w_ref  : (9*Cp, Cp)        tap-stacked dense weight (bf16)
    """
    n = pl.program_id(0)

    @pl.when(n == 0)
    def _():
        sum_ref[...] = jnp.zeros_like(sum_ref)
        sq_ref[...] = jnp.zeros_like(sq_ref)

    x = xp_ref[0].astype(jnp.float32)                    # (H+2, W+2, Cp)
    t = (x - mean_ref[...]) * rstd_ref[...] * g_ref[...] + b_ref[...]
    t = jnp.maximum(t, 0.0) * mask_ref[0]                # re-zero the pad ring
    t = t.astype(jnp.bfloat16)

    cp = t.shape[-1]
    he = stride * (ho - 1) + 1
    we = stride * (wo - 1) + 1
    # NOTE: stride > 1 uses in-kernel strided slicing (demo exercises stride=1).
    taps = [t[kh:kh + he:stride, kw:kw + we:stride, :]
            for kh in range(3) for kw in range(3)]       # 9 x (Ho, Wo, Cp)
    cat = jnp.concatenate(taps, axis=-1)                 # (Ho, Wo, 9*Cp)
    z = jnp.dot(cat.reshape(ho * wo, 9 * cp), w_ref[...],
                preferred_element_type=jnp.float32)      # (Ho*Wo, Cp)

    y_ref[...] = z.reshape(1, ho, wo, cp).astype(y_ref.dtype)
    sum_ref[...] = sum_ref[...] + jnp.sum(z, axis=0, keepdims=True)
    sq_ref[...] = sq_ref[...] + jnp.sum(z * z, axis=0, keepdims=True)


def _bn_relu_matmul_add_kernel(x_ref, mean_ref, rstd_ref, g_ref, b_ref,
                               w_ref, res_ref, o_ref):
    """out = relu(bn(x)) @ w + residual   (identity residual)."""
    x = x_ref[...].astype(jnp.float32)
    xn = jnp.maximum((x - mean_ref[...]) * rstd_ref[...] * g_ref[...]
                     + b_ref[...], 0.0)
    z = jnp.dot(xn.astype(jnp.bfloat16), w_ref[...],
                preferred_element_type=jnp.float32)
    o_ref[...] = (z + res_ref[...].astype(jnp.float32)).astype(o_ref.dtype)


def _bn_relu_matmul_dsadd_kernel(x_ref, mean_ref, rstd_ref, g_ref, b_ref,
                                 w_ref, xs_ref, wd_ref, o_ref):
    """out = relu(bn(x)) @ w + xs @ wd   (fused downsample residual)."""
    x = x_ref[...].astype(jnp.float32)
    xn = jnp.maximum((x - mean_ref[...]) * rstd_ref[...] * g_ref[...]
                     + b_ref[...], 0.0)
    z = jnp.dot(xn.astype(jnp.bfloat16), w_ref[...],
                preferred_element_type=jnp.float32)
    r = jnp.dot(xs_ref[...], wd_ref[...], preferred_element_type=jnp.float32)
    o_ref[...] = (z + r).astype(o_ref.dtype)


# --------------------------- pallas_call wrappers ---------------------------

def _cvec(c):
    return pl.BlockSpec((1, c), lambda i: (0, 0))


def _channel_stats(x2d, rows_true, tm):
    rows_pad, cp = x2d.shape
    kern = functools.partial(_stats_kernel, tm=tm, rows_true=rows_true)
    return pl.pallas_call(
        kern, grid=(rows_pad // tm,),
        in_specs=[pl.BlockSpec((tm, cp), lambda i: (i, 0))],
        out_specs=(_cvec(cp), _cvec(cp)),
        out_shape=(jax.ShapeDtypeStruct((1, cp), jnp.float32),
                   jax.ShapeDtypeStruct((1, cp), jnp.float32)),
        compiler_params=pltpu.CompilerParams(
            dimension_semantics=("arbitrary",), vmem_limit_bytes=VMEM_LIMIT),
        cost_estimate=pl.CostEstimate(flops=3 * rows_pad * cp,
                                      transcendentals=0,
                                      bytes_accessed=4 * rows_pad * cp),
    )(x2d)


def _finalize_stats(s, sq, count):
    mean = s / float(count)
    var = jnp.maximum(sq / float(count) - mean * mean, 0.0)   # biased variance
    return mean, lax.rsqrt(var + BN_EPS)


def _conv1x1_stage(x2d, mean, rstd, g, b, w, rows_true, tm):
    rows_pad, cin = x2d.shape
    cout = w.shape[1]
    kern = functools.partial(_bn_relu_matmul_stats_kernel, tm=tm,
                             rows_true=rows_true)
    return pl.pallas_call(
        kern, grid=(rows_pad // tm,),
        in_specs=[pl.BlockSpec((tm, cin), lambda i: (i, 0)),
                  _cvec(cin), _cvec(cin), _cvec(cin), _cvec(cin),
                  pl.BlockSpec((cin, cout), lambda i: (0, 0))],
        out_specs=(pl.BlockSpec((tm, cout), lambda i: (i, 0)),
                   _cvec(cout), _cvec(cout)),
        out_shape=(jax.ShapeDtypeStruct((rows_pad, cout), jnp.bfloat16),
                   jax.ShapeDtypeStruct((1, cout), jnp.float32),
                   jax.ShapeDtypeStruct((1, cout), jnp.float32)),
        compiler_params=pltpu.CompilerParams(
            dimension_semantics=("arbitrary",), vmem_limit_bytes=VMEM_LIMIT),
        cost_estimate=pl.CostEstimate(
            flops=2 * rows_pad * cin * cout, transcendentals=0,
            bytes_accessed=4 * rows_pad * cin + 2 * cin * cout
                           + 2 * rows_pad * cout),
    )(x2d, mean, rstd, g, b, w)


def _conv3x3_stage(xp, mask, mean, rstd, g, b, w, ho, wo, stride):
    n, hp, wp, cp = xp.shape
    kern = functools.partial(_bn_relu_conv3x3_stats_kernel,
                             ho=ho, wo=wo, stride=stride)
    return pl.pallas_call(
        kern, grid=(n,),
        in_specs=[pl.BlockSpec((1, hp, wp, cp), lambda i: (i, 0, 0, 0)),
                  pl.BlockSpec((1, hp, wp, 1), lambda i: (0, 0, 0, 0)),
                  _cvec(cp), _cvec(cp), _cvec(cp), _cvec(cp),
                  pl.BlockSpec((9 * cp, cp), lambda i: (0, 0))],
        out_specs=(pl.BlockSpec((1, ho, wo, cp), lambda i: (i, 0, 0, 0)),
                   _cvec(cp), _cvec(cp)),
        out_shape=(jax.ShapeDtypeStruct((n, ho, wo, cp), jnp.bfloat16),
                   jax.ShapeDtypeStruct((1, cp), jnp.float32),
                   jax.ShapeDtypeStruct((1, cp), jnp.float32)),
        compiler_params=pltpu.CompilerParams(
            dimension_semantics=("arbitrary",), vmem_limit_bytes=VMEM_LIMIT),
        cost_estimate=pl.CostEstimate(
            flops=2 * n * ho * wo * 9 * cp * cp, transcendentals=0,
            bytes_accessed=2 * n * hp * wp * cp + 18 * cp * cp
                           + 2 * n * ho * wo * cp),
    )(xp, mask, mean, rstd, g, b, w)


def _expand_identity_stage(h2d, mean, rstd, g, b, w, res, tm):
    rows_pad, cp = h2d.shape
    cout = w.shape[1]
    return pl.pallas_call(
        _bn_relu_matmul_add_kernel, grid=(rows_pad // tm,),
        in_specs=[pl.BlockSpec((tm, cp), lambda i: (i, 0)),
                  _cvec(cp), _cvec(cp), _cvec(cp), _cvec(cp),
                  pl.BlockSpec((cp, cout), lambda i: (0, 0)),
                  pl.BlockSpec((tm, cout), lambda i: (i, 0))],
        out_specs=pl.BlockSpec((tm, cout), lambda i: (i, 0)),
        out_shape=jax.ShapeDtypeStruct((rows_pad, cout), jnp.float32),
        compiler_params=pltpu.CompilerParams(
            dimension_semantics=("parallel",), vmem_limit_bytes=VMEM_LIMIT),
        cost_estimate=pl.CostEstimate(
            flops=2 * rows_pad * cp * cout, transcendentals=0,
            bytes_accessed=2 * rows_pad * cp + 2 * cp * cout
                           + 8 * rows_pad * cout),
    )(h2d, mean, rstd, g, b, w, res)


def _expand_downsample_stage(h2d, mean, rstd, g, b, w, xs, wd, tm):
    rows_pad, cp = h2d.shape
    cin = xs.shape[1]
    cout = w.shape[1]
    return pl.pallas_call(
        _bn_relu_matmul_dsadd_kernel, grid=(rows_pad // tm,),
        in_specs=[pl.BlockSpec((tm, cp), lambda i: (i, 0)),
                  _cvec(cp), _cvec(cp), _cvec(cp), _cvec(cp),
                  pl.BlockSpec((cp, cout), lambda i: (0, 0)),
                  pl.BlockSpec((tm, cin), lambda i: (i, 0)),
                  pl.BlockSpec((cin, cout), lambda i: (0, 0))],
        out_specs=pl.BlockSpec((tm, cout), lambda i: (i, 0)),
        out_shape=jax.ShapeDtypeStruct((rows_pad, cout), jnp.float32),
        compiler_params=pltpu.CompilerParams(
            dimension_semantics=("parallel",), vmem_limit_bytes=VMEM_LIMIT),
        cost_estimate=pl.CostEstimate(
            flops=2 * rows_pad * (cp + cin) * cout, transcendentals=0,
            bytes_accessed=2 * rows_pad * (cp + cin)
                           + 2 * (cp + cin) * cout + 4 * rows_pad * cout),
    )(h2d, mean, rstd, g, b, w, xs, wd)


# ------------------------------- JAX wrapper --------------------------------

def _pad_row(v, c):
    return jnp.pad(v.astype(jnp.float32), (0, c - v.shape[0])).reshape(1, c)


def _pad_mat(m, r, c):
    return jnp.pad(m.astype(jnp.float32),
                   ((0, r - m.shape[0]), (0, c - m.shape[1])))


@functools.partial(jax.jit, static_argnames=("stride", "downsampling",
                                             "expansion"))
def bottleneckv2_forward(x_nchw, params, *, stride=1, downsampling=False,
                         expansion=4):
    n, cin, h, w = x_nchw.shape
    places = params["w1"].shape[1]
    out_c = places * expansion
    ho = (h - 1) // stride + 1
    wo = (w - 1) // stride + 1
    if not downsampling:
        assert stride == 1 and cin == out_c, (
            "identity residual requires stride==1 and in_places=="
            "places*expansion")

    cp_in = _rup(cin, LANE)
    cp_mid = _rup(places, LANE)
    cp_out = _rup(out_c, LANE)
    tm = ROW_TILE

    x_nhwc = jnp.transpose(x_nchw, (0, 2, 3, 1)).astype(jnp.float32)
    rows = n * h * w
    rows_pad = _rup(rows, tm)
    x2d = x_nhwc.reshape(rows, cin)
    x2d_p = jnp.pad(x2d, ((0, rows_pad - rows), (0, cp_in - cin)))

    # ---- BN_a statistics of the raw input (Pallas row-tile reduction) ----
    s0, q0 = _channel_stats(x2d_p, rows, tm)
    mean_a, rstd_a = _finalize_stats(s0, q0, rows)

    ga = _pad_row(params["ga"], cp_in)
    ba = _pad_row(params["ba"], cp_in)
    w1 = _pad_mat(params["w1"], cp_in, cp_mid).astype(jnp.bfloat16)

    # ---- stage 1: BN_a + ReLU + 1x1 conv, fused, + stats of its output ----
    h1_p, s1, q1 = _conv1x1_stage(x2d_p, mean_a, rstd_a, ga, ba, w1, rows, tm)
    mean_b, rstd_b = _finalize_stats(s1, q1, rows)

    # ---- stage 2: BN_b + ReLU + 3x3 conv (pad=1, stride), fused, + stats ----
    h1 = h1_p[:rows].reshape(n, h, w, cp_mid)
    h1_sp = jnp.pad(h1, ((0, 0), (1, 1), (1, 1), (0, 0)))
    interior = jnp.zeros((h + 2, w + 2), jnp.float32)
    interior = interior.at[1:h + 1, 1:w + 1].set(1.0)
    mask = interior[None, :, :, None]
    gb = _pad_row(params["gb"], cp_mid)
    bb = _pad_row(params["bb"], cp_mid)
    w2 = jnp.pad(params["w2"].astype(jnp.float32).reshape(9, places, places),
                 ((0, 0), (0, cp_mid - places), (0, cp_mid - places)))
    w2 = w2.reshape(9 * cp_mid, cp_mid).astype(jnp.bfloat16)
    h3, s2, q2 = _conv3x3_stage(h1_sp, mask, mean_b, rstd_b, gb, bb, w2,
                                ho, wo, stride)
    rows_o = n * ho * wo
    mean_c, rstd_c = _finalize_stats(s2, q2, rows_o)

    # ---- stage 3: BN_c + ReLU + 1x1 expansion conv + residual add, fused ----
    rows_o_pad = _rup(rows_o, tm)
    h3_2d = jnp.pad(h3.reshape(rows_o, cp_mid),
                    ((0, rows_o_pad - rows_o), (0, 0)))
    gc = _pad_row(params["gc"], cp_mid)
    bc = _pad_row(params["bc"], cp_mid)
    w3 = _pad_mat(params["w3"], cp_mid, cp_out).astype(jnp.bfloat16)

    if downsampling:
        xs = x_nhwc[:, ::stride, ::stride, :].reshape(rows_o, cin)
        xs = jnp.pad(xs, ((0, rows_o_pad - rows_o), (0, cp_in - cin)))
        xs = xs.astype(jnp.bfloat16)
        wd = _pad_mat(params["wd"], cp_in, cp_out).astype(jnp.bfloat16)
        out_p = _expand_downsample_stage(h3_2d, mean_c, rstd_c, gc, bc, w3,
                                         xs, wd, tm)
    else:
        res = jnp.pad(x2d, ((0, rows_o_pad - rows_o), (0, cp_out - cin)))
        out_p = _expand_identity_stage(h3_2d, mean_c, rstd_c, gc, bc, w3,
                                       res, tm)

    out = out_p[:rows_o, :out_c].reshape(n, ho, wo, out_c)
    return jnp.transpose(out, (0, 3, 1, 2))                # back to NCHW


# ---------------------------- params & reference ----------------------------

def init_params(key, in_places, places, expansion, downsampling):
    out_c = places * expansion
    ks = jax.random.split(key, 10)
    nrm = jax.random.normal
    p = {
        "ga": 1.0 + 0.1 * nrm(ks[0], (in_places,), jnp.float32),
        "ba": 0.1 * nrm(ks[1], (in_places,), jnp.float32),
        "w1": 0.1 * nrm(ks[2], (in_places, places), jnp.float32),
        "gb": 1.0 + 0.1 * nrm(ks[3], (places,), jnp.float32),
        "bb": 0.1 * nrm(ks[4], (places,), jnp.float32),
        "w2": 0.1 * nrm(ks[5], (3, 3, places, places), jnp.float32),
        "gc": 1.0 + 0.1 * nrm(ks[6], (places,), jnp.float32),
        "bc": 0.1 * nrm(ks[7], (places,), jnp.float32),
        "w3": 0.1 * nrm(ks[8], (places, out_c), jnp.float32),
    }
    if downsampling:
        p["wd"] = 0.1 * nrm(ks[9], (in_places, out_c), jnp.float32)
    return p


def reference_forward(x_nchw, p, *, stride, downsampling):
    """Pure-JAX f32 reference with identical (training-mode BN) semantics."""
    x = jnp.transpose(x_nchw, (0, 2, 3, 1)).astype(jnp.float32)
    nb, hh, ww, _ = x.shape

    def bn_relu(v, g, b):
        mean = jnp.mean(v, axis=(0, 1, 2), keepdims=True)
        var = jnp.mean((v - mean) ** 2, axis=(0, 1, 2), keepdims=True)
        return jnp.maximum((v - mean) * lax.rsqrt(var + BN_EPS) * g + b, 0.0)

    h = bn_relu(x, p["ga"], p["ba"])
    h = jnp.einsum("nhwc,cd->nhwd", h, p["w1"])
    h = bn_relu(h, p["gb"], p["bb"])
    hp = jnp.pad(h, ((0, 0), (1, 1), (1, 1), (0, 0)))
    s = stride
    ho = (hh - 1) // s + 1
    wo = (ww - 1) // s + 1
    acc = jnp.zeros((nb, ho, wo, h.shape[-1]), jnp.float32)
    for kh in range(3):
        for kw in range(3):
            sl = hp[:, kh:kh + s * (ho - 1) + 1:s,
                       kw:kw + s * (wo - 1) + 1:s, :]
            acc = acc + jnp.einsum("nhwc,cd->nhwd", sl, p["w2"][kh, kw])
    h = bn_relu(acc, p["gc"], p["bc"])
    out = jnp.einsum("nhwc,cd->nhwd", h, p["w3"])
    if downsampling:
        res = jnp.einsum("nhwc,cd->nhwd", x[:, ::s, ::s, :], p["wd"])
    else:
        res = x
    return jnp.transpose(out + res, (0, 3, 1, 2))


# ----------------------------------- main ------------------------------------

if __name__ == "__main__":
    key = jax.random.PRNGKey(0)
    configs = [
        # name,        N, in_pl, places, exp, stride, downsampling, H,  W
        ("identity",   2, 32,    8,      4,   1,      False,        16, 16),
        ("downsample", 2, 16,    8,      4,   1,      True,         8,  8),
    ]
    for name, n, cin, places, expansion, stride, downsampling, h, w in configs:
        key, kx, kp = jax.random.split(key, 3)
        x = jax.random.normal(kx, (n, cin, h, w), jnp.float32)
        params = init_params(kp, cin, places, expansion, downsampling)

        out = bottleneckv2_forward(x, params, stride=stride,
                                   downsampling=downsampling,
                                   expansion=expansion)
        out = jax.block_until_ready(out)

        ref = reference_forward(x, params, stride=stride,
                                downsampling=downsampling)
        assert out.shape == ref.shape, (name, out.shape, ref.shape)
        assert bool(jnp.all(jnp.isfinite(out))), name
        err = float(jnp.max(jnp.abs(out - ref)))
        tol = 5e-2 + 5e-2 * float(jnp.max(jnp.abs(ref)))
        assert err <= tol, f"{name}: max abs err {err} > tol {tol}"

    print("KERNEL_OK")
</pallas_src>

<mosaic_0001>
module attributes {stable_mosaic.version = 11 : i64} {
  func.func @_stats_kernel(%arg0: i32, %arg1: memref<256x128xf32, #tpu.memory_space<vmem>>, %arg2: memref<1x128xf32, #tpu.memory_space<vmem>>, %arg3: memref<1x128xf32, #tpu.memory_space<vmem>>) attributes {dimension_semantics = [#tpu.dimension_semantics<arbitrary>], iteration_bounds = array<i64: 2>, scalar_prefetch = 0 : i64, scratch_operands = 0 : i64, tpu.core_type = #tpu.core_type<tc>, window_params = [{transform_indices = @transform_0, window_bounds = array<i64: 256, 128>}, {pipeline_mode = #tpu.pipeline_mode<synchronous>, transform_indices = @transform_1, window_bounds = array<i64: 1, 128>}, {pipeline_mode = #tpu.pipeline_mode<synchronous>, transform_indices = @transform_2, window_bounds = array<i64: 1, 128>}]} {
    %c0_i32 = arith.constant 0 : i32
    %0 = arith.cmpi eq, %arg0, %c0_i32 : i32
    %1 = arith.extui %0 : i1 to i32
    %c0_i32_0 = arith.constant 0 : i32
    %2 = arith.cmpi ne, %1, %c0_i32_0 : i32
    scf.if %2 {
      %cst_11 = arith.constant 0.000000e+00 : f32
      %24 = vector.broadcast %cst_11 : f32 to vector<1x128xf32>
      %c0_12 = arith.constant 0 : index
      %c0_13 = arith.constant 0 : index
      %25 = vector.load %arg2[%c0_12, %c0_13] : memref<1x128xf32, #tpu.memory_space<vmem>>, vector<1x128xf32>
      tpu.vector_store %arg2[%c0_12, %c0_13], %24 {strides = array<i32>} : memref<1x128xf32, #tpu.memory_space<vmem>>, vector<1x128xf32>,
      %cst_14 = arith.constant 0.000000e+00 : f32
      %26 = vector.broadcast %cst_14 : f32 to vector<1x128xf32>
      %c0_15 = arith.constant 0 : index
      %c0_16 = arith.constant 0 : index
      %27 = vector.load %arg3[%c0_15, %c0_16] : memref<1x128xf32, #tpu.memory_space<vmem>>, vector<1x128xf32>
      tpu.vector_store %arg3[%c0_15, %c0_16], %26 {strides = array<i32>} : memref<1x128xf32, #tpu.memory_space<vmem>>, vector<1x128xf32>,
    } else {
    }
    %c0 = arith.constant 0 : index
    %c0_1 = arith.constant 0 : index
    %3 = vector.load %arg1[%c0, %c0_1] : memref<256x128xf32, #tpu.memory_space<vmem>>, vector<256x128xf32>
    %4 = tpu.iota {dimensions = array<i32: 0>} : vector<256x128xi32>
    %c256_i32 = arith.constant 256 : i32
    %5 = arith.muli %arg0, %c256_i32 : i32
    %6 = vector.broadcast %5 : i32 to vector<256x128xi32>
    %7 = arith.addi %4, %6 : vector<256x128xi32>
    %c512_i32 = arith.constant 512 : i32
    %8 = vector.broadcast %c512_i32 : i32 to vector<256x128xi32>
    %9 = arith.cmpi slt, %7, %8 : vector<256x128xi32>
    %10 = arith.extui %9 : vector<256x128xi1> to vector<256x128xi32>
    %11 = arith.sitofp %10 : vector<256x128xi32> to vector<256x128xf32>
    %12 = arith.mulf %3, %11 : vector<256x128xf32>
    %c0_2 = arith.constant 0 : index
    %c0_3 = arith.constant 0 : index
    %13 = vector.load %arg2[%c0_2, %c0_3] : memref<1x128xf32, #tpu.memory_space<vmem>>, vector<1x128xf32>
    %cst = arith.constant dense<0.000000e+00> : vector<128xf32>
    %14 = vector.multi_reduction <add>, %12, %cst [0] : vector<256x128xf32> to vector<128xf32>
    %15 = vector.shape_cast %14 : vector<128xf32> to vector<1x128xf32>
    %16 = arith.addf %13, %15 : vector<1x128xf32>
    %c0_4 = arith.constant 0 : index
    %c0_5 = arith.constant 0 : index
    %17 = vector.load %arg2[%c0_4, %c0_5] : memref<1x128xf32, #tpu.memory_space<vmem>>, vector<1x128xf32>
    tpu.vector_store %arg2[%c0_4, %c0_5], %16 {strides = array<i32>} : memref<1x128xf32, #tpu.memory_space<vmem>>, vector<1x128xf32>,
    %c0_6 = arith.constant 0 : index
    %c0_7 = arith.constant 0 : index
    %18 = vector.load %arg3[%c0_6, %c0_7] : memref<1x128xf32, #tpu.memory_space<vmem>>, vector<1x128xf32>
    %19 = arith.mulf %12, %3 : vector<256x128xf32>
    %cst_8 = arith.constant dense<0.000000e+00> : vector<128xf32>
    %20 = vector.multi_reduction <add>, %19, %cst_8 [0] : vector<256x128xf32> to vector<128xf32>
    %21 = vector.shape_cast %20 : vector<128xf32> to vector<1x128xf32>
    %22 = arith.addf %18, %21 : vector<1x128xf32>
    %c0_9 = arith.constant 0 : index
    %c0_10 = arith.constant 0 : index
    %23 = vector.load %arg3[%c0_9, %c0_10] : memref<1x128xf32, #tpu.memory_space<vmem>>, vector<1x128xf32>
    tpu.vector_store %arg3[%c0_9, %c0_10], %22 {strides = array<i32>} : memref<1x128xf32, #tpu.memory_space<vmem>>, vector<1x128xf32>,
    return
  }
  func.func @transform_0(%arg0: i32) -> (i32, i32) {
    %c0_i32 = arith.constant 0 : i32
    %c0_i32_0 = arith.constant 0 : i32
    return %arg0, %c0_i32 : i32, i32
  }
  func.func @transform_1(%arg0: i32) -> (i32, i32) {
    %c0_i32 = arith.constant 0 : i32
    %c0_i32_0 = arith.constant 0 : i32
    %c0_i32_1 = arith.constant 0 : i32
    return %c0_i32, %c0_i32_0 : i32, i32
  }
  func.func @transform_2(%arg0: i32) -> (i32, i32) {
    %c0_i32 = arith.constant 0 : i32
    %c0_i32_0 = arith.constant 0 : i32
    %c0_i32_1 = arith.constant 0 : i32
    return %c0_i32, %c0_i32_0 : i32, i32
  }
}

module attributes {stable_mosaic.version = 11 : i64} {
  func.func @_bn_relu_matmul_stats_kernel(%arg0: i32, %arg1: memref<256x128xf32, #tpu.memory_space<vmem>>, %arg2: memref<1x128xf32, #tpu.memory_space<vmem>>, %arg3: memref<1x128xf32, #tpu.memory_space<vmem>>, %arg4: memref<1x128xf32, #tpu.memory_space<vmem>>, %arg5: memref<1x128xf32, #tpu.memory_space<vmem>>, %arg6: memref<128x128xbf16, #tpu.memory_space<vmem>>, %arg7: memref<256x128xbf16, #tpu.memory_space<vmem>>, %arg8: memref<1x128xf32, #tpu.memory_space<vmem>>, %arg9: memref<1x128xf32, #tpu.memory_space<vmem>>) attributes {dimension_semantics = [#tpu.dimension_semantics<arbitrary>], iteration_bounds = array<i64: 2>, scalar_prefetch = 0 : i64, scratch_operands = 0 : i64, tpu.core_type = #tpu.core_type<tc>, window_params = [{transform_indices = @transform_0, window_bounds = array<i64: 256, 128>}, {pipeline_mode = #tpu.pipeline_mode<synchronous>, transform_indices = @transform_1, window_bounds = array<i64: 1, 128>}, {pipeline_mode = #tpu.pipeline_mode<synchronous>, transform_indices = @transform_2, window_bounds = array<i64: 1, 128>}, {pipeline_mode = #tpu.pipeline_mode<synchronous>, transform_indices = @transform_3, window_bounds = array<i64: 1, 128>}, {pipeline_mode = #tpu.pipeline_mode<synchronous>, transform_indices = @transform_4, window_bounds = array<i64: 1, 128>}, {pipeline_mode = #tpu.pipeline_mode<synchronous>, transform_indices = @transform_5, window_bounds = array<i64: 128, 128>}, {transform_indices = @transform_6, window_bounds = array<i64: 256, 128>}, {pipeline_mode = #tpu.pipeline_mode<synchronous>, transform_indices = @transform_7, window_bounds = array<i64: 1, 128>}, {pipeline_mode = #tpu.pipeline_mode<synchronous>, transform_indices = @transform_8, window_bounds = array<i64: 1, 128>}]} {
    %c0_i32 = arith.constant 0 : i32
    %0 = arith.cmpi eq, %arg0, %c0_i32 : i32
    %1 = arith.extui %0 : i1 to i32
    %c0_i32_0 = arith.constant 0 : i32
    %2 = arith.cmpi ne, %1, %c0_i32_0 : i32
    scf.if %2 {
      %cst_25 = arith.constant 0.000000e+00 : f32
      %43 = vector.broadcast %cst_25 : f32 to vector<1x128xf32>
      %c0_26 = arith.constant 0 : index
      %c0_27 = arith.constant 0 : index
      %44 = vector.load %arg8[%c0_26, %c0_27] : memref<1x128xf32, #tpu.memory_space<vmem>>, vector<1x128xf32>
      tpu.vector_store %arg8[%c0_26, %c0_27], %43 {strides = array<i32>} : memref<1x128xf32, #tpu.memory_space<vmem>>, vector<1x128xf32>,
      %cst_28 = arith.constant 0.000000e+00 : f32
      %45 = vector.broadcast %cst_28 : f32 to vector<1x128xf32>
      %c0_29 = arith.constant 0 : index
      %c0_30 = arith.constant 0 : index
      %46 = vector.load %arg9[%c0_29, %c0_30] : memref<1x128xf32, #tpu.memory_space<vmem>>, vector<1x128xf32>
      tpu.vector_store %arg9[%c0_29, %c0_30], %45 {strides = array<i32>} : memref<1x128xf32, #tpu.memory_space<vmem>>, vector<1x128xf32>,
    } else {
    }
    %c0 = arith.constant 0 : index
    %c0_1 = arith.constant 0 : index
    %3 = vector.load %arg1[%c0, %c0_1] : memref<256x128xf32, #tpu.memory_space<vmem>>, vector<256x128xf32>
    %c0_2 = arith.constant 0 : index
    %c0_3 = arith.constant 0 : index
    %4 = vector.load %arg2[%c0_2, %c0_3] : memref<1x128xf32, #tpu.memory_space<vmem>>, vector<1x128xf32>
    %5 = vector.broadcast %4 : vector<1x128xf32> to vector<256x128xf32>
    %6 = arith.subf %3, %5 : vector<256x128xf32>
    %c0_4 = arith.constant 0 : index
    %c0_5 = arith.constant 0 : index
    %7 = vector.load %arg3[%c0_4, %c0_5] : memref<1x128xf32, #tpu.memory_space<vmem>>, vector<1x128xf32>
    %8 = vector.broadcast %7 : vector<1x128xf32> to vector<256x128xf32>
    %9 = arith.mulf %6, %8 : vector<256x128xf32>
    %c0_6 = arith.constant 0 : index
    %c0_7 = arith.constant 0 : index
    %10 = vector.load %arg4[%c0_6, %c0_7] : memref<1x128xf32, #tpu.memory_space<vmem>>, vector<1x128xf32>
    %11 = vector.broadcast %10 : vector<1x128xf32> to vector<256x128xf32>
    %12 = arith.mulf %9, %11 : vector<256x128xf32>
    %c0_8 = arith.constant 0 : index
    %c0_9 = arith.constant 0 : index
    %13 = vector.load %arg5[%c0_8, %c0_9] : memref<1x128xf32, #tpu.memory_space<vmem>>, vector<1x128xf32>
    %14 = vector.broadcast %13 : vector<1x128xf32> to vector<256x128xf32>
    %15 = arith.addf %12, %14 : vector<256x128xf32>
    %cst = arith.constant 0.000000e+00 : f32
    %16 = vector.broadcast %cst : f32 to vector<256x128xf32>
    %17 = arith.maximumf %15, %16 : vector<256x128xf32>
    %18 = arith.truncf %17 : vector<256x128xf32> to vector<256x128xbf16>
    %c0_10 = arith.constant 0 : index
    %c0_11 = arith.constant 0 : index
    %19 = vector.load %arg6[%c0_10, %c0_11] : memref<128x128xbf16, #tpu.memory_space<vmem>>, vector<128x128xbf16>
    %cst_12 = arith.constant dense<0.000000e+00> : vector<256x128xf32>
    %20 = tpu.matmul %18, %19, %cst_12 {dimension_numbers = #tpu.dot_dimension_numbers<[1], [0], [0], [1], [0, 0, 1, 1], [], []>} : vector<256x128xbf16>, vector<128x128xbf16>, vector<256x128xf32> -> vector<256x128xf32>
    %21 = arith.truncf %20 : vector<256x128xf32> to vector<256x128xbf16>
    %c0_13 = arith.constant 0 : index
    %c0_14 = arith.constant 0 : index
    %22 = vector.load %arg7[%c0_13, %c0_14] : memref<256x128xbf16, #tpu.memory_space<vmem>>, vector<256x128xbf16>
    tpu.vector_store %arg7[%c0_13, %c0_14], %21 {strides = array<i32>} : memref<256x128xbf16, #tpu.memory_space<vmem>>, vector<256x128xbf16>,
    %23 = tpu.iota {dimensions = array<i32: 0>} : vector<256x128xi32>
    %c256_i32 = arith.constant 256 : i32
    %24 = arith.muli %arg0, %c256_i32 : i32
    %25 = vector.broadcast %24 : i32 to vector<256x128xi32>
    %26 = arith.addi %23, %25 : vector<256x128xi32>
    %c512_i32 = arith.constant 512 : i32
    %27 = vector.broadcast %c512_i32 : i32 to vector<256x128xi32>
    %28 = arith.cmpi slt, %26, %27 : vector<256x128xi32>
    %29 = arith.extui %28 : vector<256x128xi1> to vector<256x128xi32>
    %30 = arith.sitofp %29 : vector<256x128xi32> to vector<256x128xf32>
    %31 = arith.mulf %20, %30 : vector<256x128xf32>
    %c0_15 = arith.constant 0 : index
    %c0_16 = arith.constant 0 : index
    %32 = vector.load %arg8[%c0_15, %c0_16] : memref<1x128xf32, #tpu.memory_space<vmem>>, vector<1x128xf32>
    %cst_17 = arith.constant dense<0.000000e+00> : vector<128xf32>
    %33 = vector.multi_reduction <add>, %31, %cst_17 [0] : vector<256x128xf32> to vector<128xf32>
    %34 = vector.shape_cast %33 : vector<128xf32> to vector<1x128xf32>
    %35 = arith.addf %32, %34 : vector<1x128xf32>
    %c0_18 = arith.constant 0 : index
    %c0_19 = arith.constant 0 : index
    %36 = vector.load %arg8[%c0_18, %c0_19] : memref<1x128xf32, #tpu.memory_space<vmem>>, vector<1x128xf32>
    tpu.vector_store %arg8[%c0_18, %c0_19], %35 {strides = array<i32>} : memref<1x128xf32, #tpu.memory_space<vmem>>, vector<1x128xf32>,
    %c0_20 = arith.constant 0 : index
    %c0_21 = arith.constant 0 : index
    %37 = vector.load %arg9[%c0_20, %c0_21] : memref<1x128xf32, #tpu.memory_space<vmem>>, vector<1x128xf32>
    %38 = arith.mulf %31, %20 : vector<256x128xf32>
    %cst_22 = arith.constant dense<0.000000e+00> : vector<128xf32>
    %39 = vector.multi_reduction <add>, %38, %cst_22 [0] : vector<256x128xf32> to vector<128xf32>
    %40 = vector.shape_cast %39 : vector<128xf32> to vector<1x128xf32>
    %41 = arith.addf %37, %40 : vector<1x128xf32>
    %c0_23 = arith.constant 0 : index
    %c0_24 = arith.constant 0 : index
    %42 = vector.load %arg9[%c0_23, %c0_24] : memref<1x128xf32, #tpu.memory_space<vmem>>, vector<1x128xf32>
    tpu.vector_store %arg9[%c0_23, %c0_24], %41 {strides = array<i32>} : memref<1x128xf32, #tpu.memory_space<vmem>>, vector<1x128xf32>,
    return
  }
  func.func @transform_0(%arg0: i32) -> (i32, i32) {
    %c0_i32 = arith.constant 0 : i32
    %c0_i32_0 = arith.constant 0 : i32
    return %arg0, %c0_i32 : i32, i32
  }
  func.func @transform_1(%arg0: i32) -> (i32, i32) {
    %c0_i32 = arith.constant 0 : i32
    %c0_i32_0 = arith.constant 0 : i32
    %c0_i32_1 = arith.constant 0 : i32
    return %c0_i32, %c0_i32_0 : i32, i32
  }
  func.func @transform_2(%arg0: i32) -> (i32, i32) {
    %c0_i32 = arith.constant 0 : i32
    %c0_i32_0 = arith.constant 0 : i32
    %c0_i32_1 = arith.constant 0 : i32
    return %c0_i32, %c0_i32_0 : i32, i32
  }
  func.func @transform_3(%arg0: i32) -> (i32, i32) {
    %c0_i32 = arith.constant 0 : i32
    %c0_i32_0 = arith.constant 0 : i32
    %c0_i32_1 = arith.constant 0 : i32
    return %c0_i32, %c0_i32_0 : i32, i32
  }
  func.func @transform_4(%arg0: i32) -> (i32, i32) {
    %c0_i32 = arith.constant 0 : i32
    %c0_i32_0 = arith.constant 0 : i32
    %c0_i32_1 = arith.constant 0 : i32
    return %c0_i32, %c0_i32_0 : i32, i32
  }
  func.func @transform_5(%arg0: i32) -> (i32, i32) {
    %c0_i32 = arith.constant 0 : i32
    %c0_i32_0 = arith.constant 0 : i32
    %c0_i32_1 = arith.constant 0 : i32
    return %c0_i32, %c0_i32_0 : i32, i32
  }
  func.func @transform_6(%arg0: i32) -> (i32, i32) {
    %c0_i32 = arith.constant 0 : i32
    %c0_i32_0 = arith.constant 0 : i32
    return %arg0, %c0_i32 : i32, i32
  }
  func.func @transform_7(%arg0: i32) -> (i32, i32) {
    %c0_i32 = arith.constant 0 : i32
    %c0_i32_0 = arith.constant 0 : i32
    %c0_i32_1 = arith.constant 0 : i32
    return %c0_i32, %c0_i32_0 : i32, i32
  }
  func.func @transform_8(%arg0: i32) -> (i32, i32) {
    %c0_i32 = arith.constant 0 : i32
    %c0_i32_0 = arith.constant 0 : i32
    %c0_i32_1 = arith.constant 0 : i32
    return %c0_i32, %c0_i32_0 : i32, i32
  }
}

module attributes {stable_mosaic.version = 11 : i64} {
  func.func @_bn_relu_conv3x3_stats_kernel(%arg0: i32, %arg1: memref<1x18x18x128xbf16, #tpu.memory_space<vmem>>, %arg2: memref<1x18x18x1xf32, #tpu.memory_space<vmem>>, %arg3: memref<1x128xf32, #tpu.memory_space<vmem>>, %arg4: memref<1x128xf32, #tpu.memory_space<vmem>>, %arg5: memref<1x128xf32, #tpu.memory_space<vmem>>, %arg6: memref<1x128xf32, #tpu.memory_space<vmem>>, %arg7: memref<1152x128xbf16, #tpu.memory_space<vmem>>, %arg8: memref<1x16x16x128xbf16, #tpu.memory_space<vmem>>, %arg9: memref<1x128xf32, #tpu.memory_space<vmem>>, %arg10: memref<1x128xf32, #tpu.memory_space<vmem>>) attributes {dimension_semantics = [#tpu.dimension_semantics<arbitrary>], iteration_bounds = array<i64: 2>, scalar_prefetch = 0 : i64, scratch_operands = 0 : i64, tpu.core_type = #tpu.core_type<tc>, window_params = [{transform_indices = @transform_0, window_bounds = array<i64: 1, 18, 18, 128>}, {pipeline_mode = #tpu.pipeline_mode<synchronous>, transform_indices = @transform_1, window_bounds = array<i64: 1, 18, 18, 1>}, {pipeline_mode = #tpu.pipeline_mode<synchronous>, transform_indices = @transform_2, window_bounds = array<i64: 1, 128>}, {pipeline_mode = #tpu.pipeline_mode<synchronous>, transform_indices = @transform_3, window_bounds = array<i64: 1, 128>}, {pipeline_mode = #tpu.pipeline_mode<synchronous>, transform_indices = @transform_4, window_bounds = array<i64: 1, 128>}, {pipeline_mode = #tpu.pipeline_mode<synchronous>, transform_indices = @transform_5, window_bounds = array<i64: 1, 128>}, {pipeline_mode = #tpu.pipeline_mode<synchronous>, transform_indices = @transform_6, window_bounds = array<i64: 1152, 128>}, {transform_indices = @transform_7, window_bounds = array<i64: 1, 16, 16, 128>}, {pipeline_mode = #tpu.pipeline_mode<synchronous>, transform_indices = @transform_8, window_bounds = array<i64: 1, 128>}, {pipeline_mode = #tpu.pipeline_mode<synchronous>, transform_indices = @transform_9, window_bounds = array<i64: 1, 128>}]} {
    %c0_i32 = arith.constant 0 : i32
    %0 = arith.cmpi eq, %arg0, %c0_i32 : i32
    %1 = arith.extui %0 : i1 to i32
    %c0_i32_0 = arith.constant 0 : i32
    %2 = arith.cmpi ne, %1, %c0_i32_0 : i32
    scf.if %2 {
      %cst_33 = arith.constant 0.000000e+00 : f32
      %56 = vector.broadcast %cst_33 : f32 to vector<1x128xf32>
      %c0_34 = arith.constant 0 : index
      %c0_35 = arith.constant 0 : index
      %57 = vector.load %arg9[%c0_34, %c0_35] : memref<1x128xf32, #tpu.memory_space<vmem>>, vector<1x128xf32>
      tpu.vector_store %arg9[%c0_34, %c0_35], %56 {strides = array<i32>} : memref<1x128xf32, #tpu.memory_space<vmem>>, vector<1x128xf32>,
      %cst_36 = arith.constant 0.000000e+00 : f32
      %58 = vector.broadcast %cst_36 : f32 to vector<1x128xf32>
      %c0_37 = arith.constant 0 : index
      %c0_38 = arith.constant 0 : index
      %59 = vector.load %arg10[%c0_37, %c0_38] : memref<1x128xf32, #tpu.memory_space<vmem>>, vector<1x128xf32>
      tpu.vector_store %arg10[%c0_37, %c0_38], %58 {strides = array<i32>} : memref<1x128xf32, #tpu.memory_space<vmem>>, vector<1x128xf32>,
    } else {
    }
    %c0 = arith.constant 0 : index
    %c0_1 = arith.constant 0 : index
    %c0_2 = arith.constant 0 : index
    %c0_3 = arith.constant 0 : index
    %3 = vector.load %arg1[%c0, %c0_1, %c0_2, %c0_3] : memref<1x18x18x128xbf16, #tpu.memory_space<vmem>>, vector<1x18x18x128xbf16>
    %4 = vector.shape_cast %3 : vector<1x18x18x128xbf16> to vector<18x18x128xbf16>
    %5 = arith.extf %4 : vector<18x18x128xbf16> to vector<18x18x128xf32>
    %c0_4 = arith.constant 0 : index
    %c0_5 = arith.constant 0 : index
    %6 = vector.load %arg3[%c0_4, %c0_5] : memref<1x128xf32, #tpu.memory_space<vmem>>, vector<1x128xf32>
    %7 = vector.shape_cast %6 : vector<1x128xf32> to vector<1x1x128xf32>
    %8 = vector.broadcast %7 : vector<1x1x128xf32> to vector<18x18x128xf32>
    %9 = arith.subf %5, %8 : vector<18x18x128xf32>
    %c0_6 = arith.constant 0 : index
    %c0_7 = arith.constant 0 : index
    %10 = vector.load %arg4[%c0_6, %c0_7] : memref<1x128xf32, #tpu.memory_space<vmem>>, vector<1x128xf32>
    %11 = vector.shape_cast %10 : vector<1x128xf32> to vector<1x1x128xf32>
    %12 = vector.broadcast %11 : vector<1x1x128xf32> to vector<18x18x128xf32>
    %13 = arith.mulf %9, %12 : vector<18x18x128xf32>
    %c0_8 = arith.constant 0 : index
    %c0_9 = arith.constant 0 : index
    %14 = vector.load %arg5[%c0_8, %c0_9] : memref<1x128xf32, #tpu.memory_space<vmem>>, vector<1x128xf32>
    %15 = vector.shape_cast %14 : vector<1x128xf32> to vector<1x1x128xf32>
    %16 = vector.broadcast %15 : vector<1x1x128xf32> to vector<18x18x128xf32>
    %17 = arith.mulf %13, %16 : vector<18x18x128xf32>
    %c0_10 = arith.constant 0 : index
    %c0_11 = arith.constant 0 : index
    %18 = vector.load %arg6[%c0_10, %c0_11] : memref<1x128xf32, #tpu.memory_space<vmem>>, vector<1x128xf32>
    %19 = vector.shape_cast %18 : vector<1x128xf32> to vector<1x1x128xf32>
    %20 = vector.broadcast %19 : vector<1x1x128xf32> to vector<18x18x128xf32>
    %21 = arith.addf %17, %20 : vector<18x18x128xf32>
    %cst = arith.constant 0.000000e+00 : f32
    %22 = vector.broadcast %cst : f32 to vector<18x18x128xf32>
    %23 = arith.maximumf %21, %22 : vector<18x18x128xf32>
    %c0_12 = arith.constant 0 : index
    %c0_13 = arith.constant 0 : index
    %c0_14 = arith.constant 0 : index
    %c0_15 = arith.constant 0 : index
    %24 = vector.load %arg2[%c0_12, %c0_13, %c0_14, %c0_15] : memref<1x18x18x1xf32, #tpu.memory_space<vmem>>, vector<1x18x18x1xf32>
    %25 = vector.shape_cast %24 : vector<1x18x18x1xf32> to vector<18x18x1xf32>
    %26 = vector.broadcast %25 : vector<18x18x1xf32> to vector<18x18x128xf32>
    %27 = arith.mulf %23, %26 : vector<18x18x128xf32>
    %28 = arith.truncf %27 : vector<18x18x128xf32> to vector<18x18x128xbf16>
    %29 = vector.extract_strided_slice %28 {offsets = [0, 0, 0], sizes = [16, 16, 128], strides = [1, 1, 1]} : vector<18x18x128xbf16> to vector<16x16x128xbf16>
    %30 = vector.extract_strided_slice %28 {offsets = [0, 1, 0], sizes = [16, 16, 128], strides = [1, 1, 1]} : vector<18x18x128xbf16> to vector<16x16x128xbf16>
    %31 = vector.extract_strided_slice %28 {offsets = [0, 2, 0], sizes = [16, 16, 128], strides = [1, 1, 1]} : vector<18x18x128xbf16> to vector<16x16x128xbf16>
    %32 = vector.extract_strided_slice %28 {offsets = [1, 0, 0], sizes = [16, 16, 128], strides = [1, 1, 1]} : vector<18x18x128xbf16> to vector<16x16x128xbf16>
    %33 = vector.extract_strided_slice %28 {offsets = [1, 1, 0], sizes = [16, 16, 128], strides = [1, 1, 1]} : vector<18x18x128xbf16> to vector<16x16x128xbf16>
    %34 = vector.extract_strided_slice %28 {offsets = [1, 2, 0], sizes = [16, 16, 128], strides = [1, 1, 1]} : vector<18x18x128xbf16> to vector<16x16x128xbf16>
    %35 = vector.extract_strided_slice %28 {offsets = [2, 0, 0], sizes = [16, 16, 128], strides = [1, 1, 1]} : vector<18x18x128xbf16> to vector<16x16x128xbf16>
    %36 = vector.extract_strided_slice %28 {offsets = [2, 1, 0], sizes = [16, 16, 128], strides = [1, 1, 1]} : vector<18x18x128xbf16> to vector<16x16x128xbf16>
    %37 = vector.extract_strided_slice %28 {offsets = [2, 2, 0], sizes = [16, 16, 128], strides = [1, 1, 1]} : vector<18x18x128xbf16> to vector<16x16x128xbf16>
    %38 = tpu.concatenate %29, %30, %31, %32, %33, %34, %35, %36, %37 in 2 : vector<16x16x128xbf16>, vector<16x16x128xbf16>, vector<16x16x128xbf16>, vector<16x16x128xbf16>, vector<16x16x128xbf16>, vector<16x16x128xbf16>, vector<16x16x128xbf16>, vector<16x16x128xbf16>, vector<16x16x128xbf16> -> vector<16x16x1152xbf16>
    %39 = vector.shape_cast %38 : vector<16x16x1152xbf16> to vector<256x1152xbf16>
    %c0_16 = arith.constant 0 : index
    %c0_17 = arith.constant 0 : index
    %40 = vector.load %arg7[%c0_16, %c0_17] : memref<1152x128xbf16, #tpu.memory_space<vmem>>, vector<1152x128xbf16>
    %cst_18 = arith.constant dense<0.000000e+00> : vector<256x128xf32>
    %41 = tpu.matmul %39, %40, %cst_18 {dimension_numbers = #tpu.dot_dimension_numbers<[1], [0], [0], [1], [0, 0, 1, 1], [], []>} : vector<256x1152xbf16>, vector<1152x128xbf16>, vector<256x128xf32> -> vector<256x128xf32>
    %42 = vector.shape_cast %41 : vector<256x128xf32> to vector<1x16x16x128xf32>
    %43 = arith.truncf %42 : vector<1x16x16x128xf32> to vector<1x16x16x128xbf16>
    %c0_19 = arith.constant 0 : index
    %c0_20 = arith.constant 0 : index
    %c0_21 = arith.constant 0 : index
    %c0_22 = arith.constant 0 : index
    %44 = vector.load %arg8[%c0_19, %c0_20, %c0_21, %c0_22] : memref<1x16x16x128xbf16, #tpu.memory_space<vmem>>, vector<1x16x16x128xbf16>
    tpu.vector_store %arg8[%c0_19, %c0_20, %c0_21, %c0_22], %43 {strides = array<i32>} : memref<1x16x16x128xbf16, #tpu.memory_space<vmem>>, vector<1x16x16x128xbf16>,
    %c0_23 = arith.constant 0 : index
    %c0_24 = arith.constant 0 : index
    %45 = vector.load %arg9[%c0_23, %c0_24] : memref<1x128xf32, #tpu.memory_space<vmem>>, vector<1x128xf32>
    %cst_25 = arith.constant dense<0.000000e+00> : vector<128xf32>
    %46 = vector.multi_reduction <add>, %41, %cst_25 [0] : vector<256x128xf32> to vector<128xf32>
    %47 = vector.shape_cast %46 : vector<128xf32> to vector<1x128xf32>
    %48 = arith.addf %45, %47 : vector<1x128xf32>
    %c0_26 = arith.constant 0 : index
    %c0_27 = arith.constant 0 : index
    %49 = vector.load %arg9[%c0_26, %c0_27] : memref<1x128xf32, #tpu.memory_space<vmem>>, vector<1x128xf32>
    tpu.vector_store %arg9[%c0_26, %c0_27], %48 {strides = array<i32>} : memref<1x128xf32, #tpu.memory_space<vmem>>, vector<1x128xf32>,
    %c0_28 = arith.constant 0 : index
    %c0_29 = arith.constant 0 : index
    %50 = vector.load %arg10[%c0_28, %c0_29] : memref<1x128xf32, #tpu.memory_space<vmem>>, vector<1x128xf32>
    %51 = arith.mulf %41, %41 : vector<256x128xf32>
    %cst_30 = arith.constant dense<0.000000e+00> : vector<128xf32>
    %52 = vector.multi_reduction <add>, %51, %cst_30 [0] : vector<256x128xf32> to vector<128xf32>
    %53 = vector.shape_cast %52 : vector<128xf32> to vector<1x128xf32>
    %54 = arith.addf %50, %53 : vector<1x128xf32>
    %c0_31 = arith.constant 0 : index
    %c0_32 = arith.constant 0 : index
    %55 = vector.load %arg10[%c0_31, %c0_32] : memref<1x128xf32, #tpu.memory_space<vmem>>, vector<1x128xf32>
    tpu.vector_store %arg10[%c0_31, %c0_32], %54 {strides = array<i32>} : memref<1x128xf32, #tpu.memory_space<vmem>>, vector<1x128xf32>,
    return
  }
  func.func @transform_0(%arg0: i32) -> (i32, i32, i32, i32) {
    %c0_i32 = arith.constant 0 : i32
    %c0_i32_0 = arith.constant 0 : i32
    %c0_i32_1 = arith.constant 0 : i32
    %c0_i32_2 = arith.constant 0 : i32
    return %arg0, %c0_i32, %c0_i32_0, %c0_i32_1 : i32, i32, i32, i32
  }
  func.func @transform_1(%arg0: i32) -> (i32, i32, i32, i32) {
    %c0_i32 = arith.constant 0 : i32
    %c0_i32_0 = arith.constant 0 : i32
    %c0_i32_1 = arith.constant 0 : i32
    %c0_i32_2 = arith.constant 0 : i32
    %c0_i32_3 = arith.constant 0 : i32
    return %c0_i32, %c0_i32_0, %c0_i32_1, %c0_i32_2 : i32, i32, i32, i32
  }
  func.func @transform_2(%arg0: i32) -> (i32, i32) {
    %c0_i32 = arith.constant 0 : i32
    %c0_i32_0 = arith.constant 0 : i32
    %c0_i32_1 = arith.constant 0 : i32
    return %c0_i32, %c0_i32_0 : i32, i32
  }
  func.func @transform_3(%arg0: i32) -> (i32, i32) {
    %c0_i32 = arith.constant 0 : i32
    %c0_i32_0 = arith.constant 0 : i32
    %c0_i32_1 = arith.constant 0 : i32
    return %c0_i32, %c0_i32_0 : i32, i32
  }
  func.func @transform_4(%arg0: i32) -> (i32, i32) {
    %c0_i32 = arith.constant 0 : i32
    %c0_i32_0 = arith.constant 0 : i32
    %c0_i32_1 = arith.constant 0 : i32
    return %c0_i32, %c0_i32_0 : i32, i32
  }
  func.func @transform_5(%arg0: i32) -> (i32, i32) {
    %c0_i32 = arith.constant 0 : i32
    %c0_i32_0 = arith.constant 0 : i32
    %c0_i32_1 = arith.constant 0 : i32
    return %c0_i32, %c0_i32_0 : i32, i32
  }
  func.func @transform_6(%arg0: i32) -> (i32, i32) {
    %c0_i32 = arith.constant 0 : i32
    %c0_i32_0 = arith.constant 0 : i32
    %c0_i32_1 = arith.constant 0 : i32
    return %c0_i32, %c0_i32_0 : i32, i32
  }
  func.func @transform_7(%arg0: i32) -> (i32, i32, i32, i32) {
    %c0_i32 = arith.constant 0 : i32
    %c0_i32_0 = arith.constant 0 : i32
    %c0_i32_1 = arith.constant 0 : i32
    %c0_i32_2 = arith.constant 0 : i32
    return %arg0, %c0_i32, %c0_i32_0, %c0_i32_1 : i32, i32, i32, i32
  }
  func.func @transform_8(%arg0: i32) -> (i32, i32) {
    %c0_i32 = arith.constant 0 : i32
    %c0_i32_0 = arith.constant 0 : i32
    %c0_i32_1 = arith.constant 0 : i32
    return %c0_i32, %c0_i32_0 : i32, i32
  }
  func.func @transform_9(%arg0: i32) -> (i32, i32) {
    %c0_i32 = arith.constant 0 : i32
    %c0_i32_0 = arith.constant 0 : i32
    %c0_i32_1 = arith.constant 0 : i32
    return %c0_i32, %c0_i32_0 : i32, i32
  }
}

module attributes {stable_mosaic.version = 11 : i64} {
  func.func @_bn_relu_matmul_add_kernel(%arg0: i32, %arg1: memref<256x128xbf16, #tpu.memory_space<vmem>>, %arg2: memref<1x128xf32, #tpu.memory_space<vmem>>, %arg3: memref<1x128xf32, #tpu.memory_space<vmem>>, %arg4: memref<1x128xf32, #tpu.memory_space<vmem>>, %arg5: memref<1x128xf32, #tpu.memory_space<vmem>>, %arg6: memref<128x128xbf16, #tpu.memory_space<vmem>>, %arg7: memref<256x128xf32, #tpu.memory_space<vmem>>, %arg8: memref<256x128xf32, #tpu.memory_space<vmem>>) attributes {dimension_semantics = [#tpu.dimension_semantics<parallel>], iteration_bounds = array<i64: 2>, scalar_prefetch = 0 : i64, scratch_operands = 0 : i64, tpu.core_type = #tpu.core_type<tc>, window_params = [{transform_indices = @transform_0, window_bounds = array<i64: 256, 128>}, {pipeline_mode = #tpu.pipeline_mode<synchronous>, transform_indices = @transform_1, window_bounds = array<i64: 1, 128>}, {pipeline_mode = #tpu.pipeline_mode<synchronous>, transform_indices = @transform_2, window_bounds = array<i64: 1, 128>}, {pipeline_mode = #tpu.pipeline_mode<synchronous>, transform_indices = @transform_3, window_bounds = array<i64: 1, 128>}, {pipeline_mode = #tpu.pipeline_mode<synchronous>, transform_indices = @transform_4, window_bounds = array<i64: 1, 128>}, {pipeline_mode = #tpu.pipeline_mode<synchronous>, transform_indices = @transform_5, window_bounds = array<i64: 128, 128>}, {transform_indices = @transform_6, window_bounds = array<i64: 256, 128>}, {transform_indices = @transform_7, window_bounds = array<i64: 256, 128>}]} {
    %c0 = arith.constant 0 : index
    %c0_0 = arith.constant 0 : index
    %0 = vector.load %arg1[%c0, %c0_0] : memref<256x128xbf16, #tpu.memory_space<vmem>>, vector<256x128xbf16>
    %1 = arith.extf %0 : vector<256x128xbf16> to vector<256x128xf32>
    %c0_1 = arith.constant 0 : index
    %c0_2 = arith.constant 0 : index
    %2 = vector.load %arg2[%c0_1, %c0_2] : memref<1x128xf32, #tpu.memory_space<vmem>>, vector<1x128xf32>
    %3 = vector.broadcast %2 : vector<1x128xf32> to vector<256x128xf32>
    %4 = arith.subf %1, %3 : vector<256x128xf32>
    %c0_3 = arith.constant 0 : index
    %c0_4 = arith.constant 0 : index
    %5 = vector.load %arg3[%c0_3, %c0_4] : memref<1x128xf32, #tpu.memory_space<vmem>>, vector<1x128xf32>
    %6 = vector.broadcast %5 : vector<1x128xf32> to vector<256x128xf32>
    %7 = arith.mulf %4, %6 : vector<256x128xf32>
    %c0_5 = arith.constant 0 : index
    %c0_6 = arith.constant 0 : index
    %8 = vector.load %arg4[%c0_5, %c0_6] : memref<1x128xf32, #tpu.memory_space<vmem>>, vector<1x128xf32>
    %9 = vector.broadcast %8 : vector<1x128xf32> to vector<256x128xf32>
    %10 = arith.mulf %7, %9 : vector<256x128xf32>
    %c0_7 = arith.constant 0 : index
    %c0_8 = arith.constant 0 : index
    %11 = vector.load %arg5[%c0_7, %c0_8] : memref<1x128xf32, #tpu.memory_space<vmem>>, vector<1x128xf32>
    %12 = vector.broadcast %11 : vector<1x128xf32> to vector<256x128xf32>
    %13 = arith.addf %10, %12 : vector<256x128xf32>
    %cst = arith.constant 0.000000e+00 : f32
    %14 = vector.broadcast %cst : f32 to vector<256x128xf32>
    %15 = arith.maximumf %13, %14 : vector<256x128xf32>
    %16 = arith.truncf %15 : vector<256x128xf32> to vector<256x128xbf16>
    %c0_9 = arith.constant 0 : index
    %c0_10 = arith.constant 0 : index
    %17 = vector.load %arg6[%c0_9, %c0_10] : memref<128x128xbf16, #tpu.memory_space<vmem>>, vector<128x128xbf16>
    %cst_11 = arith.constant dense<0.000000e+00> : vector<256x128xf32>
    %18 = tpu.matmul %16, %17, %cst_11 {dimension_numbers = #tpu.dot_dimension_numbers<[1], [0], [0], [1], [0, 0, 1, 1], [], []>} : vector<256x128xbf16>, vector<128x128xbf16>, vector<256x128xf32> -> vector<256x128xf32>
    %c0_12 = arith.constant 0 : index
    %c0_13 = arith.constant 0 : index
    %19 = vector.load %arg7[%c0_12, %c0_13] : memref<256x128xf32, #tpu.memory_space<vmem>>, vector<256x128xf32>
    %20 = arith.addf %18, %19 : vector<256x128xf32>
    %c0_14 = arith.constant 0 : index
    %c0_15 = arith.constant 0 : index
    %21 = vector.load %arg8[%c0_14, %c0_15] : memref<256x128xf32, #tpu.memory_space<vmem>>, vector<256x128xf32>
    tpu.vector_store %arg8[%c0_14, %c0_15], %20 {strides = array<i32>} : memref<256x128xf32, #tpu.memory_space<vmem>>, vector<256x128xf32>,
    return
  }
  func.func @transform_0(%arg0: i32) -> (i32, i32) {
    %c0_i32 = arith.constant 0 : i32
    %c0_i32_0 = arith.constant 0 : i32
    return %arg0, %c0_i32 : i32, i32
  }
  func.func @transform_1(%arg0: i32) -> (i32, i32) {
    %c0_i32 = arith.constant 0 : i32
    %c0_i32_0 = arith.constant 0 : i32
    %c0_i32_1 = arith.constant 0 : i32
    return %c0_i32, %c0_i32_0 : i32, i32
  }
  func.func @transform_2(%arg0: i32) -> (i32, i32) {
    %c0_i32 = arith.constant 0 : i32
    %c0_i32_0 = arith.constant 0 : i32
    %c0_i32_1 = arith.constant 0 : i32
    return %c0_i32, %c0_i32_0 : i32, i32
  }
  func.func @transform_3(%arg0: i32) -> (i32, i32) {
    %c0_i32 = arith.constant 0 : i32
    %c0_i32_0 = arith.constant 0 : i32
    %c0_i32_1 = arith.constant 0 : i32
    return %c0_i32, %c0_i32_0 : i32, i32
  }
  func.func @transform_4(%arg0: i32) -> (i32, i32) {
    %c0_i32 = arith.constant 0 : i32
    %c0_i32_0 = arith.constant 0 : i32
    %c0_i32_1 = arith.constant 0 : i32
    return %c0_i32, %c0_i32_0 : i32, i32
  }
  func.func @transform_5(%arg0: i32) -> (i32, i32) {
    %c0_i32 = arith.constant 0 : i32
    %c0_i32_0 = arith.constant 0 : i32
    %c0_i32_1 = arith.constant 0 : i32
    return %c0_i32, %c0_i32_0 : i32, i32
  }
  func.func @transform_6(%arg0: i32) -> (i32, i32) {
    %c0_i32 = arith.constant 0 : i32
    %c0_i32_0 = arith.constant 0 : i32
    return %arg0, %c0_i32 : i32, i32
  }
  func.func @transform_7(%arg0: i32) -> (i32, i32) {
    %c0_i32 = arith.constant 0 : i32
    %c0_i32_0 = arith.constant 0 : i32
    return %arg0, %c0_i32 : i32, i32
  }
}

</mosaic_0001>

<bundles_post_ra>
// kernel: bottleneckv2_forward.4
= control target key start
LH: loop header
LB: loop body
LE: loop exit
PB: predicated region body
PF: predicated region fallthrough
CT: control target
= control target key end

     0   :  { %s585_s9 = smov 0   ;;  %s769_s0 = inlined_call_operand.vmem [shape: f32[512,128], index: 0, kind: input, shape index: {}]   ;;  %s770_s1 = inlined_call_operand.vmem [shape: f32[1,128], index: 1, kind: output, shape index: {0}]   ;;  %s771_s2 = inlined_call_operand.vmem [shape: f32[1,128], index: 2, kind: output, shape index: {1}]  }
   0x1 LB: > { %s508_s10 = sadd.s32 4294967295, %s566_s9   ;;  %p511_p0 = scmp.ge.s32.totalorder %s566_s9, 1  ;;  %s566_s9 = sphi %s585_s9, %s13_s9  }
   0x2   : > { %p106_p1 = scmp.lt.s32.totalorder %s566_s9, 3 }
   0x4   : > { %p107_p2 = pnand %p511_p0, %p106_p1 }
   0x5   : > { %s512_s11 = sshll.u32 (!%p107_p2), %s508_s10, 5  ;;  %p514_p4 = scmp.ne.s32.totalorder (!%p107_p2), %s508_s10, 0 }
   0x6   : > { %110 = sbr.rel (%p107_p2) target bundleno = 113 (0x71), region = 24  ;;  %p124_p3 = scmp.lt.s32.totalorder (!%p107_p2), %s512_s11, 63 }
   0xb   : > { %s773_s11 = smov (!%p124_p3, %s512_s11), 63  ;;  %132 = sbr.rel (%p514_p4) target bundleno = 19 (0x13), region = 28 }
   0xc   : > { %s513_s12 = sshll.u32 %s773_s11, 3 }
   0xd   : > { %s596_s15 = scalar_lea.vmem %s769_s0, %s513_s12 }
  0x10   : > { %v568_v0 = vmov 0.0  }
  0x11   : > { %133 = vst [vmem:[%s770_s1] sm:$0x1] %v568_v0 }
  0x12   : > { %134 = vst [vmem:[%s771_s2] sm:$0x1] %v568_v0 }
  0x13 PF: > { %v167_v1 = vlaneseq  ;;  %s515_s20 = sshll.u32 %s508_s10, 8  ;;  %v135_v15 = vld [vmem:[%s596_s15] sm:$0xff]  ;;  %v136_v16 = vld [vmem:[%s596_s15 + $0x8] sm:$0xff]  ;;  %v569_v17 = vmov 0.0   ;;  %v137_v22 = vld [vmem:[%s596_s15 + $0x10] sm:$0xff] }
  0x14   : > { %v607_v4 = vstv %s515_s20  ;;  %v138_v28 = vld [vmem:[%s596_s15 + $0x18] sm:$0xff]  ;;  %v139_v33 = vld [vmem:[%s596_s15 + $0x20] sm:$0xff]  ;;  %v140_v41 = vld [vmem:[%s596_s15 + $0x28] sm:$0xff] }
  0x15   : > { %v604_v2 = vshrl.u32 %v167_v1, 7  ;;  %v141_v48 = vld [vmem:[%s596_s15 + $0x30] sm:$0xff]  ;;  %v142_v56 = vld [vmem:[%s596_s15 + $0x38] sm:$0xff]  ;;  %v143_v0 = vld [vmem:[%s596_s15 + $0x40] sm:$0xff] }
  0x17   : > { %v169_v3 = vadd.s32 8, %v604_v2  ;;  %v170_v5 = vadd.s32 16, %v604_v2  ;;  %v171_v6 = vadd.s32 24, %v604_v2  ;;  %v202_v7 = vadd.s32 %v607_v4, %v604_v2 }
  0x18   : > { %v172_v9 = vadd.s32 32, %v604_v2  ;;  %v173_v11 = vadd.s32 40, %v604_v2  ;;  %v174_v13 = vadd.s32 48, %v604_v2  ;;  %v175_v20 = vadd.s32 56, %v604_v2 }
  0x19   : > { %v203_v8 = vadd.s32 %v607_v4, %v169_v3  ;;  %v204_v10 = vadd.s32 %v607_v4, %v170_v5  ;;  %v205_v12 = vadd.s32 %v607_v4, %v171_v6  ;;  %vm234_vm0 = vcmp.lt.s32.totalorder %v202_v7, 512 }
  0x1a   : > { %v206_v14 = vadd.s32 %v607_v4, %v172_v9  ;;  %v516_v18 = vsel %vm234_vm0, 1.0, %v569_v17  ;;  %v207_v21 = vadd.s32 %v607_v4, %v173_v11  ;;  %v176_v23 = vadd.s32 64, %v604_v2 }
  0x1b   : > { %vm235_vm1 = vcmp.lt.s32.totalorder %v203_v8, 512  ;;  %vm236_vm2 = vcmp.lt.s32.totalorder %v204_v10, 512  ;;  %vm237_vm3 = vcmp.lt.s32.totalorder %v205_v12, 512  ;;  %v208_v25 = vadd.s32 %v607_v4, %v174_v13  ;;  %v144_v10 = vld [vmem:[%s596_s15 + $0x48] sm:$0xff] }
  0x1c   : > { %v517_v19 = vsel %vm235_vm1, 1.0, %v569_v17  ;;  %v518_v24 = vsel %vm236_vm2, 1.0, %v569_v17  ;;  %vm238_vm4 = vcmp.lt.s32.totalorder %v206_v14, 512  ;;  %v330_v26 = vmul.f32 %v516_v18, %v135_v15 }
  0x1d   : > { %v331_v27 = vmul.f32 %v517_v19, %v136_v16  ;;  %v519_v29 = vsel %vm237_vm3, 1.0, %v569_v17  ;;  %v177_v30 = vadd.s32 72, %v604_v2  ;;  %v209_v31 = vadd.s32 %v607_v4, %v175_v20  ;;  %v145_v19 = vld [vmem:[%s596_s15 + $0x50] sm:$0xff] }
  0x1e   : > { %vm239_vm5 = vcmp.lt.s32.totalorder %v207_v21, 512  ;;  %v332_v32 = vmul.f32 %v518_v24, %v137_v22  ;;  %v178_v34 = vadd.s32 80, %v604_v2  ;;  %v210_v35 = vadd.s32 %v607_v4, %v176_v23 }
  0x1f   : > { %v520_v36 = vsel %vm238_vm4, 1.0, %v569_v17  ;;  %v363_v37 = vadd.f32 %v331_v27, %v330_v26  ;;  %vm240_vm6 = vcmp.lt.s32.totalorder %v208_v25, 512  ;;  %v333_v38 = vmul.f32 %v519_v29, %v138_v28 }
  0x20   : > { %v403_v39 = vmul.f32 %v330_v26, %v135_v15  ;;  %v404_v40 = vmul.f32 %v331_v27, %v136_v16  ;;  %v179_v42 = vadd.s32 88, %v604_v2  ;;  %v521_v43 = vsel %vm239_vm5, 1.0, %v569_v17  ;;  %v146_v27 = vld [vmem:[%s596_s15 + $0x58] sm:$0xff] }
  0x21   : > { %v364_v44 = vadd.f32 %v363_v37, %v332_v32  ;;  %v211_v45 = vadd.s32 %v607_v4, %v177_v30  ;;  %vm241_vm7 = vcmp.lt.s32.totalorder %v209_v31, 512  ;;  %v334_v46 = vmul.f32 %v520_v36, %v139_v33 }
  0x22   : > { %v405_v47 = vmul.f32 %v332_v32, %v137_v22  ;;  %v180_v49 = vadd.s32 96, %v604_v2  ;;  %v212_v50 = vadd.s32 %v607_v4, %v178_v34  ;;  %v522_v51 = vsel %vm240_vm6, 1.0, %v569_v17 }
  0x23   : > { %v365_v52 = vadd.f32 %v364_v44, %v333_v38  ;;  %vm242_vm8 = vcmp.lt.s32.totalorder %v210_v35, 512  ;;  %v335_v53 = vmul.f32 %v521_v43, %v140_v41  ;;  %v406_v54 = vmul.f32 %v333_v38, %v138_v28  ;;  %v147_v35 = vld [vmem:[%s596_s15 + $0x60] sm:$0xff]  ;;  %v148_v43 = vld [vmem:[%s596_s15 + $0x68] sm:$0xff] }
  0x24   : > { %v435_v55 = vadd.f32 %v404_v40, %v403_v39  ;;  %v181_v57 = vadd.s32 104, %v604_v2  ;;  %v213_v58 = vadd.s32 %v607_v4, %v179_v42  ;;  %v523_v59 = vsel %vm241_vm7, 1.0, %v569_v17 }
  0x25   : > { %v366_v60 = vadd.f32 %v365_v52, %v334_v46  ;;  %vm243_vm9 = vcmp.lt.s32.totalorder %v211_v45, 512  ;;  %v336_v61 = vmul.f32 %v522_v51, %v141_v48  ;;  %v407_v62 = vmul.f32 %v334_v46, %v139_v33  ;;  %v149_v51 = vld [vmem:[%s596_s15 + $0x70] sm:$0xff] }
  0x26   : > { %v436_v63 = vadd.f32 %v435_v55, %v405_v47  ;;  %v182_v1 = vadd.s32 112, %v604_v2  ;;  %v214_v3 = vadd.s32 %v607_v4, %v180_v49  ;;  %v524_v5 = vsel %vm242_vm8, 1.0, %v569_v17 }
  0x27   : > { %v367_v6 = vadd.f32 %v366_v60, %v335_v53  ;;  %vm244_vm10 = vcmp.lt.s32.totalorder %v212_v50, 512  ;;  %v337_v7 = vmul.f32 %v523_v59, %v142_v56  ;;  %v408_v8 = vmul.f32 %v335_v53, %v140_v41  ;;  %v150_v59 = vld [vmem:[%s596_s15 + $0x78] sm:$0xff] }
  0x28   : > { %v437_v9 = vadd.f32 %v436_v63, %v406_v54  ;;  %v183_v11 = vadd.s32 120, %v604_v2  ;;  %v215_v12 = vadd.s32 %v607_v4, %v181_v57  ;;  %v525_v13 = vsel %vm243_vm9, 1.0, %v569_v17 }
  0x29   : > { %v368_v14 = vadd.f32 %v367_v6, %v336_v61  ;;  %vm245_vm11 = vcmp.lt.s32.totalorder %v213_v58, 512  ;;  %v338_v15 = vmul.f32 %v524_v5, %v143_v0  ;;  %v409_v16 = vmul.f32 %v336_v61, %v141_v48  ;;  %v151_v5 = vld [vmem:[%s596_s15 + $0x80] sm:$0xff] }
  0x2a   : > { %v438_v18 = vadd.f32 %v437_v9, %v407_v62  ;;  %v184_v20 = vadd.s32 128, %v604_v2  ;;  %v216_v21 = vadd.s32 %v607_v4, %v182_v1  ;;  %v526_v22 = vsel %vm244_vm10, 1.0, %v569_v17 }
  0x2b   : > { %v369_v23 = vadd.f32 %v368_v14, %v337_v7  ;;  %vm246_vm12 = vcmp.lt.s32.totalorder %v214_v3, 512  ;;  %v339_v24 = vmul.f32 %v525_v13, %v144_v10  ;;  %v410_v25 = vmul.f32 %v337_v7, %v142_v56  ;;  %v152_v13 = vld [vmem:[%s596_s15 + $0x88] sm:$0xff] }
  0x2c   : > { %v439_v26 = vadd.f32 %v438_v18, %v408_v8  ;;  %v185_v28 = vadd.s32 136, %v604_v2  ;;  %v217_v29 = vadd.s32 %v607_v4, %v183_v11  ;;  %v527_v30 = vsel %vm245_vm11, 1.0, %v569_v17 }
  0x2d   : > { %v370_v31 = vadd.f32 %v369_v23, %v338_v15  ;;  %vm247_vm13 = vcmp.lt.s32.totalorder %v215_v12, 512  ;;  %v340_v32 = vmul.f32 %v526_v22, %v145_v19  ;;  %v411_v33 = vmul.f32 %v338_v15, %v143_v0  ;;  %v153_v22 = vld [vmem:[%s596_s15 + $0x90] sm:$0xff] }
  0x2e   : > { %v440_v34 = vadd.f32 %v439_v26, %v409_v16  ;;  %v186_v36 = vadd.s32 144, %v604_v2  ;;  %v218_v37 = vadd.s32 %v607_v4, %v184_v20  ;;  %v528_v38 = vsel %vm246_vm12, 1.0, %v569_v17 }
  0x2f   : > { %v371_v39 = vadd.f32 %v370_v31, %v339_v24  ;;  %vm248_vm14 = vcmp.lt.s32.totalorder %v216_v21, 512  ;;  %v341_v40 = vmul.f32 %v527_v30, %v146_v27  ;;  %v412_v41 = vmul.f32 %v339_v24, %v144_v10  ;;  %v154_v30 = vld [vmem:[%s596_s15 + $0x98] sm:$0xff] }
  0x30   : > { %v441_v42 = vadd.f32 %v440_v34, %v410_v25  ;;  %v187_v44 = vadd.s32 152, %v604_v2  ;;  %v219_v45 = vadd.s32 %v607_v4, %v185_v28  ;;  %v529_v46 = vsel %vm247_vm13, 1.0, %v569_v17 }
  0x31   : > { %v372_v47 = vadd.f32 %v371_v39, %v340_v32  ;;  %vm249_vm15 = vcmp.lt.s32.totalorder %v217_v29, 512  ;;  %v342_v48 = vmul.f32 %v528_v38, %v147_v35  ;;  %v413_v49 = vmul.f32 %v340_v32, %v145_v19  ;;  %v155_v38 = vld [vmem:[%s596_s15 + $0xa0] sm:$0xff] }
  0x32   : > { %v442_v50 = vadd.f32 %v441_v42, %v411_v33  ;;  %v188_v52 = vadd.s32 160, %v604_v2  ;;  %v220_v53 = vadd.s32 %v607_v4, %v186_v36  ;;  %v530_v54 = vsel %vm248_vm14, 1.0, %v569_v17 }
  0x33   : > { %v373_v55 = vadd.f32 %v372_v47, %v341_v40  ;;  %vm250_vm0 = vcmp.lt.s32.totalorder %v218_v37, 512  ;;  %v343_v56 = vmul.f32 %v529_v46, %v148_v43  ;;  %v414_v57 = vmul.f32 %v341_v40, %v146_v27  ;;  %v156_v46 = vld [vmem:[%s596_s15 + $0xa8] sm:$0xff] }
  0x34   : > { %v443_v58 = vadd.f32 %v442_v50, %v412_v41  ;;  %v189_v60 = vadd.s32 168, %v604_v2  ;;  %v221_v61 = vadd.s32 %v607_v4, %v187_v44  ;;  %v531_v62 = vsel %vm249_vm15, 1.0, %v569_v17 }
  0x35   : > { %v374_v63 = vadd.f32 %v373_v55, %v342_v48  ;;  %vm251_vm1 = vcmp.lt.s32.totalorder %v219_v45, 512  ;;  %v344_v0 = vmul.f32 %v530_v54, %v149_v51  ;;  %v415_v1 = vmul.f32 %v342_v48, %v147_v35  ;;  %v157_v54 = vld [vmem:[%s596_s15 + $0xb0] sm:$0xff] }
  0x36   : > { %v444_v3 = vadd.f32 %v443_v58, %v413_v49  ;;  %v190_v6 = vadd.s32 176, %v604_v2  ;;  %v222_v7 = vadd.s32 %v607_v4, %v188_v52  ;;  %v532_v8 = vsel %vm250_vm0, 1.0, %v569_v17 }
  0x37   : > { %v375_v9 = vadd.f32 %v374_v63, %v343_v56  ;;  %vm252_vm2 = vcmp.lt.s32.totalorder %v220_v53, 512  ;;  %v345_v10 = vmul.f32 %v531_v62, %v150_v59  ;;  %v416_v11 = vmul.f32 %v343_v56, %v148_v43  ;;  %v158_v62 = vld [vmem:[%s596_s15 + $0xb8] sm:$0xff] }
  0x38   : > { %v445_v12 = vadd.f32 %v444_v3, %v414_v57  ;;  %v191_v14 = vadd.s32 184, %v604_v2  ;;  %v223_v15 = vadd.s32 %v607_v4, %v189_v60  ;;  %v533_v16 = vsel %vm251_vm1, 1.0, %v569_v17 }
  0x39   : > { %v376_v18 = vadd.f32 %v375_v9, %v344_v0  ;;  %vm253_vm3 = vcmp.lt.s32.totalorder %v221_v61, 512  ;;  %v346_v19 = vmul.f32 %v532_v8, %v151_v5  ;;  %v417_v20 = vmul.f32 %v344_v0, %v149_v51  ;;  %v159_v8 = vld [vmem:[%s596_s15 + $0xc0] sm:$0xff] }
  0x3a   : > { %v446_v21 = vadd.f32 %v445_v12, %v415_v1  ;;  %v192_v23 = vadd.s32 192, %v604_v2  ;;  %v224_v24 = vadd.s32 %v607_v4, %v190_v6  ;;  %v534_v25 = vsel %vm252_vm2, 1.0, %v569_v17 }
  0x3b   : > { %v377_v26 = vadd.f32 %v376_v18, %v345_v10  ;;  %vm254_vm4 = vcmp.lt.s32.totalorder %v222_v7, 512  ;;  %v347_v27 = vmul.f32 %v533_v16, %v152_v13  ;;  %v418_v28 = vmul.f32 %v345_v10, %v150_v59  ;;  %v160_v16 = vld [vmem:[%s596_s15 + $0xc8] sm:$0xff] }
  0x3c   : > { %v447_v29 = vadd.f32 %v446_v21, %v416_v11  ;;  %v193_v31 = vadd.s32 200, %v604_v2  ;;  %v225_v32 = vadd.s32 %v607_v4, %v191_v14  ;;  %v535_v33 = vsel %vm253_vm3, 1.0, %v569_v17 }
  0x3d   : > { %v378_v34 = vadd.f32 %v377_v26, %v346_v19  ;;  %vm255_vm5 = vcmp.lt.s32.totalorder %v223_v15, 512  ;;  %v348_v35 = vmul.f32 %v534_v25, %v153_v22  ;;  %v419_v36 = vmul.f32 %v346_v19, %v151_v5  ;;  %v161_v25 = vld [vmem:[%s596_s15 + $0xd0] sm:$0xff] }
  0x3e   : > { %v448_v37 = vadd.f32 %v447_v29, %v417_v20  ;;  %v194_v39 = vadd.s32 208, %v604_v2  ;;  %v226_v40 = vadd.s32 %v607_v4, %v192_v23  ;;  %v536_v41 = vsel %vm254_vm4, 1.0, %v569_v17 }
  0x3f   : > { %v379_v42 = vadd.f32 %v378_v34, %v347_v27  ;;  %vm256_vm6 = vcmp.lt.s32.totalorder %v224_v24, 512  ;;  %v349_v43 = vmul.f32 %v535_v33, %v154_v30  ;;  %v420_v44 = vmul.f32 %v347_v27, %v152_v13 }
  0x40   : > { %v449_v45 = vadd.f32 %v448_v37, %v418_v28  ;;  %v195_v47 = vadd.s32 216, %v604_v2  ;;  %v227_v48 = vadd.s32 %v607_v4, %v193_v31  ;;  %v537_v49 = vsel %vm255_vm5, 1.0, %v569_v17  ;;  %v162_v31 = vld [vmem:[%s596_s15 + $0xd8] sm:$0xff] }
  0x41   : > { %v380_v50 = vadd.f32 %v379_v42, %v348_v35  ;;  %vm257_vm7 = vcmp.lt.s32.totalorder %v225_v32, 512  ;;  %v350_v51 = vmul.f32 %v536_v41, %v155_v38  ;;  %v421_v52 = vmul.f32 %v348_v35, %v153_v22 }
  0x42   : > { %v450_v53 = vadd.f32 %v449_v45, %v419_v36  ;;  %v196_v55 = vadd.s32 224, %v604_v2  ;;  %v228_v56 = vadd.s32 %v607_v4, %v194_v39  ;;  %v538_v57 = vsel %vm256_vm6, 1.0, %v569_v17 }
  0x43   : > { %v381_v58 = vadd.f32 %v380_v50, %v349_v43  ;;  %vm258_vm8 = vcmp.lt.s32.totalorder %v226_v40, 512  ;;  %v351_v59 = vmul.f32 %v537_v49, %v156_v46  ;;  %v422_v60 = vmul.f32 %v349_v43, %v154_v30  ;;  %v165_v49 = vld [vmem:[%s596_s15 + $0xf0] sm:$0xff] }
  0x44   : > { %v451_v61 = vadd.f32 %v450_v53, %v420_v44  ;;  %v197_v63 = vadd.s32 232, %v604_v2  ;;  %v229_v0 = vadd.s32 %v607_v4, %v195_v47  ;;  %v539_v1 = vsel %vm257_vm7, 1.0, %v569_v17  ;;  %v164_v44 = vld [vmem:[%s596_s15 + $0xe8] sm:$0xff] }
  0x45   : > { %v382_v3 = vadd.f32 %v381_v58, %v350_v51  ;;  %vm259_vm9 = vcmp.lt.s32.totalorder %v227_v48, 512  ;;  %v352_v5 = vmul.f32 %v538_v57, %v157_v54  ;;  %v423_v6 = vmul.f32 %v350_v51, %v155_v38  ;;  %v163_v38 = vld [vmem:[%s596_s15 + $0xe0] sm:$0xff] }
  0x46   : > { %v452_v7 = vadd.f32 %v451_v61, %v421_v52  ;;  %v198_v9 = vadd.s32 240, %v604_v2  ;;  %v230_v10 = vadd.s32 %v607_v4, %v196_v55  ;;  %v540_v11 = vsel %vm258_vm8, 1.0, %v569_v17  ;;  %v166_v55 = vld [vmem:[%s596_s15 + $0xf8] sm:$0xff] }
  0x47   : > { %v383_v12 = vadd.f32 %v382_v3, %v351_v59  ;;  %vm260_vm10 = vcmp.lt.s32.totalorder %v228_v56, 512  ;;  %v353_v13 = vmul.f32 %v539_v1, %v158_v62  ;;  %v424_v14 = vmul.f32 %v351_v59, %v156_v46 }
  0x48   : > { %v453_v15 = vadd.f32 %v452_v7, %v422_v60  ;;  %v199_v18 = vadd.s32 248, %v604_v2  ;;  %v231_v19 = vadd.s32 %v607_v4, %v197_v63  ;;  %v541_v20 = vsel %vm259_vm9, 1.0, %v569_v17 }
  0x49   : > { %v384_v21 = vadd.f32 %v383_v12, %v352_v5  ;;  %vm261_vm11 = vcmp.lt.s32.totalorder %v229_v0, 512  ;;  %v354_v22 = vmul.f32 %v540_v11, %v159_v8  ;;  %v425_v23 = vmul.f32 %v352_v5, %v157_v54 }
  0x4a   : > { %v454_v24 = vadd.f32 %v453_v15, %v423_v6  ;;  %v232_v26 = vadd.s32 %v607_v4, %v198_v9  ;;  %v542_v27 = vsel %vm260_vm10, 1.0, %v569_v17  ;;  %vm262_vm12 = vcmp.lt.s32.totalorder %v230_v10, 512 }
  0x4b   : > { %v385_v28 = vadd.f32 %v384_v21, %v353_v13  ;;  %v355_v2 = vmul.f32 %v541_v20, %v160_v16  ;;  %v426_v29 = vmul.f32 %v353_v13, %v158_v62  ;;  %v233_v32 = vadd.s32 %v607_v4, %v199_v18  ;;  %v362_v18 = vld [vmem:[%s770_s1] sm:$0x1] }
  0x4c   : > { %v455_v30 = vadd.f32 %v454_v24, %v424_v14  ;;  %v543_v33 = vsel %vm261_vm11, 1.0, %v569_v17  ;;  %vm263_vm13 = vcmp.lt.s32.totalorder %v231_v19, 512  ;;  %v356_v35 = vmul.f32 %v542_v27, %v161_v25  ;;  %v402_v24 = vld [vmem:[%s771_s2] sm:$0x1] }
  0x4d   : > { %v386_v34 = vadd.f32 %v385_v28, %v354_v22  ;;  %v427_v36 = vmul.f32 %v354_v22, %v159_v8  ;;  %v544_v39 = vsel %vm262_vm12, 1.0, %v569_v17  ;;  %vm264_vm14 = vcmp.lt.s32.totalorder %v232_v26, 512 }
  0x4e   : > { %v456_v37 = vadd.f32 %v455_v30, %v425_v23  ;;  %v357_v41 = vmul.f32 %v543_v33, %v162_v31  ;;  %v428_v42 = vmul.f32 %v355_v2, %v160_v16  ;;  %v545_v4 = vsel %vm263_vm13, 1.0, %v569_v17 }
  0x4f   : > { %v387_v40 = vadd.f32 %v386_v34, %v355_v2  ;;  %vm265_vm15 = vcmp.lt.s32.totalorder %v233_v32, 512  ;;  %v358_v46 = vmul.f32 %v544_v39, %v163_v38  ;;  %v429_v47 = vmul.f32 %v356_v35, %v161_v25 }
  0x50   : > { %v457_v43 = vadd.f32 %v456_v37, %v426_v29  ;;  %v546_v50 = vsel %vm264_vm14, 1.0, %v569_v17  ;;  %v359_v52 = vmul.f32 %v545_v4, %v164_v44  ;;  %v430_v53 = vmul.f32 %v357_v41, %v162_v31 }
  0x51   : > { %v388_v45 = vadd.f32 %v387_v40, %v356_v35  ;;  %v547_v56 = vsel %vm265_vm15, 1.0, %v569_v17  ;;  %v360_v58 = vmul.f32 %v546_v50, %v165_v49  ;;  %v431_v59 = vmul.f32 %v358_v46, %v163_v38 }
  0x52   : > { %v458_v48 = vadd.f32 %v457_v43, %v427_v36  ;;  %v361_v62 = vmul.f32 %v547_v56, %v166_v55  ;;  %v432_v63 = vmul.f32 %v359_v52, %v164_v44 }
  0x53   : > { %v389_v51 = vadd.f32 %v388_v45, %v357_v41  ;;  %v433_v3 = vmul.f32 %v360_v58, %v165_v49 }
  0x54   : > { %v459_v54 = vadd.f32 %v458_v48, %v428_v42  ;;  %v434_v7 = vmul.f32 %v361_v62, %v166_v55 }
  0x55   : > { %v390_v57 = vadd.f32 %v389_v51, %v358_v46 }
  0x56   : > { %v460_v60 = vadd.f32 %v459_v54, %v429_v47 }
  0x57   : > { %v391_v61 = vadd.f32 %v390_v57, %v359_v52 }
  0x58   : > { %v461_v0 = vadd.f32 %v460_v60, %v430_v53 }
  0x59   : > { %v392_v1 = vadd.f32 %v391_v61, %v360_v58 }
  0x5a   : > { %v462_v5 = vadd.f32 %v461_v0, %v431_v59 }
  0x5b   : > { %v393_v6 = vadd.f32 %v392_v1, %v361_v62 }
  0x5c   : > { %v463_v8 = vadd.f32 %v462_v5, %v432_v63 }
  0x5d   : > { %v394_v9 = vrot.slane %v393_v6, 4 }
  0x5e   : > { %v464_v10 = vadd.f32 %v463_v8, %v433_v3 }
  0x5f   : > { %v395_v11 = vadd.f32 %v394_v9, %v393_v6 }
  0x60   : > { %v465_v12 = vadd.f32 %v464_v10, %v434_v7 }
  0x61   : > { %v396_v13 = vrot.slane %v395_v11, 2 }
  0x62   : > { %v466_v17 = vrot.slane %v465_v12, 4 }
  0x63   : > { %v397_v14 = vadd.f32 %v396_v13, %v395_v11 }
  0x64   : > { %v467_v15 = vadd.f32 %v466_v17, %v465_v12 }
  0x65   : > { %v398_v16 = vrot.slane %v397_v14, 1 }
  0x66   : > { %v468_v19 = vrot.slane %v467_v15, 2 }
  0x67   : > { %v399_v20 = vadd.f32 %v398_v16, %v397_v14 }
  0x68   : > { %v469_v21 = vadd.f32 %v468_v19, %v467_v15 }
  0x69   : > { %v400_v22 = vadd.f32 %v399_v20, %v362_v18 }
  0x6a   : > { %v470_v23 = vrot.slane %v469_v21, 1 }
  0x6b   : > { %401 = vst [vmem:[%s770_s1] sm:$0x1] %v400_v22 }
  0x6c   : > { %v471_v25 = vadd.f32 %v470_v23, %v469_v21 }
  0x6e   : > { %v472_v26 = vadd.f32 %v471_v25, %v402_v24 }
  0x70   : > { %473 = vst [vmem:[%s771_s2] sm:$0x1] %v472_v26 }
  0x71 PF: > { %s13_s9 = sadd.s32 1, %s566_s9  }
  0x72   : > { %p10_p5 = scmp.ge.s32.totalorder %s13_s9, 4  }
  0x74   :  { %12 = sbr.rel (!%p10_p5) target bundleno = 1 (0x1), region = 62 }

// kernel: bottleneckv2_forward.5
= control target key start
LH: loop header
LB: loop body
LE: loop exit
PB: predicated region body
PF: predicated region fallthrough
CT: control target
= control target key end

     0   :  { %s1399_s27 = smov 0   ;;  %s1920_s0 = inlined_call_operand.vmem [shape: f32[512,128], index: 0, kind: input, shape index: {}]   ;;  %s1921_s1 = inlined_call_operand.vmem [shape: f32[1,128], index: 1, kind: input, shape index: {}]   ;;  %s1922_s2 = inlined_call_operand.vmem [shape: f32[1,128], index: 2, kind: input, shape index: {}]   ;;  %s1923_s3 = inlined_call_operand.vmem [shape: f32[1,128], index: 3, kind: input, shape index: {}]   ;;  %s1924_s4 = inlined_call_operand.vmem [shape: f32[1,128], index: 4, kind: input, shape index: {}]   ;;  %s1925_s5 = inlined_call_operand.vmem [shape: bf16[128,128], index: 5, kind: input, shape index: {}]   ;;  %s1926_s6 = inlined_call_operand.vmem [shape: bf16[512,128], index: 6, kind: output, shape index: {0}]   ;;  %s1927_s7 = inlined_call_operand.vmem [shape: f32[1,128], index: 7, kind: output, shape index: {1}]   ;;  %s1928_s8 = inlined_call_operand.vmem [shape: f32[1,128], index: 8, kind: output, shape index: {2}]  }
   0x1 LB: > { %s1405_s28 = sadd.s32 4294967295, %s1350_s27   ;;  %p1130_p0 = scmp.ge.s32.totalorder %s1350_s27, 1  ;;  %s1350_s27 = sphi %s1399_s27, %s19_s27  }
   0x2   : > { %p258_p1 = scmp.lt.s32.totalorder %s1350_s27, 3 }
   0x4   : > { %p259_p2 = pnand %p1130_p0, %p258_p1 }
   0x5   : > { %s1131_s29 = sshll.u32 (!%p259_p2), %s1405_s28, 5  ;;  %p1135_p4 = scmp.ne.s32.totalorder (!%p259_p2), %s1405_s28, 0 }
   0x6   : > { %262 = sbr.rel (%p259_p2) target bundleno = 302 (0x12e), region = 44  ;;  %p293_p3 = scmp.lt.s32.totalorder (!%p259_p2), %s1131_s29, 63 }
   0xb   : > { %s1930_s29 = smov (!%p293_p3, %s1131_s29), 63  ;;  %307 = sbr.rel (%p1135_p4) target bundleno = 19 (0x13), region = 48 }
   0xc   : > { %s1132_s30 = sshll.u32 %s1930_s29, 3  ;;  %s1134_s9 = sshll.u32 %s1930_s29, 2 }
   0xd   : > { %s1413_s12 = scalar_lea.vmem %s1920_s0, %s1132_s30  ;;  %s1418_s15 = scalar_lea.vmem %s1926_s6, %s1134_s9 }
  0x10   : > { %v1352_v0 = vmov 0.0  }
  0x11   : > { %308 = vst [vmem:[%s1927_s7] sm:$0x1] %v1352_v0 }
  0x12   : > { %309 = vst [vmem:[%s1928_s8] sm:$0x1] %v1352_v0 }
  0x13 PF: > { %v1210_v1 = vld [vmem:[%s1925_s5 + $0x38] sm:$0xff]  ;;  %v1209_v2 = vld [vmem:[%s1925_s5 + $0x30] sm:$0xff]  ;;  %v1436_v3 = vld [vmem:[%s1921_s1] ss:$0 sm:$0xff] }
  0x14   : > { %598 = vmatpush.bf16.msra.mxu0 %v1210_v1  ;;  %1306 = vmatpush.bf16.msra.mxu1 %v1210_v1  ;;  %v310_v4 = vld [vmem:[%s1413_s12] sm:$0xff]  ;;  %v311_v5 = vld [vmem:[%s1413_s12 + $0x8] sm:$0xff]  ;;  %v1206_v24 = vld [vmem:[%s1925_s5 + $0x18] sm:$0xff] }
  0x15   : > { %1307 = vmatpush.bf16.msra.mxu2 %v1210_v1  ;;  %1308 = vmatpush.bf16.msra.mxu3 %v1210_v1  ;;  %v1208_v6 = vld [vmem:[%s1925_s5 + $0x28] sm:$0xff]  ;;  %v318_v7 = vld [vmem:[%s1413_s12 + $0x40] sm:$0xff]  ;;  %v346_v9 = vsub.f32 %v310_v4, %v1436_v3  ;;  %v347_v13 = vsub.f32 %v311_v5, %v1436_v3  ;;  %v1205_v32 = vld [vmem:[%s1925_s5 + $0x10] sm:$0xff] }
  0x16   : > { %v319_v8 = vld [vmem:[%s1413_s12 + $0x48] sm:$0xff]  ;;  %v1449_v10 = vld [vmem:[%s1922_s2] ss:$0 sm:$0xff]  ;;  %v354_v14 = vsub.f32 %v318_v7, %v1436_v3  ;;  %v312_v39 = vld [vmem:[%s1413_s12 + $0x10] sm:$0xff] }
  0x17   : > { %v326_v11 = vld [vmem:[%s1413_s12 + $0x80] sm:$0xff]  ;;  %v327_v12 = vld [vmem:[%s1413_s12 + $0x88] sm:$0xff]  ;;  %v355_v15 = vsub.f32 %v319_v8, %v1436_v3  ;;  %v382_v19 = vmul.f32 %v1449_v10, %v346_v9  ;;  %v383_v21 = vmul.f32 %v1449_v10, %v347_v13  ;;  %v313_v40 = vld [vmem:[%s1413_s12 + $0x18] sm:$0xff]  ;;  %v348_v50 = vsub.f32 %v312_v39, %v1436_v3 }
  0x18   : > { %599 = vmatpush.bf16.msra.mxu0 %v1209_v2  ;;  %1309 = vmatpush.bf16.msra.mxu1 %v1209_v2  ;;  %v1207_v16 = vld [vmem:[%s1925_s5 + $0x20] sm:$0xff]  ;;  %v362_v17 = vsub.f32 %v326_v11, %v1436_v3  ;;  %v363_v18 = vsub.f32 %v327_v12, %v1436_v3  ;;  %v390_v22 = vmul.f32 %v1449_v10, %v354_v14  ;;  %v1204_v41 = vld [vmem:[%s1925_s5 + $0x8] sm:$0xff]  ;;  %v320_v42 = vld [vmem:[%s1413_s12 + $0x50] sm:$0xff] }
  0x19   : > { %1310 = vmatpush.bf16.msra.mxu2 %v1209_v2  ;;  %1311 = vmatpush.bf16.msra.mxu3 %v1209_v2  ;;  %v1465_v20 = vld [vmem:[%s1923_s3] ss:$0 sm:$0xff]  ;;  %v391_v23 = vmul.f32 %v1449_v10, %v355_v15  ;;  %v321_v46 = vld [vmem:[%s1413_s12 + $0x58] sm:$0xff]  ;;  %v328_v47 = vld [vmem:[%s1413_s12 + $0x90] sm:$0xff]  ;;  %v349_v51 = vsub.f32 %v313_v40, %v1436_v3  ;;  %v356_v57 = vsub.f32 %v320_v42, %v1436_v3 }
  0x1a   : > { %v398_v25 = vmul.f32 %v1449_v10, %v362_v17  ;;  %v399_v26 = vmul.f32 %v1449_v10, %v363_v18  ;;  %v418_v27 = vmul.f32 %v1465_v20, %v382_v19  ;;  %v1479_v28 = vld [vmem:[%s1924_s4] ss:$0 sm:$0xff]  ;;  %v419_v29 = vmul.f32 %v1465_v20, %v383_v21  ;;  %v335_v48 = vld [vmem:[%s1413_s12 + $0xc8] sm:$0xff]  ;;  %v329_v52 = vld [vmem:[%s1413_s12 + $0x98] sm:$0xff] }
  0x1b   : > { %v426_v30 = vmul.f32 %v1465_v20, %v390_v22  ;;  %v427_v31 = vmul.f32 %v1465_v20, %v391_v23  ;;  %v334_v43 = vld [vmem:[%s1413_s12 + $0xc0] sm:$0xff]  ;;  %v357_v58 = vsub.f32 %v321_v46, %v1436_v3  ;;  %v364_v59 = vsub.f32 %v328_v47, %v1436_v3  ;;  %v323_v40 = vld [vmem:[%s1413_s12 + $0x68] sm:$0xff] }
  0x1c   : > { %600 = vmatpush.bf16.msra.mxu0 %v1208_v6  ;;  %1312 = vmatpush.bf16.msra.mxu1 %v1208_v6  ;;  %v434_v33 = vmul.f32 %v1465_v20, %v398_v25  ;;  %v435_v34 = vmul.f32 %v1465_v20, %v399_v26  ;;  %v454_v35 = vadd.f32 %v1479_v28, %v418_v27  ;;  %v1203_v61 = vld [vmem:[%s1925_s5] sm:$0xff]  ;;  %v315_v25 = vld [vmem:[%s1413_s12 + $0x28] sm:$0xff] }
  0x1d   : > { %1313 = vmatpush.bf16.msra.mxu2 %v1208_v6  ;;  %1314 = vmatpush.bf16.msra.mxu3 %v1208_v6  ;;  %v455_v36 = vadd.f32 %v1479_v28, %v419_v29  ;;  %v462_v37 = vadd.f32 %v1479_v28, %v426_v30  ;;  %v463_v38 = vadd.f32 %v1479_v28, %v427_v31  ;;  %v314_v21 = vld [vmem:[%s1413_s12 + $0x20] sm:$0xff] }
  0x1e   : > { %v470_v44 = vadd.f32 %v1479_v28, %v434_v33  ;;  %v471_v45 = vadd.f32 %v1479_v28, %v435_v34  ;;  %v486_v49 = vmax.f32 %v454_v35, 0.0  ;;  %v370_v56 = vsub.f32 %v334_v43, %v1436_v3  ;;  %v336_v35 = vld [vmem:[%s1413_s12 + $0xd0] sm:$0xff]  ;;  %v322_v39 = vld [vmem:[%s1413_s12 + $0x60] sm:$0xff] }
  0x1f   : > { %v487_v53 = vmax.f32 %v455_v36, 0.0  ;;  %v494_v54 = vmax.f32 %v462_v37, 0.0  ;;  %v495_v55 = vmax.f32 %v463_v38, 0.0  ;;  %v371_v60 = vsub.f32 %v335_v48, %v1436_v3  ;;  %v330_v48 = vld [vmem:[%s1413_s12 + $0xa0] sm:$0xff] }
  0x20   : > { %601 = vmatpush.bf16.msra.mxu0 %v1207_v16  ;;  %1315 = vmatpush.bf16.msra.mxu1 %v1207_v16  ;;  %v502_v62 = vmax.f32 %v470_v44, 0.0  ;;  %v503_v63 = vmax.f32 %v471_v45, 0.0  ;;  %v365_v0 = vsub.f32 %v329_v52, %v1436_v3  ;;  %v406_v1 = vmul.f32 %v1449_v10, %v370_v56 }
  0x21   : > { %1316 = vmatpush.bf16.msra.mxu2 %v1207_v16  ;;  %1317 = vmatpush.bf16.msra.mxu3 %v1207_v16  ;;  %v384_v2 = vmul.f32 %v1449_v10, %v348_v50  ;;  %v385_v4 = vmul.f32 %v1449_v10, %v349_v51  ;;  %v407_v5 = vmul.f32 %v1449_v10, %v371_v60 }
  0x22   : > { %v518_v6 = vpack.c.bf16 %v487_v53, %v486_v49  ;;  %v522_v7 = vpack.c.bf16 %v495_v55, %v494_v54  ;;  %v442_v8 = vmul.f32 %v1465_v20, %v406_v1  ;;  %v392_v9 = vmul.f32 %v1449_v10, %v356_v57  ;;  %v331_v49 = vld [vmem:[%s1413_s12 + $0xa8] sm:$0xff] }
  0x23   : > { %v393_v11 = vmul.f32 %v1449_v10, %v357_v58  ;;  %v400_v12 = vmul.f32 %v1449_v10, %v364_v59  ;;  %v443_v13 = vmul.f32 %v1465_v20, %v407_v5  ;;  %v526_v14 = vpack.c.bf16 %v503_v63, %v502_v62 }
  0x24   : > { %602 = vmatpush.bf16.msra.mxu0 %v1206_v24  ;;  %1318 = vmatpush.bf16.msra.mxu1 %v1206_v24  ;;  %v401_v15 = vmul.f32 %v1449_v10, %v365_v0  ;;  %v478_v16 = vadd.f32 %v1479_v28, %v442_v8  ;;  %v420_v17 = vmul.f32 %v1465_v20, %v384_v2 }
  0x25   : > { %1319 = vmatpush.bf16.msra.mxu2 %v1206_v24  ;;  %1320 = vmatpush.bf16.msra.mxu3 %v1206_v24  ;;  %v421_v18 = vmul.f32 %v1465_v20, %v385_v4  ;;  %v479_v19 = vadd.f32 %v1479_v28, %v443_v13  ;;  %v428_v23 = vmul.f32 %v1465_v20, %v392_v9 }
  0x26   : > { %v510_v22 = vmax.f32 %v478_v16, 0.0  ;;  %v429_v24 = vmul.f32 %v1465_v20, %v393_v11  ;;  %v436_v26 = vmul.f32 %v1465_v20, %v400_v12  ;;  %v437_v29 = vmul.f32 %v1465_v20, %v401_v15 }
  0x27   : > { %v511_v27 = vmax.f32 %v479_v19, 0.0  ;;  %v456_v30 = vadd.f32 %v1479_v28, %v420_v17  ;;  %v457_v31 = vadd.f32 %v1479_v28, %v421_v18  ;;  %v351_v34 = vsub.f32 %v315_v25, %v1436_v3 }
  0x28   : > { %603 = vmatpush.bf16.msra.mxu0 %v1205_v32  ;;  %1321 = vmatpush.bf16.msra.mxu1 %v1205_v32  ;;  %v464_v36 = vadd.f32 %v1479_v28, %v428_v23  ;;  %v465_v37 = vadd.f32 %v1479_v28, %v429_v24  ;;  %v472_v38 = vadd.f32 %v1479_v28, %v436_v26  ;;  %v339_v23 = vld [vmem:[%s1413_s12 + $0xe8] sm:$0xff] }
  0x29   : > { %1322 = vmatpush.bf16.msra.mxu2 %v1205_v32  ;;  %1323 = vmatpush.bf16.msra.mxu3 %v1205_v32  ;;  %v350_v32 = vsub.f32 %v314_v21, %v1436_v3  ;;  %v530_v33 = vpack.c.bf16 %v511_v27, %v510_v22  ;;  %v372_v42 = vsub.f32 %v336_v35, %v1436_v3  ;;  %v488_v45 = vmax.f32 %v456_v30, 0.0  ;;  %v338_v22 = vld [vmem:[%s1413_s12 + $0xe0] sm:$0xff]  ;;  %v317_v30 = vld [vmem:[%s1413_s12 + $0x38] sm:$0xff] }
  0x2a   : > { %v473_v43 = vadd.f32 %v1479_v28, %v437_v29  ;;  %v489_v46 = vmax.f32 %v457_v31, 0.0  ;;  %v387_v51 = vmul.f32 %v1449_v10, %v351_v34  ;;  %v358_v52 = vsub.f32 %v322_v39, %v1436_v3  ;;  %v316_v29 = vld [vmem:[%s1413_s12 + $0x30] sm:$0xff] }
  0x2b   : > { %v386_v47 = vmul.f32 %v1449_v10, %v350_v32  ;;  %v408_v50 = vmul.f32 %v1449_v10, %v372_v42  ;;  %v359_v53 = vsub.f32 %v323_v40, %v1436_v3  ;;  %v496_v55 = vmax.f32 %v464_v36, 0.0  ;;  %v324_v31 = vld [vmem:[%s1413_s12 + $0x70] sm:$0xff]  ;;  %v325_v32 = vld [vmem:[%s1413_s12 + $0x78] sm:$0xff] }
  0x2c   : > { %604 = vmatpush.bf16.msra.mxu0 %v1204_v41  ;;  %1324 = vmatpush.bf16.msra.mxu1 %v1204_v41  ;;  %v497_v56 = vmax.f32 %v465_v37, 0.0  ;;  %v504_v57 = vmax.f32 %v472_v38, 0.0  ;;  %v505_v59 = vmax.f32 %v473_v43, 0.0  ;;  %v366_v60 = vsub.f32 %v330_v48, %v1436_v3  ;;  %v333_v42 = vld [vmem:[%s1413_s12 + $0xb8] sm:$0xff] }
  0x2d   : > { %1325 = vmatpush.bf16.msra.mxu2 %v1204_v41  ;;  %1326 = vmatpush.bf16.msra.mxu3 %v1204_v41  ;;  %v337_v41 = vld [vmem:[%s1413_s12 + $0xd8] sm:$0xff]  ;;  %v444_v58 = vmul.f32 %v1465_v20, %v408_v50  ;;  %v519_v0 = vpack.c.bf16 %v489_v46, %v488_v45  ;;  %v394_v1 = vmul.f32 %v1449_v10, %v358_v52 }
  0x2e   : > { %v373_v44 = vsub.f32 %v337_v41, %v1436_v3  ;;  %v395_v2 = vmul.f32 %v1449_v10, %v359_v53  ;;  %v523_v5 = vpack.c.bf16 %v497_v56, %v496_v55  ;;  %v527_v9 = vpack.c.bf16 %v505_v59, %v504_v57  ;;  %v332_v41 = vld [vmem:[%s1413_s12 + $0xb0] sm:$0xff]  ;;  %v341_v56 = vld [vmem:[%s1413_s12 + $0xf8] sm:$0xff] }
  0x2f   : > { %v480_v63 = vadd.f32 %v1479_v28, %v444_v58  ;;  %v402_v11 = vmul.f32 %v1449_v10, %v366_v60  ;;  %v374_v24 = vsub.f32 %v338_v22, %v1436_v3  ;;  %v375_v25 = vsub.f32 %v339_v23, %v1436_v3  ;;  %v340_v55 = vld [vmem:[%s1413_s12 + $0xf0] sm:$0xff]  ;;  %s1168_s12 = sshll.u32 %s1405_s28, 8 }
  0x30   : > { %605 = vmatpush.bf16.msra.mxu0 %v1203_v61  ;;  %1327 = vmatpush.bf16.msra.mxu1 %v1203_v61  ;;  %v409_v54 = vmul.f32 %v1449_v10, %v373_v44  ;;  %v431_v15 = vmul.f32 %v1465_v20, %v395_v2  ;;  %v352_v39 = vsub.f32 %v316_v29, %v1436_v3 }
  0x31   : > { %1328 = vmatpush.bf16.msra.mxu2 %v1203_v61  ;;  %1329 = vmatpush.bf16.msra.mxu3 %v1203_v61  ;;  %v367_v61 = vsub.f32 %v331_v49, %v1436_v3  ;;  %v512_v8 = vmax.f32 %v480_v63, 0.0  ;;  %v438_v19 = vmul.f32 %v1465_v20, %v402_v11  ;;  %v411_v34 = vmul.f32 %v1449_v10, %v375_v25 }
  0x32   : > { %v445_v62 = vmul.f32 %v1465_v20, %v409_v54  ;;  %v467_v27 = vadd.f32 %v1479_v28, %v431_v15  ;;  %v353_v40 = vsub.f32 %v317_v30, %v1436_v3  ;;  %v361_v48 = vsub.f32 %v325_v32, %v1436_v3 }
  0x33   : > { %606 = vmatmul.bf16.vlgmr.msra.gmra.mxu0 %v518_v6  ;;  %626 = vmatmul.bf16.vlgmr.msra.gmra.mxu1 %v522_v7  ;;  %v422_v6 = vmul.f32 %v1465_v20, %v386_v47  ;;  %v423_v7 = vmul.f32 %v1465_v20, %v387_v51  ;;  %v403_v12 = vmul.f32 %v1449_v10, %v367_v61 }
  0x34   : > { %646 = vmatmul.bf16.vlgmr.msra.gmra.mxu2 %v526_v14  ;;  %666 = vmatmul.bf16.vlgmr.msra.gmra.mxu3 %v530_v33  ;;  %v481_v4 = vadd.f32 %v1479_v28, %v445_v62  ;;  %v430_v14 = vmul.f32 %v1465_v20, %v394_v1  ;;  %v410_v33 = vmul.f32 %v1449_v10, %v374_v24  ;;  %v499_v46 = vmax.f32 %v467_v27, 0.0 }
  0x35   : > { %v458_v17 = vadd.f32 %v1479_v28, %v422_v6  ;;  %v459_v18 = vadd.f32 %v1479_v28, %v423_v7  ;;  %v439_v21 = vmul.f32 %v1465_v20, %v403_v12  ;;  %v474_v37 = vadd.f32 %v1479_v28, %v438_v19 }
  0x36   : > { %v513_v13 = vmax.f32 %v481_v4, 0.0  ;;  %v466_v26 = vadd.f32 %v1479_v28, %v430_v14  ;;  %v446_v43 = vmul.f32 %v1465_v20, %v410_v33  ;;  %v447_v44 = vmul.f32 %v1465_v20, %v411_v34 }
  0x37   : > { %v490_v35 = vmax.f32 %v458_v17, 0.0  ;;  %v491_v36 = vmax.f32 %v459_v18, 0.0  ;;  %v475_v38 = vadd.f32 %v1479_v28, %v439_v21  ;;  %v360_v47 = vsub.f32 %v324_v31, %v1436_v3 }
  0x38   : > { %v531_v16 = vpack.c.bf16 %v513_v13, %v512_v8  ;;  %v498_v45 = vmax.f32 %v466_v26, 0.0  ;;  %v482_v49 = vadd.f32 %v1479_v28, %v446_v43  ;;  %v483_v50 = vadd.f32 %v1479_v28, %v447_v44 }
  0x39   : > { %v506_v51 = vmax.f32 %v474_v37, 0.0  ;;  %v507_v52 = vmax.f32 %v475_v38, 0.0  ;;  %v368_v53 = vsub.f32 %v332_v41, %v1436_v3  ;;  %v369_v54 = vsub.f32 %v333_v42, %v1436_v3 }
  0x3a   : > { %v520_v57 = vpack.c.bf16 %v491_v36, %v490_v35  ;;  %v388_v58 = vmul.f32 %v1449_v10, %v352_v39  ;;  %v524_v59 = vpack.c.bf16 %v499_v46, %v498_v45  ;;  %v389_v60 = vmul.f32 %v1449_v10, %v353_v40 }
  0x3b   : > { %v396_v61 = vmul.f32 %v1449_v10, %v360_v47  ;;  %v397_v62 = vmul.f32 %v1449_v10, %v361_v48  ;;  %v514_v63 = vmax.f32 %v482_v49, 0.0  ;;  %v376_v1 = vsub.f32 %v340_v55, %v1436_v3 }
  0x3c   : > { %v377_v2 = vsub.f32 %v341_v56, %v1436_v3  ;;  %v528_v4 = vpack.c.bf16 %v507_v52, %v506_v51  ;;  %v405_v6 = vmul.f32 %v1449_v10, %v369_v54  ;;  %v424_v7 = vmul.f32 %v1465_v20, %v388_v58 }
  0x3d   : > { %v425_v8 = vmul.f32 %v1465_v20, %v389_v60  ;;  %v433_v11 = vmul.f32 %v1465_v20, %v397_v62  ;;  %v412_v13 = vmul.f32 %v1449_v10, %v376_v1  ;;  %v1680_v60 = vstv %s1168_s12 }
  0x3e   : > { %v413_v3 = vmul.f32 %v1449_v10, %v377_v2  ;;  %v441_v15 = vmul.f32 %v1465_v20, %v405_v6 }
  0x3f   : > { %v461_v17 = vadd.f32 %v1479_v28, %v425_v8  ;;  %v469_v19 = vadd.f32 %v1479_v28, %v433_v11  ;;  %v448_v21 = vmul.f32 %v1465_v20, %v412_v13  ;;  %v1353_v13 = vmov 0.0  }
  0x40   : > { %v449_v22 = vmul.f32 %v1465_v20, %v413_v3  ;;  %v477_v23 = vadd.f32 %v1479_v28, %v441_v15 }
  0x41   : > { %v493_v25 = vmax.f32 %v461_v17, 0.0  ;;  %v501_v27 = vmax.f32 %v469_v19, 0.0  ;;  %v484_v29 = vadd.f32 %v1479_v28, %v448_v21 }
  0x42   : > { %v485_v30 = vadd.f32 %v1479_v28, %v449_v22  ;;  %v509_v32 = vmax.f32 %v477_v23, 0.0 }
  0x43   : > { %611 = vmatmul.bf16.gmra.mxu0 %v519_v0  ;;  %631 = vmatmul.bf16.gmra.mxu1 %v523_v5  ;;  %v515_v0 = vmax.f32 %v483_v50, 0.0  ;;  %v404_v5 = vmul.f32 %v1449_v10, %v368_v53  ;;  %v516_v35 = vmax.f32 %v484_v29, 0.0  ;;  %v751_v50 = vlaneseq }
  0x44   : > { %651 = vmatmul.bf16.gmra.mxu2 %v527_v9  ;;  %671 = vmatmul.bf16.gmra.mxu3 %v531_v16  ;;  %v432_v9 = vmul.f32 %v1465_v20, %v396_v61  ;;  %v460_v16 = vadd.f32 %v1479_v28, %v424_v7  ;;  %v517_v36 = vmax.f32 %v485_v30, 0.0 }
  0x45   : > { %v532_v12 = vpack.c.bf16 %v515_v0, %v514_v63  ;;  %v440_v14 = vmul.f32 %v1465_v20, %v404_v5  ;;  %v1663_v52 = vshrl.u32 %v751_v50, 7 }
  0x46   : > { %v468_v18 = vadd.f32 %v1479_v28, %v432_v9  ;;  %v492_v24 = vmax.f32 %v460_v16, 0.0  ;;  %v533_v37 = vpack.c.bf16 %v517_v36, %v516_v35 }
  0x47   : > { %v476_v10 = vadd.f32 %v1479_v28, %v440_v14  ;;  %v753_v56 = vadd.s32 8, %v1663_v52  ;;  %v754_v61 = vadd.s32 16, %v1663_v52  ;;  %v755_v63 = vadd.s32 24, %v1663_v52 }
  0x48   : > { %v500_v26 = vmax.f32 %v468_v18, 0.0  ;;  %v521_v33 = vpack.c.bf16 %v493_v25, %v492_v24  ;;  %v786_v0 = vadd.s32 %v1680_v60, %v1663_v52  ;;  %v756_v5 = vadd.s32 32, %v1663_v52 }
  0x49   : > { %v508_v31 = vmax.f32 %v476_v10, 0.0  ;;  %v787_v62 = vadd.s32 %v1680_v60, %v753_v56  ;;  %v788_v2 = vadd.s32 %v1680_v60, %v754_v61  ;;  %v789_v8 = vadd.s32 %v1680_v60, %v755_v63 }
  0x4a   : > { %v525_v34 = vpack.c.bf16 %v501_v27, %v500_v26  ;;  %v757_v9 = vadd.s32 40, %v1663_v52  ;;  %vm818_vm1 = vcmp.lt.s32.totalorder %v786_v0, 512  ;;  %v790_v14 = vadd.s32 %v1680_v60, %v756_v5 }
  0x4b   : > { %v529_v20 = vpack.c.bf16 %v509_v32, %v508_v31  ;;  %vm819_vm0 = vcmp.lt.s32.totalorder %v787_v62, 512  ;;  %vm820_vm2 = vcmp.lt.s32.totalorder %v788_v2, 512  ;;  %vm821_vm3 = vcmp.lt.s32.totalorder %v789_v8, 512 }
  0x4c   : > { %v1170_v3 = vsel %vm819_vm0, 1.0, %v1353_v13  ;;  %v758_v15 = vadd.s32 48, %v1663_v52  ;;  %v1169_v16 = vsel %vm818_vm1, 1.0, %v1353_v13  ;;  %v791_v17 = vadd.s32 %v1680_v60, %v757_v9 }
  0x4d   : > { %v760_v18 = vadd.s32 64, %v1663_v52  ;;  %v1171_v21 = vsel %vm820_vm2, 1.0, %v1353_v13  ;;  %v761_v10 = vadd.s32 72, %v1663_v52  ;;  %v762_v23 = vadd.s32 80, %v1663_v52 }
  0x4e   : > { %v1172_v24 = vsel %vm821_vm3, 1.0, %v1353_v13  ;;  %vm822_vm4 = vcmp.lt.s32.totalorder %v790_v14, 512  ;;  %v792_v31 = vadd.s32 %v1680_v60, %v758_v15  ;;  %vm823_vm5 = vcmp.lt.s32.totalorder %v791_v17, 512 }
  0x4f   : > { %v1173_v36 = vsel %vm822_vm4, 1.0, %v1353_v13  ;;  %v796_v50 = vadd.s32 %v1680_v60, %v762_v23  ;;  %v763_v56 = vadd.s32 88, %v1663_v52  ;;  %v765_v23 = vadd.s32 104, %v1663_v52 }
  0x50   : > { %vm824_vm6 = vcmp.lt.s32.totalorder %v792_v31, 512 }
  0x51   : > { %v1175_v5 = vsel %vm824_vm6, 1.0, %v1353_v13  ;;  %vm828_vm9 = vcmp.lt.s32.totalorder %v796_v50, 512  ;;  %v767_v50 = vadd.s32 120, %v1663_v52 }
  0x53   : > { %616 = vmatmul.bf16.gmra.mxu0 %v520_v57  ;;  %636 = vmatmul.bf16.gmra.mxu1 %v524_v59 }
  0x54   : > { %656 = vmatmul.bf16.gmra.mxu2 %v528_v4  ;;  %676 = vmatmul.bf16.gmra.mxu3 %v532_v12 }
  0x63   : > { %621 = vmatmul.bf16.gmra.mxu0 %v521_v33  ;;  %641 = vmatmul.bf16.gmra.mxu1 %v525_v34  ;;  %v794_v34 = vadd.s32 %v1680_v60, %v760_v18 }
  0x64   : > { %661 = vmatmul.bf16.gmra.mxu2 %v529_v20  ;;  %681 = vmatmul.bf16.gmra.mxu3 %v533_v37  ;;  %v759_v20 = vadd.s32 56, %v1663_v52  ;;  %v795_v37 = vadd.s32 %v1680_v60, %v761_v10 }
  0x65   : > { %vm826_vm7 = vcmp.lt.s32.totalorder %v794_v34, 512 }
  0x66   : > { %v793_v62 = vadd.s32 %v1680_v60, %v759_v20  ;;  %vm827_vm8 = vcmp.lt.s32.totalorder %v795_v37, 512 }
  0x68   : > { %vm825_vm10 = vcmp.lt.s32.totalorder %v793_v62, 512 }
  0xb0   : > { %v1631_v38 = vpop.f32.mrf.mxu0  ;;  %v1633_v39 = vpop.f32.mrf.mxu1 }
  0xb1   : > { %v914_v27 = vmul.f32 %v1169_v16, %v1631_v38 }
  0xb7   : > { %v1635_v28 = vpop.f32.mrf.mxu2  ;;  %v1645_v44 = vpop.f32.mrf.mxu3 }
  0xb8   : > { %v1637_v40 = vpop.f32.mrf.mxu0  ;;  %v1639_v41 = vpop.f32.mrf.mxu1 }
  0xb9   : > { %v1214_v42 = vpack.c.bf16 %v1637_v40, %v1631_v38  ;;  %v1234_v43 = vpack.c.bf16 %v1639_v41, %v1633_v39  ;;  %v915_v19 = vmul.f32 %v1170_v3, %v1637_v40  ;;  %v797_v3 = vadd.s32 %v1680_v60, %v763_v56 }
  0xbb   : > { %1215 = vst [vmem:[%s1418_s15] sm:$0xff] %v1214_v42   ;;  %v988_v35 = vmul.f32 %v915_v19, %v1637_v40  ;;  %v768_v42 = vadd.s32 128, %v1663_v52  ;;  %vm829_vm12 = vcmp.lt.s32.totalorder %v797_v3, 512  ;;  %v770_v3 = vadd.s32 144, %v1663_v52 }
  0xbc   : > { %1294 = vst [vmem:[%s1418_s15 + $0x20] sm:$0xff] %v1234_v43  }
  0xbd   : > { %v802_v9 = vadd.s32 %v1680_v60, %v768_v42  ;;  %v799_v42 = vadd.s32 %v1680_v60, %v765_v23 }
  0xbf   : > { %v1649_v45 = vpop.f32.mrf.mxu2  ;;  %v1658_v49 = vpop.f32.mrf.mxu3  ;;  %vm834_vm11 = vcmp.lt.s32.totalorder %v802_v9, 512  ;;  %vm831_vm14 = vcmp.lt.s32.totalorder %v799_v42, 512 }
  0xc0   : > { %v1651_v46 = vpop.f32.mrf.mxu0  ;;  %v1653_v47 = vpop.f32.mrf.mxu1  ;;  %v1254_v48 = vpack.c.bf16 %v1649_v45, %v1635_v28  ;;  %v1274_v51 = vpack.c.bf16 %v1658_v49, %v1645_v44 }
  0xc1   : > { %v916_v32 = vmul.f32 %v1171_v21, %v1651_v46 }
  0xc2   : > { %1298 = vst [vmem:[%s1418_s15 + $0x40] sm:$0xff] %v1254_v48   ;;  %v987_v48 = vmul.f32 %v914_v27, %v1631_v38 }
  0xc3   : > { %1302 = vst [vmem:[%s1418_s15 + $0x60] sm:$0xff] %v1274_v51   ;;  %v1174_v51 = vsel %vm823_vm5, 1.0, %v1353_v13  ;;  %v989_v40 = vmul.f32 %v916_v32, %v1651_v46 }
  0xc4   : > { %v1019_v61 = vadd.f32 %v988_v35, %v987_v48  ;;  %v766_v35 = vadd.s32 112, %v1663_v52 }
  0xc7   : > { %v1665_v53 = vpop.f32.mrf.mxu2  ;;  %v1677_v59 = vpop.f32.mrf.mxu3 }
  0xc8   : > { %v1667_v54 = vpop.f32.mrf.mxu0  ;;  %v1669_v55 = vpop.f32.mrf.mxu1 }
  0xc9   : > { %v1219_v57 = vpack.c.bf16 %v1667_v54, %v1651_v46  ;;  %v1239_v58 = vpack.c.bf16 %v1669_v55, %v1653_v47  ;;  %v917_v43 = vmul.f32 %v1172_v24, %v1667_v54  ;;  %v769_v24 = vadd.s32 136, %v1663_v52 }
  0xcb   : > { %1291 = vst [vmem:[%s1418_s15 + $0x8] sm:$0xff] %v1219_v57   ;;  %v990_v38 = vmul.f32 %v917_v43, %v1667_v54  ;;  %v764_v54 = vadd.s32 96, %v1663_v52  ;;  %v803_v62 = vadd.s32 %v1680_v60, %v769_v24  ;;  %v804_v24 = vadd.s32 %v1680_v60, %v770_v3 }
  0xcc   : > { %1295 = vst [vmem:[%s1418_s15 + $0x28] sm:$0xff] %v1239_v58   ;;  %v947_v58 = vadd.f32 %v915_v19, %v914_v27  ;;  %v1177_v19 = vsel %vm826_vm7, 1.0, %v1353_v13 }
  0xcd   : > { %v798_v31 = vadd.s32 %v1680_v60, %v764_v54  ;;  %v922_v20 = vmul.f32 %v1177_v19, %v1633_v39  ;;  %vm835_vm15 = vcmp.lt.s32.totalorder %v803_v62, 512  ;;  %vm836_vm2 = vcmp.lt.s32.totalorder %v804_v24, 512 }
  0xce   : > { %v948_v8 = vadd.f32 %v947_v58, %v916_v32  ;;  %v1176_v32 = vsel %vm825_vm10, 1.0, %v1353_v13  ;;  %v1187_v3 = vsel %vm836_vm2, 1.0, %v1353_v13 }
  0xcf   : > { %v1688_v1 = vpop.f32.mrf.mxu2  ;;  %v1701_v11 = vpop.f32.mrf.mxu3  ;;  %vm830_vm13 = vcmp.lt.s32.totalorder %v798_v31, 512  ;;  %v932_v24 = vmul.f32 %v1187_v3, %v1665_v53 }
  0xd0   : > { %v1691_v4 = vpop.f32.mrf.mxu0  ;;  %v1694_v6 = vpop.f32.mrf.mxu1  ;;  %v1259_v7 = vpack.c.bf16 %v1688_v1, %v1665_v53  ;;  %v1279_v12 = vpack.c.bf16 %v1701_v11, %v1677_v59  ;;  %v949_v16 = vadd.f32 %v948_v8, %v917_v43  ;;  %v995_v8 = vmul.f32 %v922_v20, %v1633_v39 }
  0xd1   : > { %v918_v57 = vmul.f32 %v1173_v36, %v1691_v4  ;;  %v1181_v19 = vsel %vm830_vm13, 1.0, %v1353_v13  ;;  %v771_v39 = vadd.s32 152, %v1663_v52 }
  0xd2   : > { %1299 = vst [vmem:[%s1418_s15 + $0x48] sm:$0xff] %v1259_v7  }
  0xd3   : > { %1303 = vst [vmem:[%s1418_s15 + $0x68] sm:$0xff] %v1279_v12   ;;  %v1020_v12 = vadd.f32 %v1019_v61, %v989_v40  ;;  %v991_v14 = vmul.f32 %v918_v57, %v1691_v4  ;;  %v950_v27 = vadd.f32 %v949_v16, %v918_v57  ;;  %v1180_v61 = vsel %vm829_vm12, 1.0, %v1353_v13 }
  0xd5   : > { %v1021_v21 = vadd.f32 %v1020_v12, %v990_v38 }
  0xd7   : > { %v1714_v22 = vpop.f32.mrf.mxu2  ;;  %v1727_v33 = vpop.f32.mrf.mxu3 }
  0xd8   : > { %v619_v25 = vpop.f32.mrf.mxu0  ;;  %v1719_v26 = vpop.f32.mrf.mxu1 }
  0xd9   : > { %v1224_v29 = vpack.c.bf16 %v619_v25, %v1691_v4  ;;  %v1244_v30 = vpack.c.bf16 %v1719_v26, %v1694_v6  ;;  %v919_v0 = vmul.f32 %v1174_v51, %v619_v25  ;;  %v1178_v4 = vsel %vm827_vm8, 1.0, %v1353_v13 }
  0xda   : > { %v923_v58 = vmul.f32 %v1178_v4, %v1639_v41 }
  0xdb   : > { %1292 = vst [vmem:[%s1418_s15 + $0x10] sm:$0xff] %v1224_v29   ;;  %v992_v10 = vmul.f32 %v919_v0, %v619_v25  ;;  %v1179_v29 = vsel %vm828_vm9, 1.0, %v1353_v13  ;;  %v951_v25 = vadd.f32 %v950_v27, %v919_v0  ;;  %v1182_v27 = vsel %vm831_vm14, 1.0, %v1353_v13 }
  0xdc   : > { %1296 = vst [vmem:[%s1418_s15 + $0x30] sm:$0xff] %v1244_v30   ;;  %v1022_v30 = vadd.f32 %v1021_v21, %v991_v14  ;;  %v924_v12 = vmul.f32 %v1179_v29, %v1653_v47  ;;  %v1185_v14 = vsel %vm834_vm11, 1.0, %v1353_v13  ;;  %v996_v21 = vmul.f32 %v923_v58, %v1639_v41 }
  0xde   : > { %v1023_v37 = vadd.f32 %v1022_v30, %v992_v10  ;;  %v997_v4 = vmul.f32 %v924_v12, %v1653_v47  ;;  %v926_v30 = vmul.f32 %v1181_v19, %v1694_v6  ;;  %v772_v47 = vadd.s32 160, %v1663_v52 }
  0xdf   : > { %v1745_v63 = vpop.f32.mrf.mxu2  ;;  %v1758_v15 = vpop.f32.mrf.mxu3  ;;  %v775_v19 = vadd.s32 184, %v1663_v52 }
  0xe0   : > { %v622_v2 = vpop.f32.mrf.mxu0  ;;  %v1749_v7 = vpop.f32.mrf.mxu1  ;;  %v1264_v46 = vpack.c.bf16 %v1745_v63, %v1714_v22  ;;  %v1284_v18 = vpack.c.bf16 %v1758_v15, %v1727_v33 }
  0xe1   : > { %v920_v17 = vmul.f32 %v1175_v5, %v622_v2  ;;  %v800_v5 = vadd.s32 %v1680_v60, %v766_v35 }
  0xe2   : > { %1300 = vst [vmem:[%s1418_s15 + $0x50] sm:$0xff] %v1264_v46  }
  0xe3   : > { %1304 = vst [vmem:[%s1418_s15 + $0x70] sm:$0xff] %v1284_v18   ;;  %v993_v34 = vmul.f32 %v920_v17, %v622_v2  ;;  %v952_v51 = vadd.f32 %v951_v25, %v920_v17  ;;  %v801_v17 = vadd.s32 %v1680_v60, %v767_v50  ;;  %v925_v18 = vmul.f32 %v1180_v61, %v1669_v55 }
  0xe4   : > { %vm832_vm0 = vcmp.lt.s32.totalorder %v800_v5, 512  ;;  %v805_v25 = vadd.s32 %v1680_v60, %v771_v39  ;;  %v1186_v61 = vsel %vm835_vm15, 1.0, %v1353_v13  ;;  %v774_v5 = vadd.s32 176, %v1663_v52 }
  0xe5   : > { %v1024_v0 = vadd.f32 %v1023_v37, %v993_v34  ;;  %vm833_vm1 = vcmp.lt.s32.totalorder %v801_v17, 512  ;;  %v998_v41 = vmul.f32 %v925_v18, %v1669_v55  ;;  %v1183_v34 = vsel %vm832_vm0, 1.0, %v1353_v13 }
  0xe6   : > { %v776_v55 = vadd.s32 192, %v1663_v52  ;;  %v1184_v50 = vsel %vm833_vm1, 1.0, %v1353_v13  ;;  %vm837_vm3 = vcmp.lt.s32.totalorder %v805_v25, 512 }
  0xe7   : > { %v1774_v36 = vpop.f32.mrf.mxu2  ;;  %v1787_v38 = vpop.f32.mrf.mxu3  ;;  %v1188_v39 = vsel %vm837_vm3, 1.0, %v1353_v13 }
  0xe8   : > { %v624_v43 = vpop.f32.mrf.mxu0  ;;  %v1778_v48 = vpop.f32.mrf.mxu1 }
  0xe9   : > { %v1229_v40 = vpack.c.bf16 %v624_v43, %v622_v2  ;;  %v921_v56 = vmul.f32 %v1176_v32, %v624_v43  ;;  %v1249_v57 = vpack.c.bf16 %v1778_v48, %v1749_v7 }
  0xeb   : > { %1293 = vst [vmem:[%s1418_s15 + $0x18] sm:$0xff] %v1229_v40   ;;  %v953_v2 = vadd.f32 %v952_v51, %v921_v56  ;;  %v994_v46 = vmul.f32 %v921_v56, %v624_v43  ;;  %v773_v51 = vadd.s32 168, %v1663_v52  ;;  %v999_v40 = vmul.f32 %v926_v30, %v1694_v6 }
  0xec   : > { %1297 = vst [vmem:[%s1418_s15 + $0x38] sm:$0xff] %v1249_v57   ;;  %v928_v56 = vmul.f32 %v1183_v34, %v1749_v7  ;;  %v930_v6 = vmul.f32 %v1185_v14, %v1635_v28  ;;  %v777_v14 = vadd.s32 200, %v1663_v52 }
  0xed   : > { %v954_v54 = vadd.f32 %v953_v2, %v922_v20  ;;  %v1025_v16 = vadd.f32 %v1024_v0, %v994_v46  ;;  %v927_v20 = vmul.f32 %v1182_v27, %v1719_v26  ;;  %v806_v0 = vadd.s32 %v1680_v60, %v772_v47 }
  0xee   : > { %v929_v46 = vmul.f32 %v1184_v50, %v1778_v48  ;;  %v807_v62 = vadd.s32 %v1680_v60, %v773_v51  ;;  %v778_v27 = vadd.s32 208, %v1663_v52 }
  0xef   : > { %v955_v9 = vadd.f32 %v954_v54, %v923_v58  ;;  %v1026_v10 = vadd.f32 %v1025_v16, %v995_v8  ;;  %v1803_v23 = vpop.f32.mrf.mxu2  ;;  %v1816_v35 = vpop.f32.mrf.mxu3  ;;  %v1000_v2 = vmul.f32 %v927_v20, %v1719_v26  ;;  %v810_v54 = vadd.s32 %v1680_v60, %v776_v55 }
  0xf0   : > { %v1269_v29 = vpack.c.bf16 %v1803_v23, %v1774_v36  ;;  %v1289_v43 = vpack.c.bf16 %v1816_v35, %v1787_v38  ;;  %v1001_v16 = vmul.f32 %v928_v56, %v1749_v7  ;;  %v931_v26 = vmul.f32 %v1186_v61, %v1649_v45 }
  0xf1   : > { %v956_v31 = vadd.f32 %v955_v9, %v924_v12  ;;  %v1027_v32 = vadd.f32 %v1026_v10, %v996_v21  ;;  %vm838_vm4 = vcmp.lt.s32.totalorder %v806_v0, 512  ;;  %v1002_v9 = vmul.f32 %v929_v46, %v1778_v48 }
  0xf2   : > { %1301 = vst [vmem:[%s1418_s15 + $0x58] sm:$0xff] %v1269_v29   ;;  %v1003_v7 = vmul.f32 %v930_v6, %v1635_v28  ;;  %vm839_vm5 = vcmp.lt.s32.totalorder %v807_v62, 512  ;;  %vm842_vm6 = vcmp.lt.s32.totalorder %v810_v54, 512  ;;  %v811_v48 = vadd.s32 %v1680_v60, %v777_v14 }
  0xf3   : > { %v1028_v37 = vadd.f32 %v1027_v32, %v997_v4  ;;  %v957_v42 = vadd.f32 %v956_v31, %v925_v18  ;;  %1305 = vst [vmem:[%s1418_s15 + $0x78] sm:$0xff] %v1289_v43   ;;  %v808_v4 = vadd.s32 %v1680_v60, %v774_v5  ;;  %v809_v31 = vadd.s32 %v1680_v60, %v775_v19 }
  0xf4   : > { %v1004_v32 = vmul.f32 %v931_v26, %v1649_v45  ;;  %v1189_v25 = vsel %vm838_vm4, 1.0, %v1353_v13  ;;  %v1190_v47 = vsel %vm839_vm5, 1.0, %v1353_v13  ;;  %v1193_v50 = vsel %vm842_vm6, 1.0, %v1353_v13 }
  0xf5   : > { %v958_v57 = vadd.f32 %v957_v42, %v926_v30  ;;  %v1029_v58 = vadd.f32 %v1028_v37, %v998_v41  ;;  %v933_v41 = vmul.f32 %v1188_v39, %v1688_v1  ;;  %vm840_vm7 = vcmp.lt.s32.totalorder %v808_v4, 512 }
  0xf6   : > { %v812_v37 = vadd.s32 %v1680_v60, %v778_v27  ;;  %v779_v42 = vadd.s32 216, %v1663_v52  ;;  %v934_v45 = vmul.f32 %v1189_v25, %v1714_v22  ;;  %vm841_vm8 = vcmp.lt.s32.totalorder %v809_v31, 512 }
  0xf7   : > { %v959_v8 = vadd.f32 %v958_v57, %v927_v20  ;;  %v1030_v12 = vadd.f32 %v1029_v58, %v999_v40  ;;  %v1005_v20 = vmul.f32 %v932_v24, %v1665_v53  ;;  %v935_v51 = vmul.f32 %v1190_v47, %v1745_v63 }
  0xf8   : > { %v1191_v40 = vsel %vm840_vm7, 1.0, %v1353_v13  ;;  %v1006_v53 = vmul.f32 %v933_v41, %v1688_v1  ;;  %vm843_vm9 = vcmp.lt.s32.totalorder %v811_v48, 512  ;;  %vm844_vm10 = vcmp.lt.s32.totalorder %v812_v37, 512 }
  0xf9   : > { %v960_v17 = vadd.f32 %v959_v8, %v928_v56  ;;  %v1031_v18 = vadd.f32 %v1030_v12, %v1000_v2  ;;  %v780_v56 = vadd.s32 224, %v1663_v52  ;;  %v813_v61 = vadd.s32 %v1680_v60, %v779_v42 }
  0xfa   : > { %v1192_v0 = vsel %vm841_vm8, 1.0, %v1353_v13  ;;  %v781_v5 = vadd.s32 232, %v1663_v52  ;;  %v1007_v2 = vmul.f32 %v934_v45, %v1714_v22  ;;  %v936_v12 = vmul.f32 %v1191_v40, %v1774_v36 }
  0xfb   : > { %v961_v21 = vadd.f32 %v960_v17, %v929_v46  ;;  %v1032_v10 = vadd.f32 %v1031_v18, %v1001_v16  ;;  %v1008_v1 = vmul.f32 %v935_v51, %v1745_v63  ;;  %v814_v3 = vadd.s32 %v1680_v60, %v780_v56 }
  0xfc   : > { %v937_v16 = vmul.f32 %v1192_v0, %v1803_v23  ;;  %v782_v17 = vadd.s32 240, %v1663_v52  ;;  %v938_v18 = vmul.f32 %v1193_v50, %v1645_v44  ;;  %v1195_v22 = vsel %vm844_vm10, 1.0, %v1353_v13 }
  0xfd   : > { %v962_v29 = vadd.f32 %v961_v21, %v930_v6  ;;  %v1033_v30 = vadd.f32 %v1032_v10, %v1002_v9  ;;  %v1194_v6 = vsel %vm843_vm9, 1.0, %v1353_v13  ;;  %vm845_vm11 = vcmp.lt.s32.totalorder %v813_v61, 512 }
  0xfe   : > { %v815_v19 = vadd.s32 %v1680_v60, %v781_v5  ;;  %v1009_v63 = vmul.f32 %v936_v12, %v1774_v36  ;;  %v783_v14 = vadd.s32 248, %v1663_v52  ;;  %v939_v21 = vmul.f32 %v1194_v6, %v1658_v49 }
  0xff   : > { %v963_v28 = vadd.f32 %v962_v29, %v931_v26  ;;  %v1034_v34 = vadd.f32 %v1033_v30, %v1003_v7  ;;  %vm846_vm12 = vcmp.lt.s32.totalorder %v814_v3, 512  ;;  %v1010_v4 = vmul.f32 %v937_v16, %v1803_v23 }
 0x100   : > { %v816_v7 = vadd.s32 %v1680_v60, %v782_v17  ;;  %v940_v27 = vmul.f32 %v1195_v22, %v1677_v59  ;;  %v1196_v29 = vsel %vm845_vm11, 1.0, %v1353_v13  ;;  %vm847_vm13 = vcmp.lt.s32.totalorder %v815_v19, 512 }
 0x101   : > { %v964_v43 = vadd.f32 %v963_v28, %v932_v24  ;;  %v1035_v55 = vadd.f32 %v1034_v34, %v1004_v32  ;;  %v1011_v24 = vmul.f32 %v938_v18, %v1645_v44  ;;  %v817_v52 = vadd.s32 %v1680_v60, %v783_v14 }
 0x102   : > { %v1012_v36 = vmul.f32 %v939_v21, %v1658_v49  ;;  %v1197_v32 = vsel %vm846_vm12, 1.0, %v1353_v13  ;;  %vm848_vm14 = vcmp.lt.s32.totalorder %v816_v7, 512  ;;  %v1013_v44 = vmul.f32 %v940_v27, %v1677_v59 }
 0x103   : > { %v1036_v57 = vadd.f32 %v1035_v55, %v1005_v20  ;;  %v965_v58 = vadd.f32 %v964_v43, %v933_v41  ;;  %v941_v41 = vmul.f32 %v1196_v29, %v1701_v11  ;;  %v1198_v25 = vsel %vm847_vm13, 1.0, %v1353_v13 }
 0x104   : > { %v942_v28 = vmul.f32 %v1197_v32, %v1727_v33  ;;  %vm849_vm15 = vcmp.lt.s32.totalorder %v817_v52, 512  ;;  %v1199_v60 = vsel %vm848_vm14, 1.0, %v1353_v13  ;;  %v943_v37 = vmul.f32 %v1198_v25, %v1758_v15 }
 0x105   : > { %v966_v46 = vadd.f32 %v965_v58, %v934_v45  ;;  %v1037_v8 = vadd.f32 %v1036_v57, %v1006_v53  ;;  %v1014_v49 = vmul.f32 %v941_v41, %v1701_v11  ;;  %v1200_v45 = vsel %vm849_vm15, 1.0, %v1353_v13 }
 0x106   : > { %v1015_v43 = vmul.f32 %v942_v28, %v1727_v33  ;;  %v944_v50 = vmul.f32 %v1199_v60, %v1787_v38  ;;  %v1016_v40 = vmul.f32 %v943_v37, %v1758_v15  ;;  %v945_v53 = vmul.f32 %v1200_v45, %v1816_v35 }
 0x107   : > { %v967_v54 = vadd.f32 %v966_v46, %v935_v51  ;;  %v1038_v62 = vadd.f32 %v1037_v8, %v1007_v2 }
 0x108   : > { %v1017_v58 = vmul.f32 %v944_v50, %v1787_v38  ;;  %v1018_v13 = vmul.f32 %v945_v53, %v1816_v35  ;;  %v986_v35 = vld [vmem:[%s1928_s8] sm:$0x1] }
 0x109   : > { %v1039_v26 = vadd.f32 %v1038_v62, %v1008_v1  ;;  %v968_v39 = vadd.f32 %v967_v54, %v936_v12  ;;  %v946_v54 = vld [vmem:[%s1927_s7] sm:$0x1] }
 0x10b   : > { %v1040_v9 = vadd.f32 %v1039_v26, %v1009_v63  ;;  %v969_v10 = vadd.f32 %v968_v39, %v937_v16 }
 0x10d   : > { %v970_v30 = vadd.f32 %v969_v10, %v938_v18  ;;  %v1041_v31 = vadd.f32 %v1040_v9, %v1010_v4 }
 0x10f   : > { %v971_v23 = vadd.f32 %v970_v30, %v939_v21  ;;  %v1042_v48 = vadd.f32 %v1041_v31, %v1011_v24 }
 0x111   : > { %v972_v34 = vadd.f32 %v971_v23, %v940_v27  ;;  %v1043_v47 = vadd.f32 %v1042_v48, %v1012_v36 }
 0x113   : > { %v1044_v20 = vadd.f32 %v1043_v47, %v1013_v44  ;;  %v973_v42 = vadd.f32 %v972_v34, %v941_v41 }
 0x115   : > { %v974_v59 = vadd.f32 %v973_v42, %v942_v28  ;;  %v1045_v55 = vadd.f32 %v1044_v20, %v1014_v49 }
 0x117   : > { %v975_v51 = vadd.f32 %v974_v59, %v943_v37  ;;  %v1046_v56 = vadd.f32 %v1045_v55, %v1015_v43 }
 0x119   : > { %v1047_v57 = vadd.f32 %v1046_v56, %v1016_v40  ;;  %v976_v11 = vadd.f32 %v975_v51, %v944_v50 }
 0x11b   : > { %v1048_v61 = vadd.f32 %v1047_v57, %v1017_v58  ;;  %v977_v0 = vadd.f32 %v976_v11, %v945_v53 }
 0x11d   : > { %v978_v5 = vrot.slane %v977_v0, 4  ;;  %v1049_v33 = vadd.f32 %v1048_v61, %v1018_v13 }
 0x11f   : > { %v979_v2 = vadd.f32 %v978_v5, %v977_v0  ;;  %v1050_v46 = vrot.slane %v1049_v33, 4 }
 0x121   : > { %v980_v8 = vrot.slane %v979_v2, 2  ;;  %v1051_v12 = vadd.f32 %v1050_v46, %v1049_v33 }
 0x123   : > { %v981_v6 = vadd.f32 %v980_v8, %v979_v2  ;;  %v1052_v1 = vrot.slane %v1051_v12, 2 }
 0x125   : > { %v982_v15 = vrot.slane %v981_v6, 1  ;;  %v1053_v3 = vadd.f32 %v1052_v1, %v1051_v12 }
 0x127   : > { %v983_v62 = vadd.f32 %v982_v15, %v981_v6  ;;  %v1054_v38 = vrot.slane %v1053_v3, 1 }
 0x129   : > { %v984_v16 = vadd.f32 %v983_v62, %v946_v54  ;;  %v1055_v17 = vadd.f32 %v1054_v38, %v1053_v3 }
 0x12b   : > { %985 = vst [vmem:[%s1927_s7] sm:$0x1] %v984_v16  ;;  %v1056_v18 = vadd.f32 %v1055_v17, %v986_v35 }
 0x12d   : > { %1057 = vst [vmem:[%s1928_s8] sm:$0x1] %v1056_v18 }
 0x12e PF: > { %s19_s27 = sadd.s32 1, %s1350_s27  }
 0x12f   : > { %p16_p5 = scmp.ge.s32.totalorder %s19_s27, 4  }
 0x131   :  { %18 = sbr.rel (!%p16_p5) target bundleno = 1 (0x1), region = 94 }

// kernel: bottleneckv2_forward.7
= control target key start
LH: loop header
LB: loop body
LE: loop exit
PB: predicated region body
PF: predicated region fallthrough
CT: control target
= control target key end

     0   :  { %12 = vsyncpa [#allocation3], 0  ;;  %s1528_s0 = inlined_call_operand.vmem [shape: bf16[512,128], index: 0, kind: input, shape index: {}]   ;;  %s1529_s1 = inlined_call_operand.vmem [shape: f32[1,128], index: 1, kind: input, shape index: {}]   ;;  %s1530_s2 = inlined_call_operand.vmem [shape: f32[1,128], index: 2, kind: input, shape index: {}]   ;;  %s1531_s3 = inlined_call_operand.vmem [shape: f32[1,128], index: 3, kind: input, shape index: {}]   ;;  %s1532_s4 = inlined_call_operand.vmem [shape: f32[1,128], index: 4, kind: input, shape index: {}]   ;;  %s1533_s5 = inlined_call_operand.vmem [shape: bf16[128,128], index: 5, kind: input, shape index: {}]   ;;  %s1534_s6 = inlined_call_operand.vmem [shape: f32[512,128], index: 6, kind: input, shape index: {}]   ;;  %s1535_s7 = inlined_call_operand.hbm [shape: f32[512,128], index: 7, kind: output, shape index: {}]  }
   0x1   :  { %14 = vsyncpa [#allocation3 + $0x1], 0  ;;  %s1174_s24 = smov 0   ;;  %s1176_s25 = smov 0  }
   0x2   :  { %s1178_s26 = smov 0   ;;  %s1180_s27 = smov 0  }
   0x3 LB: > { %s1195_s28 = sadd.s32 4294967295, %s1130_s27   ;;  %s865_s29 = sadd.s32 4294967294, %s1130_s27   ;;  %s1130_s27 = sphi %s1180_s27, %s1541_s27   ;;  %s1126_s26 = sphi %s1178_s26, %s1540_s26   ;;  %s1122_s25 = sphi %s1176_s25, %s1539_s25   ;;  %s1118_s24 = sphi %s1174_s24, %s1538_s24  }
   0x4   : > { %s1199_s30 = sadd.s32 1, %s1130_s27   ;;  %s184_s8 = sadd.s32 1, %s1126_s26 }
   0x5   : > { %s181_s9 = ssub.s32 %s1130_s27, %s1199_s30  ;;  %p194_p0 = scmp.ne.s32.totalorder %s1126_s26, %s1122_s25 }
   0x6   : > { %p182_p1 = scmp.eq.s32.totalorder %s181_s9, 0  ;;  %p195_p2 = scmp.eq.s32.totalorder %s1195_s28, 1 }
   0x7   : > { %p200_p3 = scmp.ne.s32.totalorder %s1122_s25, %s1118_s24  ;;  %p201_p4 = scmp.eq.s32.totalorder %s865_s29, 1 }
   0x8   : > { %s1210_s10 = scalar_select %p182_p1, %s1126_s26, %s184_s8  }
   0x9   : > { %p1212_p5 = por %p195_p2, %p194_p0  ;;  %p1216_p6 = por %p201_p4, %p200_p3 }
   0xa   : > { %p868_p7 = scmp.ge.s32.totalorder %s1130_s27, 1  ;;  %p252_p8 = scmp.lt.s32.totalorder %s1130_s27, 3 }
   0xc   : > { %p253_p9 = pnand %p868_p7, %p252_p8 }
   0xd   : > { %s870_s15 = sshll.u32 (!%p253_p9), %s1195_s28, 5  ;;  %s286_s17 = sand.u32 (!%p253_p9), 1, %s1122_s25  }
   0xe   : > { %256 = sbr.rel (%p253_p9) target bundleno = 247 (0xf7), region = 48  ;;  %p290_p10 = scmp.lt.s32.totalorder (!%p253_p9), %s870_s15, 63 }
   0xf   : > { %s869_s21 = sshll.u32 (!%p253_p9), %s286_s17, 8  ;;  %s919_s22 = sshll.u32 (!%p253_p9), %s1195_s28, 8 }
  0x10   : > { %s787_s9 = scalar_lea.hbm (!%p253_p9), %s1535_s7, %s919_s22  ;;  %s776_s14 = scalar_lea.sflag (!%p253_p9), [#allocation3], %s286_s17 }
  0x11   : > { %s790_s13 = sshll.u32 (!%p253_p9), %s787_s9, 4  ;;  %s791_s13 = int_to_ptr.hbm [resolvable:$true] %s790_s13 }
  0x12   : > { %s1082_s16 = sshra.s32 (!%p253_p9), %s791_s13, 4  ;;  %s1083_s16 = int_to_ptr.hbm [resolvable:$true] %s1082_s16 }
  0x13   : > { %v918_v0 = vld [vmem:[%s1533_s5 + $0x38] sm:$0xff]  ;;  %v917_v1 = vld [vmem:[%s1533_s5 + $0x30] sm:$0xff]  ;;  %s1543_s15 = smov (!%p290_p10, %s870_s15), 63  ;;  %v916_v2 = vld [vmem:[%s1533_s5 + $0x28] sm:$0xff]  ;;  %p1089_p0 = scmp.lt.s32.totalorder %s1083_s16, %s1535_s7 }
  0x14   : > { %654 = vmatpush.bf16.msra.mxu0 %v918_v0  ;;  %999 = vmatpush.bf16.msra.mxu1 %v918_v0  ;;  %s871_s18 = sshll.u32 %s1543_s15, 2  ;;  %v1243_v3 = vld [vmem:[%s1529_s1] ss:$0 sm:$0xff]  ;;  %v914_v34 = vld [vmem:[%s1533_s5 + $0x18] sm:$0xff]  ;;  %v913_v47 = vld [vmem:[%s1533_s5 + $0x10] sm:$0xff] }
  0x15   : > { %1000 = vmatpush.bf16.msra.mxu2 %v918_v0  ;;  %1001 = vmatpush.bf16.msra.mxu3 %v918_v0  ;;  %s1238_s23 = scalar_lea.vmem %s1528_s0, %s871_s18  ;;  %v1251_v9 = vld [vmem:[%s1530_s2] ss:$0 sm:$0xff]  ;;  %v912_v62 = vld [vmem:[%s1533_s5 + $0x8] sm:$0xff] }
  0x16   : > { %v921_v4 = vld [vmem:[%s1238_s23] sm:$0xff]   ;;  %v984_v38 = vld [vmem:[%s1238_s23 + $0x8] sm:$0xff]  }
  0x17   : > { %v987_v5 = vld [vmem:[%s1238_s23 + $0x20] sm:$0xff]   ;;  %v922_v7 = vunpack.c.l.bf16 %v921_v4  ;;  %v923_v8 = vunpack.c.h.bf16 %v921_v4  ;;  %v926_v45 = vunpack.c.l.bf16 %v984_v38  ;;  %v988_v46 = vld [vmem:[%s1238_s23 + $0x28] sm:$0xff]   ;;  %v927_v55 = vunpack.c.h.bf16 %v984_v38 }
  0x18   : > { %655 = vmatpush.bf16.msra.mxu0 %v917_v1  ;;  %1002 = vmatpush.bf16.msra.mxu1 %v917_v1  ;;  %v991_v6 = vld [vmem:[%s1238_s23 + $0x40] sm:$0xff]   ;;  %v938_v10 = vunpack.c.l.bf16 %v987_v5  ;;  %v939_v11 = vunpack.c.h.bf16 %v987_v5  ;;  %v942_v56 = vunpack.c.l.bf16 %v988_v46  ;;  %v992_v57 = vld [vmem:[%s1238_s23 + $0x48] sm:$0xff]   ;;  %v943_v60 = vunpack.c.h.bf16 %v988_v46 }
  0x19   : > { %1003 = vmatpush.bf16.msra.mxu2 %v917_v1  ;;  %1004 = vmatpush.bf16.msra.mxu3 %v917_v1  ;;  %v995_v12 = vld [vmem:[%s1238_s23 + $0x60] sm:$0xff]   ;;  %v954_v13 = vunpack.c.l.bf16 %v991_v6  ;;  %v955_v14 = vunpack.c.h.bf16 %v991_v6  ;;  %v370_v18 = vsub.f32 %v922_v7, %v1243_v3  ;;  %v371_v19 = vsub.f32 %v923_v8, %v1243_v3  ;;  %v996_v61 = vld [vmem:[%s1238_s23 + $0x68] sm:$0xff]  }
  0x1a   : > { %v970_v15 = vunpack.c.l.bf16 %v995_v12  ;;  %v971_v16 = vunpack.c.h.bf16 %v995_v12  ;;  %v915_v17 = vld [vmem:[%s1533_s5 + $0x20] sm:$0xff]  ;;  %v378_v21 = vsub.f32 %v938_v10, %v1243_v3  ;;  %v379_v22 = vsub.f32 %v939_v11, %v1243_v3 }
  0x1b   : > { %v1262_v20 = vld [vmem:[%s1531_s3] ss:$0 sm:$0xff]  ;;  %v386_v23 = vsub.f32 %v954_v13, %v1243_v3  ;;  %v387_v24 = vsub.f32 %v955_v14, %v1243_v3  ;;  %v406_v25 = vmul.f32 %v1251_v9, %v370_v18  ;;  %v407_v26 = vmul.f32 %v1251_v9, %v371_v19 }
  0x1c   : > { %656 = vmatpush.bf16.msra.mxu0 %v916_v2  ;;  %1005 = vmatpush.bf16.msra.mxu1 %v916_v2  ;;  %v414_v27 = vmul.f32 %v1251_v9, %v378_v21  ;;  %v394_v28 = vsub.f32 %v970_v15, %v1243_v3  ;;  %v1275_v29 = vld [vmem:[%s1532_s4] ss:$0 sm:$0xff]  ;;  %v415_v30 = vmul.f32 %v1251_v9, %v379_v22  ;;  %v958_v6 = vunpack.c.l.bf16 %v992_v57 }
  0x1d   : > { %1006 = vmatpush.bf16.msra.mxu2 %v916_v2  ;;  %1007 = vmatpush.bf16.msra.mxu3 %v916_v2  ;;  %v422_v31 = vmul.f32 %v1251_v9, %v386_v23  ;;  %v423_v32 = vmul.f32 %v1251_v9, %v387_v24  ;;  %v395_v33 = vsub.f32 %v971_v16, %v1243_v3  ;;  %v959_v7 = vunpack.c.h.bf16 %v992_v57  ;;  %v911_v16 = vld [vmem:[%s1533_s5] sm:$0xff] }
  0x1e   : > { %v442_v35 = vmul.f32 %v1262_v20, %v406_v25  ;;  %v443_v36 = vmul.f32 %v1262_v20, %v407_v26  ;;  %v450_v37 = vmul.f32 %v1262_v20, %v414_v27  ;;  %v451_v39 = vmul.f32 %v1262_v20, %v415_v30 }
  0x1f   : > { %v458_v40 = vmul.f32 %v1262_v20, %v422_v31  ;;  %v459_v41 = vmul.f32 %v1262_v20, %v423_v32  ;;  %v430_v42 = vmul.f32 %v1251_v9, %v394_v28  ;;  %v431_v44 = vmul.f32 %v1251_v9, %v395_v33 }
  0x20   : > { %657 = vmatpush.bf16.msra.mxu0 %v915_v17  ;;  %1008 = vmatpush.bf16.msra.mxu1 %v915_v17  ;;  %v478_v43 = vadd.f32 %v1275_v29, %v442_v35  ;;  %v479_v48 = vadd.f32 %v1275_v29, %v443_v36  ;;  %v486_v49 = vadd.f32 %v1275_v29, %v450_v37  ;;  %v974_v12 = vunpack.c.l.bf16 %v996_v61 }
  0x21   : > { %1009 = vmatpush.bf16.msra.mxu2 %v915_v17  ;;  %1010 = vmatpush.bf16.msra.mxu3 %v915_v17  ;;  %v466_v50 = vmul.f32 %v1262_v20, %v430_v42  ;;  %v487_v51 = vadd.f32 %v1275_v29, %v451_v39  ;;  %v494_v52 = vadd.f32 %v1275_v29, %v458_v40  ;;  %v975_v21 = vunpack.c.h.bf16 %v996_v61  ;;  %v985_v39 = vld [vmem:[%s1238_s23 + $0x10] sm:$0xff]  }
  0x22   : > { %v467_v53 = vmul.f32 %v1262_v20, %v431_v44  ;;  %v495_v54 = vadd.f32 %v1275_v29, %v459_v41  ;;  %v510_v58 = vmax.f32 %v478_v43, 0.0  ;;  %v372_v59 = vsub.f32 %v926_v45, %v1243_v3  ;;  %v989_v40 = vld [vmem:[%s1238_s23 + $0x30] sm:$0xff]  }
  0x23   : > { %v511_v63 = vmax.f32 %v479_v48, 0.0  ;;  %v518_v0 = vmax.f32 %v486_v49, 0.0  ;;  %v502_v1 = vadd.f32 %v1275_v29, %v466_v50  ;;  %v519_v4 = vmax.f32 %v487_v51, 0.0  ;;  %v993_v44 = vld [vmem:[%s1238_s23 + $0x50] sm:$0xff]  }
  0x24   : > { %658 = vmatpush.bf16.msra.mxu0 %v914_v34  ;;  %1011 = vmatpush.bf16.msra.mxu1 %v914_v34  ;;  %v503_v2 = vadd.f32 %v1275_v29, %v467_v53  ;;  %v526_v5 = vmax.f32 %v494_v52, 0.0  ;;  %v527_v8 = vmax.f32 %v495_v54, 0.0  ;;  %v373_v10 = vsub.f32 %v927_v55, %v1243_v3  ;;  %v997_v52 = vld [vmem:[%s1238_s23 + $0x70] sm:$0xff]  }
  0x25   : > { %1012 = vmatpush.bf16.msra.mxu2 %v914_v34  ;;  %1013 = vmatpush.bf16.msra.mxu3 %v914_v34  ;;  %v380_v11 = vsub.f32 %v942_v56, %v1243_v3  ;;  %v408_v13 = vmul.f32 %v1251_v9, %v372_v59  ;;  %v381_v14 = vsub.f32 %v943_v60, %v1243_v3  ;;  %v534_v17 = vmax.f32 %v502_v1, 0.0 }
  0x26   : > { %v388_v15 = vsub.f32 %v958_v6, %v1243_v3  ;;  %v535_v18 = vmax.f32 %v503_v2, 0.0  ;;  %v389_v19 = vsub.f32 %v959_v7, %v1243_v3  ;;  %v542_v22 = vpack.c.bf16 %v511_v63, %v510_v58 }
  0x27   : > { %v546_v23 = vpack.c.bf16 %v519_v4, %v518_v0  ;;  %v550_v24 = vpack.c.bf16 %v527_v8, %v526_v5  ;;  %v409_v25 = vmul.f32 %v1251_v9, %v373_v10  ;;  %v416_v26 = vmul.f32 %v1251_v9, %v380_v11 }
  0x28   : > { %659 = vmatpush.bf16.msra.mxu0 %v913_v47  ;;  %1014 = vmatpush.bf16.msra.mxu1 %v913_v47  ;;  %v396_v27 = vsub.f32 %v974_v12, %v1243_v3  ;;  %v444_v28 = vmul.f32 %v1262_v20, %v408_v13  ;;  %v417_v30 = vmul.f32 %v1251_v9, %v381_v14  ;;  %v930_v48 = vunpack.c.l.bf16 %v985_v39 }
  0x29   : > { %1015 = vmatpush.bf16.msra.mxu2 %v913_v47  ;;  %1016 = vmatpush.bf16.msra.mxu3 %v913_v47  ;;  %v424_v31 = vmul.f32 %v1251_v9, %v388_v15  ;;  %v397_v32 = vsub.f32 %v975_v21, %v1243_v3  ;;  %v554_v33 = vpack.c.bf16 %v535_v18, %v534_v17  ;;  %v931_v49 = vunpack.c.h.bf16 %v985_v39  ;;  %v986_v39 = vld [vmem:[%s1238_s23 + $0x18] sm:$0xff]  }
  0x2a   : > { %v425_v34 = vmul.f32 %v1251_v9, %v389_v19  ;;  %v432_v35 = vmul.f32 %v1251_v9, %v396_v27  ;;  %v445_v37 = vmul.f32 %v1262_v20, %v409_v25  ;;  %v452_v38 = vmul.f32 %v1262_v20, %v416_v26 }
  0x2b   : > { %v433_v36 = vmul.f32 %v1251_v9, %v397_v32  ;;  %v480_v41 = vadd.f32 %v1275_v29, %v444_v28  ;;  %v453_v42 = vmul.f32 %v1262_v20, %v417_v30  ;;  %v460_v43 = vmul.f32 %v1262_v20, %v424_v31 }
  0x2c   : > { %660 = vmatpush.bf16.msra.mxu0 %v912_v62  ;;  %1017 = vmatpush.bf16.msra.mxu1 %v912_v62  ;;  %v461_v45 = vmul.f32 %v1262_v20, %v425_v34  ;;  %v468_v46 = vmul.f32 %v1262_v20, %v432_v35  ;;  %v946_v50 = vunpack.c.l.bf16 %v989_v40  ;;  %v947_v51 = vunpack.c.h.bf16 %v989_v40 }
  0x2d   : > { %1018 = vmatpush.bf16.msra.mxu2 %v912_v62  ;;  %1019 = vmatpush.bf16.msra.mxu3 %v912_v62  ;;  %v469_v47 = vmul.f32 %v1262_v20, %v433_v36  ;;  %v481_v53 = vadd.f32 %v1275_v29, %v445_v37  ;;  %v962_v54 = vunpack.c.l.bf16 %v993_v44  ;;  %v963_v55 = vunpack.c.h.bf16 %v993_v44 }
  0x2e   : > { %v512_v56 = vmax.f32 %v480_v41, 0.0  ;;  %v488_v57 = vadd.f32 %v1275_v29, %v452_v38  ;;  %v489_v58 = vadd.f32 %v1275_v29, %v453_v42  ;;  %v496_v59 = vadd.f32 %v1275_v29, %v460_v43  ;;  %v990_v41 = vld [vmem:[%s1238_s23 + $0x38] sm:$0xff]  }
  0x2f   : > { %v497_v60 = vadd.f32 %v1275_v29, %v461_v45  ;;  %v504_v61 = vadd.f32 %v1275_v29, %v468_v46  ;;  %v505_v62 = vadd.f32 %v1275_v29, %v469_v47  ;;  %v978_v63 = vunpack.c.l.bf16 %v997_v52  ;;  %v994_v42 = vld [vmem:[%s1238_s23 + $0x58] sm:$0xff]  }
  0x30   : > { %661 = vmatpush.bf16.msra.mxu0 %v911_v16  ;;  %1020 = vmatpush.bf16.msra.mxu1 %v911_v16  ;;  %v374_v0 = vsub.f32 %v930_v48, %v1243_v3  ;;  %v375_v1 = vsub.f32 %v931_v49, %v1243_v3  ;;  %v382_v2 = vsub.f32 %v946_v50, %v1243_v3  ;;  %v513_v5 = vmax.f32 %v481_v53, 0.0  ;;  %v998_v47 = vld [vmem:[%s1238_s23 + $0x78] sm:$0xff]   ;;  %s873_s23 = sshll.u32 %s1543_s15, 3  ;;  %s1430_s15 = scalar_lea.vmem [#allocation2], %s869_s21 }
  0x31   : > { %1021 = vmatpush.bf16.msra.mxu2 %v911_v16  ;;  %1022 = vmatpush.bf16.msra.mxu3 %v911_v16  ;;  %v383_v4 = vsub.f32 %v947_v51, %v1243_v3  ;;  %v390_v6 = vsub.f32 %v962_v54, %v1243_v3  ;;  %v391_v7 = vsub.f32 %v963_v55, %v1243_v3  ;;  %v979_v8 = vunpack.c.h.bf16 %v997_v52  ;;  %s1424_s20 = scalar_lea.vmem %s1534_s6, %s873_s23  ;;  %s788_s28 = sshll.u32 %s1430_s15, 4  ;;  %s789_s28 = int_to_ptr.vmem [resolvable:$true] %s788_s28 }
  0x32   : > { %v520_v10 = vmax.f32 %v488_v57, 0.0  ;;  %v521_v11 = vmax.f32 %v489_v58, 0.0  ;;  %v528_v12 = vmax.f32 %v496_v59, 0.0  ;;  %v398_v13 = vsub.f32 %v978_v63, %v1243_v3  ;;  %s1084_s23 = scalar_lea.hbm %s1083_s16, 256 }
  0x33   : > { %662 = vmatmul.bf16.vlgmr.msra.gmra.mxu0 %v542_v22  ;;  %682 = vmatmul.bf16.vlgmr.msra.gmra.mxu1 %v546_v23  ;;  %v529_v14 = vmax.f32 %v497_v60, 0.0  ;;  %v536_v15 = vmax.f32 %v504_v61, 0.0  ;;  %v537_v16 = vmax.f32 %v505_v62, 0.0  ;;  %v399_v17 = vsub.f32 %v979_v8, %v1243_v3  ;;  %p1085_p11 = scmp.ne.s32.totalorder %s1083_s16, %s1084_s23 }
  0x34   : > { %702 = vmatmul.bf16.vlgmr.msra.gmra.mxu2 %v550_v24  ;;  %722 = vmatmul.bf16.vlgmr.msra.gmra.mxu3 %v554_v33  ;;  %v410_v18 = vmul.f32 %v1251_v9, %v374_v0  ;;  %v411_v19 = vmul.f32 %v1251_v9, %v375_v1  ;;  %v418_v21 = vmul.f32 %v1251_v9, %v382_v2  ;;  %v934_v50 = vunpack.c.l.bf16 %v986_v39 }
  0x35   : > { %v419_v22 = vmul.f32 %v1251_v9, %v383_v4  ;;  %v426_v23 = vmul.f32 %v1251_v9, %v390_v6  ;;  %v427_v24 = vmul.f32 %v1251_v9, %v391_v7  ;;  %v543_v25 = vpack.c.bf16 %v513_v5, %v512_v56  ;;  %p1086_p12 = pnand %p1085_p11, %p1212_p5 }
  0x36   : > { %v547_v26 = vpack.c.bf16 %v521_v11, %v520_v10  ;;  %v434_v27 = vmul.f32 %v1251_v9, %v398_v13  ;;  %v551_v28 = vpack.c.bf16 %v529_v14, %v528_v12  ;;  %v555_v30 = vpack.c.bf16 %v537_v16, %v536_v15 }
  0x37   : > { %v435_v31 = vmul.f32 %v1251_v9, %v399_v17  ;;  %v446_v32 = vmul.f32 %v1262_v20, %v410_v18  ;;  %v447_v33 = vmul.f32 %v1262_v20, %v411_v19  ;;  %v454_v34 = vmul.f32 %v1262_v20, %v418_v21  ;;  %p1087_p13 = pneg %p1086_p12 }
  0x38   : > { %v455_v35 = vmul.f32 %v1262_v20, %v419_v22  ;;  %v462_v36 = vmul.f32 %v1262_v20, %v426_v23  ;;  %v463_v37 = vmul.f32 %v1262_v20, %v427_v24  ;;  %v470_v38 = vmul.f32 %v1262_v20, %v434_v27 }
  0x39   : > { %v471_v40 = vmul.f32 %v1262_v20, %v435_v31  ;;  %v482_v43 = vadd.f32 %v1275_v29, %v446_v32  ;;  %v483_v44 = vadd.f32 %v1275_v29, %v447_v33  ;;  %v490_v45 = vadd.f32 %v1275_v29, %v454_v34 }
  0x3a   : > { %v491_v46 = vadd.f32 %v1275_v29, %v455_v35  ;;  %v498_v48 = vadd.f32 %v1275_v29, %v462_v36  ;;  %v499_v49 = vadd.f32 %v1275_v29, %v463_v37  ;;  %v935_v51 = vunpack.c.h.bf16 %v986_v39 }
  0x3b   : > { %v506_v52 = vadd.f32 %v1275_v29, %v470_v38  ;;  %v950_v53 = vunpack.c.l.bf16 %v990_v41  ;;  %v951_v54 = vunpack.c.h.bf16 %v990_v41  ;;  %v966_v55 = vunpack.c.l.bf16 %v994_v42 }
  0x3c   : > { %v507_v56 = vadd.f32 %v1275_v29, %v471_v40  ;;  %v967_v57 = vunpack.c.h.bf16 %v994_v42  ;;  %v982_v58 = vunpack.c.l.bf16 %v998_v47  ;;  %v983_v59 = vunpack.c.h.bf16 %v998_v47 }
  0x3d   : > { %v514_v60 = vmax.f32 %v482_v43, 0.0  ;;  %v515_v61 = vmax.f32 %v483_v44, 0.0  ;;  %v522_v62 = vmax.f32 %v490_v45, 0.0  ;;  %v523_v63 = vmax.f32 %v491_v46, 0.0 }
  0x3e   : > { %v530_v0 = vmax.f32 %v498_v48, 0.0  ;;  %v531_v1 = vmax.f32 %v499_v49, 0.0  ;;  %v376_v2 = vsub.f32 %v934_v50, %v1243_v3  ;;  %v377_v4 = vsub.f32 %v935_v51, %v1243_v3 }
  0x3f   : > { %v538_v5 = vmax.f32 %v506_v52, 0.0  ;;  %v384_v6 = vsub.f32 %v950_v53, %v1243_v3  ;;  %v385_v7 = vsub.f32 %v951_v54, %v1243_v3  ;;  %v392_v8 = vsub.f32 %v966_v55, %v1243_v3  ;;  %v582_v53 = vld [vmem:[%s1424_s20 + $0x40] sm:$0xff] }
  0x40   : > { %v539_v10 = vmax.f32 %v507_v56, 0.0  ;;  %v393_v11 = vsub.f32 %v967_v57, %v1243_v3  ;;  %v400_v12 = vsub.f32 %v982_v58, %v1243_v3  ;;  %v401_v13 = vsub.f32 %v983_v59, %v1243_v3  ;;  %v590_v58 = vld [vmem:[%s1424_s20 + $0x80] sm:$0xff] }
  0x41   : > { %v544_v14 = vpack.c.bf16 %v515_v61, %v514_v60  ;;  %v548_v15 = vpack.c.bf16 %v523_v63, %v522_v62  ;;  %v412_v16 = vmul.f32 %v1251_v9, %v376_v2  ;;  %v413_v17 = vmul.f32 %v1251_v9, %v377_v4  ;;  %v598_v59 = vld [vmem:[%s1424_s20 + $0xc0] sm:$0xff]  ;;  %v575_v60 = vld [vmem:[%s1424_s20 + $0x8] sm:$0xff] }
  0x42   : > { %v552_v18 = vpack.c.bf16 %v531_v1, %v530_v0  ;;  %v420_v19 = vmul.f32 %v1251_v9, %v384_v6  ;;  %v421_v21 = vmul.f32 %v1251_v9, %v385_v7  ;;  %v428_v22 = vmul.f32 %v1251_v9, %v392_v8  ;;  %v583_v61 = vld [vmem:[%s1424_s20 + $0x48] sm:$0xff] }
  0x43   : > { %667 = vmatmul.bf16.gmra.mxu0 %v543_v25  ;;  %687 = vmatmul.bf16.gmra.mxu1 %v547_v26  ;;  %v556_v23 = vpack.c.bf16 %v539_v10, %v538_v5  ;;  %v429_v24 = vmul.f32 %v1251_v9, %v393_v11  ;;  %v436_v25 = vmul.f32 %v1251_v9, %v400_v12  ;;  %v591_v7 = vld [vmem:[%s1424_s20 + $0x88] sm:$0xff]  ;;  %v576_v10 = vld [vmem:[%s1424_s20 + $0x10] sm:$0xff] }
  0x44   : > { %707 = vmatmul.bf16.gmra.mxu2 %v551_v28  ;;  %727 = vmatmul.bf16.gmra.mxu3 %v555_v30  ;;  %v437_v3 = vmul.f32 %v1251_v9, %v401_v13  ;;  %v448_v26 = vmul.f32 %v1262_v20, %v412_v16  ;;  %v449_v27 = vmul.f32 %v1262_v20, %v413_v17  ;;  %v599_v8 = vld [vmem:[%s1424_s20 + $0xc8] sm:$0xff]  ;;  %v584_v11 = vld [vmem:[%s1424_s20 + $0x50] sm:$0xff] }
  0x45   : > { %v456_v28 = vmul.f32 %v1262_v20, %v420_v19  ;;  %v457_v30 = vmul.f32 %v1262_v20, %v421_v21  ;;  %v464_v31 = vmul.f32 %v1262_v20, %v428_v22  ;;  %v465_v32 = vmul.f32 %v1262_v20, %v429_v24  ;;  %v592_v21 = vld [vmem:[%s1424_s20 + $0x90] sm:$0xff]  ;;  %v585_v24 = vld [vmem:[%s1424_s20 + $0x58] sm:$0xff] }
  0x46   : > { %v472_v33 = vmul.f32 %v1262_v20, %v436_v25  ;;  %v473_v9 = vmul.f32 %v1262_v20, %v437_v3  ;;  %v484_v34 = vadd.f32 %v1275_v29, %v448_v26  ;;  %v485_v35 = vadd.f32 %v1275_v29, %v449_v27  ;;  %v600_v22 = vld [vmem:[%s1424_s20 + $0xd0] sm:$0xff] }
  0x47   : > { %v492_v36 = vadd.f32 %v1275_v29, %v456_v28  ;;  %v493_v37 = vadd.f32 %v1275_v29, %v457_v30  ;;  %v500_v38 = vadd.f32 %v1275_v29, %v464_v31  ;;  %v501_v39 = vadd.f32 %v1275_v29, %v465_v32 }
  0x48   : > { %v508_v40 = vadd.f32 %v1275_v29, %v472_v33  ;;  %v509_v41 = vadd.f32 %v1275_v29, %v473_v9  ;;  %v516_v42 = vmax.f32 %v484_v34, 0.0  ;;  %v517_v43 = vmax.f32 %v485_v35, 0.0  ;;  %v574_v29 = vld [vmem:[%s1424_s20] sm:$0xff]  ;;  %v593_v33 = vld [vmem:[%s1424_s20 + $0x98] sm:$0xff] }
  0x49   : > { %v524_v20 = vmax.f32 %v492_v36, 0.0  ;;  %v525_v44 = vmax.f32 %v493_v37, 0.0  ;;  %v532_v45 = vmax.f32 %v500_v38, 0.0  ;;  %v533_v46 = vmax.f32 %v501_v39, 0.0  ;;  %v601_v9 = vld [vmem:[%s1424_s20 + $0xd8] sm:$0xff]  ;;  %v578_v34 = vld [vmem:[%s1424_s20 + $0x20] sm:$0xff] }
  0x4a   : > { %v540_v47 = vmax.f32 %v508_v40, 0.0  ;;  %v541_v48 = vmax.f32 %v509_v41, 0.0  ;;  %v545_v49 = vpack.c.bf16 %v517_v43, %v516_v42  ;;  %v586_v35 = vld [vmem:[%s1424_s20 + $0x60] sm:$0xff] }
  0x4b   : > { %v549_v50 = vpack.c.bf16 %v525_v44, %v524_v20  ;;  %v553_v51 = vpack.c.bf16 %v533_v46, %v532_v45  ;;  %v594_v20 = vld [vmem:[%s1424_s20 + $0xa0] sm:$0xff]  ;;  %v579_v45 = vld [vmem:[%s1424_s20 + $0x28] sm:$0xff] }
  0x4c   : > { %v557_v52 = vpack.c.bf16 %v541_v48, %v540_v47  ;;  %v602_v44 = vld [vmem:[%s1424_s20 + $0xe0] sm:$0xff]  ;;  %v587_v46 = vld [vmem:[%s1424_s20 + $0x68] sm:$0xff] }
  0x53   : > { %672 = vmatmul.bf16.gmra.mxu0 %v544_v14  ;;  %692 = vmatmul.bf16.gmra.mxu1 %v548_v15 }
  0x54   : > { %712 = vmatmul.bf16.gmra.mxu2 %v552_v18  ;;  %732 = vmatmul.bf16.gmra.mxu3 %v556_v23  ;;  %v577_v23 = vld [vmem:[%s1424_s20 + $0x18] sm:$0xff] }
  0x63   : > { %677 = vmatmul.bf16.gmra.mxu0 %v545_v49  ;;  %697 = vmatmul.bf16.gmra.mxu1 %v549_v50 }
  0x64   : > { %717 = vmatmul.bf16.gmra.mxu2 %v553_v51  ;;  %737 = vmatmul.bf16.gmra.mxu3 %v557_v52 }
  0xb0   : > { %v663_v54 = vpop.f32.mrf.mxu0  ;;  %v683_v55 = vpop.f32.mrf.mxu1 }
  0xb1   : > { %v664_v56 = vadd.f32 %v663_v54, %v574_v29  ;;  %v684_v57 = vadd.f32 %v683_v55, %v582_v53  ;;  %v595_v54 = vld [vmem:[%s1424_s20 + $0xa8] sm:$0xff] }
  0xb2   : > { %v603_v55 = vld [vmem:[%s1424_s20 + $0xe8] sm:$0xff] }
  0xb3   : > { %743 = vst [vmem:[%s1430_s15] sm:$0xff] %v664_v56  ;;  %v580_v56 = vld [vmem:[%s1424_s20 + $0x30] sm:$0xff] }
  0xb4   : > { %751 = vst [vmem:[%s1430_s15 + $0x40] sm:$0xff] %v684_v57  ;;  %v588_v57 = vld [vmem:[%s1424_s20 + $0x70] sm:$0xff] }
  0xb7   : > { %v703_v62 = vpop.f32.mrf.mxu2  ;;  %v723_v63 = vpop.f32.mrf.mxu3 }
  0xb8   : > { %v704_v0 = vadd.f32 %v703_v62, %v590_v58  ;;  %v724_v1 = vadd.f32 %v723_v63, %v598_v59  ;;  %v665_v2 = vpop.f32.mrf.mxu0  ;;  %v685_v4 = vpop.f32.mrf.mxu1 }
  0xb9   : > { %v666_v5 = vadd.f32 %v665_v2, %v575_v60  ;;  %v686_v6 = vadd.f32 %v685_v4, %v583_v61  ;;  %v596_v2 = vld [vmem:[%s1424_s20 + $0xb0] sm:$0xff] }
  0xba   : > { %759 = vst [vmem:[%s1430_s15 + $0x80] sm:$0xff] %v704_v0  ;;  %v604_v4 = vld [vmem:[%s1424_s20 + $0xf0] sm:$0xff] }
  0xbb   : > { %767 = vst [vmem:[%s1430_s15 + $0xc0] sm:$0xff] %v724_v1 }
  0xbc   : > { %744 = vst [vmem:[%s1430_s15 + $0x8] sm:$0xff] %v666_v5  ;;  %v581_v5 = vld [vmem:[%s1424_s20 + $0x38] sm:$0xff] }
  0xbd   : > { %752 = vst [vmem:[%s1430_s15 + $0x48] sm:$0xff] %v686_v6  ;;  %v589_v6 = vld [vmem:[%s1424_s20 + $0x78] sm:$0xff] }
  0xbf   : > { %v705_v12 = vpop.f32.mrf.mxu2  ;;  %v725_v13 = vpop.f32.mrf.mxu3 }
  0xc0   : > { %v706_v14 = vadd.f32 %v705_v12, %v591_v7  ;;  %v726_v15 = vadd.f32 %v725_v13, %v599_v8  ;;  %v668_v16 = vpop.f32.mrf.mxu0  ;;  %v688_v17 = vpop.f32.mrf.mxu1 }
  0xc1   : > { %v669_v18 = vadd.f32 %v668_v16, %v576_v10  ;;  %v689_v19 = vadd.f32 %v688_v17, %v584_v11  ;;  %v597_v16 = vld [vmem:[%s1424_s20 + $0xb8] sm:$0xff] }
  0xc2   : > { %760 = vst [vmem:[%s1430_s15 + $0x88] sm:$0xff] %v706_v14  ;;  %v605_v17 = vld [vmem:[%s1424_s20 + $0xf8] sm:$0xff]  ;;  %s1088_s20 = scalar_lea.hbm %s1535_s7, 512 }
  0xc3   : > { %768 = vst [vmem:[%s1430_s15 + $0xc8] sm:$0xff] %v726_v15  ;;  %p1090_p1 = scmp.lt.s32.totalorder %s1088_s20, %s1084_s23 }
  0xc4   : > { %745 = vst [vmem:[%s1430_s15 + $0x10] sm:$0xff] %v669_v18 }
  0xc5   : > { %753 = vst [vmem:[%s1430_s15 + $0x50] sm:$0xff] %v689_v19  ;;  %p1091_p2 = por %p1090_p1, %p1089_p0 }
  0xc7   : > { %v708_v25 = vpop.f32.mrf.mxu2  ;;  %v728_v3 = vpop.f32.mrf.mxu3  ;;  %p1092_p3 = pnand %p1091_p2, %p1087_p13 }
  0xc8   : > { %v709_v26 = vadd.f32 %v708_v25, %v592_v21  ;;  %v729_v27 = vadd.f32 %v728_v3, %v600_v22  ;;  %v670_v28 = vpop.f32.mrf.mxu0  ;;  %v690_v30 = vpop.f32.mrf.mxu1 }
  0xc9   : > { %v671_v31 = vadd.f32 %v670_v28, %v577_v23  ;;  %v691_v32 = vadd.f32 %v690_v30, %v585_v24 }
  0xca   : > { %761 = vst [vmem:[%s1430_s15 + $0x90] sm:$0xff] %v709_v26 }
  0xcb   : > { %769 = vst [vmem:[%s1430_s15 + $0xd0] sm:$0xff] %v729_v27 }
  0xcc   : > { %746 = vst [vmem:[%s1430_s15 + $0x18] sm:$0xff] %v671_v31 }
  0xcd   : > { %754 = vst [vmem:[%s1430_s15 + $0x58] sm:$0xff] %v691_v32 }
  0xcf   : > { %v710_v36 = vpop.f32.mrf.mxu2  ;;  %v730_v37 = vpop.f32.mrf.mxu3 }
  0xd0   : > { %v711_v38 = vadd.f32 %v710_v36, %v593_v33  ;;  %v731_v39 = vadd.f32 %v730_v37, %v601_v9  ;;  %v673_v40 = vpop.f32.mrf.mxu0  ;;  %v693_v41 = vpop.f32.mrf.mxu1 }
  0xd1   : > { %v674_v42 = vadd.f32 %v673_v40, %v578_v34  ;;  %v694_v43 = vadd.f32 %v693_v41, %v586_v35 }
  0xd2   : > { %762 = vst [vmem:[%s1430_s15 + $0x98] sm:$0xff] %v711_v38 }
  0xd3   : > { %770 = vst [vmem:[%s1430_s15 + $0xd8] sm:$0xff] %v731_v39 }
  0xd4   : > { %747 = vst [vmem:[%s1430_s15 + $0x20] sm:$0xff] %v674_v42 }
  0xd5   : > { %755 = vst [vmem:[%s1430_s15 + $0x60] sm:$0xff] %v694_v43 }
  0xd7   : > { %v713_v47 = vpop.f32.mrf.mxu2  ;;  %v733_v48 = vpop.f32.mrf.mxu3 }
  0xd8   : > { %v714_v49 = vadd.f32 %v713_v47, %v594_v20  ;;  %v734_v50 = vadd.f32 %v733_v48, %v602_v44  ;;  %v675_v51 = vpop.f32.mrf.mxu0  ;;  %v695_v52 = vpop.f32.mrf.mxu1 }
  0xd9   : > { %v676_v29 = vadd.f32 %v675_v51, %v579_v45  ;;  %v696_v53 = vadd.f32 %v695_v52, %v587_v46 }
  0xda   : > { %763 = vst [vmem:[%s1430_s15 + $0xa0] sm:$0xff] %v714_v49 }
  0xdb   : > { %771 = vst [vmem:[%s1430_s15 + $0xe0] sm:$0xff] %v734_v50 }
  0xdc   : > { %748 = vst [vmem:[%s1430_s15 + $0x28] sm:$0xff] %v676_v29 }
  0xdd   : > { %756 = vst [vmem:[%s1430_s15 + $0x68] sm:$0xff] %v696_v53 }
  0xdf   : > { %v715_v58 = vpop.f32.mrf.mxu2  ;;  %v735_v59 = vpop.f32.mrf.mxu3 }
  0xe0   : > { %v716_v60 = vadd.f32 %v715_v58, %v595_v54  ;;  %v736_v61 = vadd.f32 %v735_v59, %v603_v55  ;;  %v678_v62 = vpop.f32.mrf.mxu0  ;;  %v698_v63 = vpop.f32.mrf.mxu1 }
  0xe1   : > { %v679_v0 = vadd.f32 %v678_v62, %v580_v56  ;;  %v699_v1 = vadd.f32 %v698_v63, %v588_v57 }
  0xe2   : > { %764 = vst [vmem:[%s1430_s15 + $0xa8] sm:$0xff] %v716_v60 }
  0xe3   : > { %772 = vst [vmem:[%s1430_s15 + $0xe8] sm:$0xff] %v736_v61 }
  0xe4   : > { %749 = vst [vmem:[%s1430_s15 + $0x30] sm:$0xff] %v679_v0 }
  0xe5   : > { %757 = vst [vmem:[%s1430_s15 + $0x70] sm:$0xff] %v699_v1 }
  0xe7   : > { %v718_v7 = vpop.f32.mrf.mxu2  ;;  %v738_v8 = vpop.f32.mrf.mxu3 }
  0xe8   : > { %v719_v10 = vadd.f32 %v718_v7, %v596_v2  ;;  %v739_v11 = vadd.f32 %v738_v8, %v604_v4  ;;  %v680_v12 = vpop.f32.mrf.mxu0  ;;  %v700_v13 = vpop.f32.mrf.mxu1 }
  0xe9   : > { %v681_v14 = vadd.f32 %v680_v12, %v581_v5  ;;  %v701_v15 = vadd.f32 %v700_v13, %v589_v6 }
  0xea   : > { %765 = vst [vmem:[%s1430_s15 + $0xb0] sm:$0xff] %v719_v10 }
  0xeb   : > { %773 = vst [vmem:[%s1430_s15 + $0xf0] sm:$0xff] %v739_v11 }
  0xec   : > { %750 = vst [vmem:[%s1430_s15 + $0x38] sm:$0xff] %v681_v14 }
  0xed   : > { %758 = vst [vmem:[%s1430_s15 + $0x78] sm:$0xff] %v701_v15 }
  0xef   : > { %v720_v18 = vpop.f32.mrf.mxu2  ;;  %v740_v19 = vpop.f32.mrf.mxu3 }
  0xf0   : > { %v721_v21 = vadd.f32 %v720_v18, %v597_v16  ;;  %v741_v22 = vadd.f32 %v740_v19, %v605_v17 }
  0xf2   : > { %766 = vst [vmem:[%s1430_s15 + $0xb8] sm:$0xff] %v721_v21 }
  0xf3   : > { %774 = vst [vmem:[%s1430_s15 + $0xf8] sm:$0xff] %v741_v22 }
  0xf4   : > { %1095 = shalt.err (!%p1092_p3)
}
  0xf5   : > { %s1132_s17 = smov 128   ;;  %s1133_s15 = smov 8  }
  0xf6   : > { %1023 = dma.vmem_to_hbm [thread:$0]  (%p1212_p5), %s789_s28, 4096, %s791_s13, %s776_s14, %s1132_s17, %s1132_s17, %s1133_s15  }
  0xf7 PF: > { %p1029_p4 = scmp.ge.s32.totalorder %s1130_s27, 2  ;;  %s805_s29 = sand.u32 1, %s1118_s24  }
  0xf8   : > { %s806_s8 = scalar_lea.sflag [#allocation3], %s805_s29 }
  0xf9   : > { %p1026_p7 = pnand %p1029_p4, %p1216_p6 }
  0xfb   : > { %p1027_p8 = pneg %p1026_p7 }
  0xfd   : > { %1113 = dma.done.wait (%p1027_p8), %s806_s8, 4096  }
  0xfe   : > { %1115 = vsyncadd (%p1027_p8), %s806_s8, 4294963200  ;;  %p17_p9 = scmp.ge.s32.totalorder %s1199_s30, 4   ;;  %s1538_s24 = smov %s1122_s25 }
  0xff   : > { %s1539_s25 = smov %s1126_s26  ;;  %s1540_s26 = smov %s1210_s10 }
 0x100   : > { %s1541_s27 = smov %s1199_s30  ;;  %19 = sbr.rel (!%p17_p9) target bundleno = 3 (0x3), region = 86 }
 0x105   :  { %812 = vsyncpa [#allocation3], 1 }
 0x106   :  { %814 = vsyncpa [#allocation3 + $0x1], 1 }

// kernel: bottleneckv2_forward.6
= control target key start
LH: loop header
LB: loop body
LE: loop exit
PB: predicated region body
PF: predicated region fallthrough
CT: control target
= control target key end

     0   :  { %s3871_s30 = smov 0   ;;  %s5179_s0 = inlined_call_operand.vmem [shape: bf16[2,18,18,128], index: 0, kind: input, shape index: {}]   ;;  %s5180_s1 = inlined_call_operand.vmem [shape: f32[1,18,18,1], index: 1, kind: input, shape index: {}]   ;;  %s5181_s2 = inlined_call_operand.vmem [shape: f32[1,128], index: 2, kind: input, shape index: {}]   ;;  %s5182_s3 = inlined_call_operand.vmem [shape: f32[1,128], index: 3, kind: input, shape index: {}]   ;;  %s5183_s4 = inlined_call_operand.vmem [shape: f32[1,128], index: 4, kind: input, shape index: {}]   ;;  %s5184_s5 = inlined_call_operand.vmem [shape: f32[1,128], index: 5, kind: input, shape index: {}]   ;;  %s5185_s6 = inlined_call_operand.vmem [shape: bf16[1152,128], index: 6, kind: input, shape index: {}]   ;;  %s5186_s7 = inlined_call_operand.vmem [shape: bf16[2,16,16,128], index: 7, kind: output, shape index: {0}]   ;;  %s5187_s8 = inlined_call_operand.vmem [shape: f32[1,128], index: 8, kind: output, shape index: {1}]   ;;  %s5188_s9 = inlined_call_operand.vmem [shape: f32[1,128], index: 9, kind: output, shape index: {2}]  }
   0x1 LB: > { %s3250_s10 = sadd.s32 4294967295, %s3817_s30   ;;  %p3254_p0 = scmp.ge.s32.totalorder %s3817_s30, 1  ;;  %s3817_s30 = sphi %s3871_s30, %s20_s30  }
   0x2   : > { %p282_p1 = scmp.lt.s32.totalorder %s3817_s30, 3 }
   0x4   : > { %p283_p2 = pnand %p3254_p0, %p282_p1 }
   0x6   : > { %286 = sbr.rel (%p283_p2) target bundleno = 895 (0x37f), region = 48 }
   0xb   : > { %p318_p3 = scmp.lt.s32.totalorder %s3250_s10, 1  ;;  %p3258_p4 = scmp.ne.s32.totalorder %s3250_s10, 0 }
   0xd   : > { %s319_s11 = scalar_select %p318_p3, %s3250_s10, 1 }
   0xe   : > { %331 = sbr.rel (%p3258_p4) target bundleno = 22 (0x16), region = 52 }
   0xf   : > { %s3785_s12 = smul.u32 216, %s319_s11  ;;  %s3549_s13 = sshll.u32 %s319_s11, 7 }
  0x10   : > { %s3882_s16 = scalar_lea.vmem %s5186_s7, %s3549_s13 }
  0x11   : > { %s3887_s19 = scalar_lea.vmem %s5179_s0, %s3785_s12 }
  0x13   : > { %v3819_v0 = vmov 0.0  }
  0x14   : > { %332 = vst [vmem:[%s5187_s8] sm:$0x1] %v3819_v0 }
  0x15   : > { %333 = vst [vmem:[%s5188_s9] sm:$0x1] %v3819_v0 }
  0x16 PF: > { %v764_v1 = vld [vmem:[%s5180_s1 + $0x120] sm:$0xff]  ;;  %v3820_v4 = vmov 0   ;;  %v765_v5 = vld [vmem:[%s5180_s1 + $0x128] sm:$0xff]  ;;  %v755_v9 = vld [vmem:[%s5180_s1 + $0xd8] sm:$0xff]  ;;  %vm1513_vm0 = vcmask 1046528  }
  0x17   : > { %v752_v2 = vld [vmem:[%s5180_s1 + $0xc0] sm:$0xff]  ;;  %3798 = vset.pattern.permute.xlu2 %v3820_v4  ;;  %3797 = vset.pattern.permute.xlu1 %v3820_v4  ;;  %v753_v6 = vld [vmem:[%s5180_s1 + $0xc8] sm:$0xff]  ;;  %v767_v11 = vld [vmem:[%s5180_s1 + $0x138] sm:$0xff]  ;;  %vm1304_vm1 = vsmask.f32 7424 }
  0x18   : > { %v740_v3 = vld [vmem:[%s5180_s1 + $0x60] sm:$0xff]  ;;  %3796 = vset.pattern.permute.xlu0 %v3820_v4  ;;  %964 = vperm.xlu1 %3797, %v764_v1   ;;  %v741_v7 = vld [vmem:[%s5180_s1 + $0x68] sm:$0xff]  ;;  %v731_v15 = vld [vmem:[%s5180_s1 + $0x18] sm:$0xff] }
  0x19   : > { %904 = vperm.xlu0 %3796, %v752_v2   ;;  %844 = vperm.xlu2 %3798, %v740_v3   ;;  %v729_v8 = vld [vmem:[%s5180_s1 + $0x8] sm:$0xff]  ;;  %v728_v10 = vld [vmem:[%s5180_s1] sm:$0xff]  ;;  %v743_v16 = vld [vmem:[%s5180_s1 + $0x78] sm:$0xff] }
  0x1a   : > { %v768_v12 = vld [vmem:[%s5180_s1 + $0x140] sm:$0xff]  ;;  %v758_v17 = vld [vmem:[%s5180_s1 + $0xf0] sm:$0xff]  ;;  %v759_v18 = vld [vmem:[%s5180_s1 + $0xf8] sm:$0xff] }
  0x1b   : > { %v756_v13 = vld [vmem:[%s5180_s1 + $0xe0] sm:$0xff]  ;;  %v771_v20 = vld [vmem:[%s5180_s1 + $0x158] sm:$0xff]  ;;  %v746_v21 = vld [vmem:[%s5180_s1 + $0x90] sm:$0xff] }
  0x1c   : > { %v744_v14 = vld [vmem:[%s5180_s1 + $0x80] sm:$0xff]  ;;  %v770_v22 = vld [vmem:[%s5180_s1 + $0x150] sm:$0xff]  ;;  %v3557_v23 = vld [vmem:[%s5185_s6 + $0x38] sm:$0xff] }
  0x1d   : > { %v732_v19 = vld [vmem:[%s5180_s1 + $0x20] sm:$0xff]  ;;  %3761 = vmatpush.bf16.msra.mxu1 %v3557_v23  ;;  %3762 = vmatpush.bf16.msra.mxu2 %v3557_v23  ;;  %v734_v24 = vld [vmem:[%s5180_s1 + $0x30] sm:$0xff]  ;;  %v735_v25 = vld [vmem:[%s5180_s1 + $0x38] sm:$0xff] }
  0x1e   : > { %3763 = vmatpush.bf16.msra.mxu3 %v3557_v23  ;;  %2206 = vmatpush.bf16.msra.mxu0 %v3557_v23  ;;  %v747_v26 = vld [vmem:[%s5180_s1 + $0x98] sm:$0xff]  ;;  %v3556_v27 = vld [vmem:[%s5185_s6 + $0x30] sm:$0xff]  ;;  %v3555_v29 = vld [vmem:[%s5185_s6 + $0x28] sm:$0xff] }
  0x1f   : > { %v762_v28 = vld [vmem:[%s5180_s1 + $0x110] sm:$0xff]  ;;  %v773_v30 = vld [vmem:[%s5180_s1 + $0x168] sm:$0xff]  ;;  %v3554_v32 = vld [vmem:[%s5185_s6 + $0x20] sm:$0xff] }
  0x20   : > { %969 = vperm.xlu1 %3797, %v765_v5   ;;  %v761_v31 = vld [vmem:[%s5180_s1 + $0x108] sm:$0xff]  ;;  %v3739_v33 = vld [vmem:[%s3887_s19 + $0x30] sm:$0xff]   ;;  %v3553_v35 = vld [vmem:[%s5185_s6 + $0x18] sm:$0xff] }
  0x21   : > { %909 = vperm.xlu0 %3796, %v753_v6   ;;  %849 = vperm.xlu2 %3798, %v741_v7   ;;  %v749_v34 = vld [vmem:[%s5180_s1 + $0xa8] sm:$0xff]  ;;  %v750_v36 = vld [vmem:[%s5180_s1 + $0xb0] sm:$0xff]  ;;  %v3632_v38 = vunpack.c.l.bf16 %v3739_v33  ;;  %v4004_v39 = vld [vmem:[%s5181_s2] ss:$0 sm:$0xff]  ;;  %v3633_v43 = vunpack.c.h.bf16 %v3739_v33 }
  0x22   : > { %3764 = vmatpush.bf16.msra.mxu1 %v3556_v27  ;;  %3765 = vmatpush.bf16.msra.mxu2 %v3556_v27  ;;  %v774_v37 = vld [vmem:[%s5180_s1 + $0x170] sm:$0xff]  ;;  %v4013_v42 = vld [vmem:[%s5182_s3] ss:$0 sm:$0xff]  ;;  %v3551_v45 = vld [vmem:[%s5185_s6 + $0x8] sm:$0xff] }
  0x23   : > { %3766 = vmatpush.bf16.msra.mxu3 %v3556_v27  ;;  %2207 = vmatpush.bf16.msra.mxu0 %v3556_v27  ;;  %v3552_v40 = vld [vmem:[%s5185_s6 + $0x10] sm:$0xff]  ;;  %v458_v41 = vsub.f32 %v3632_v38, %v4004_v39  ;;  %v737_v47 = vld [vmem:[%s5180_s1 + $0x48] sm:$0xff]  ;;  %v4031_v49 = vld [vmem:[%s5183_s4] ss:$0 sm:$0xff]  ;;  %v459_v50 = vsub.f32 %v3633_v43, %v4004_v39 }
  0x24   : > { %v738_v44 = vld [vmem:[%s5180_s1 + $0x50] sm:$0xff]  ;;  %v3550_v51 = vld [vmem:[%s5185_s6] sm:$0xff]  ;;  %v739_v56 = vld [vmem:[%s5180_s1 + $0x58] sm:$0x3] }
  0x25   : > { %v730_v46 = vld [vmem:[%s5180_s1 + $0x10] sm:$0x3]  ;;  %v516_v48 = vmul.f32 %v4013_v42, %v458_v41  ;;  %v4041_v53 = vld [vmem:[%s5184_s5] ss:$0 sm:$0xff]  ;;  %v517_v54 = vmul.f32 %v4013_v42, %v459_v50  ;;  %v733_v57 = vld [vmem:[%s5180_s1 + $0x28] sm:$0x3] }
  0x26   : > { %3767 = vmatpush.bf16.msra.mxu1 %v3555_v29  ;;  %3768 = vmatpush.bf16.msra.mxu2 %v3555_v29  ;;  %v736_v55 = vld [vmem:[%s5180_s1 + $0x40] sm:$0x3]  ;;  %v3743_v63 = vld [vmem:[%s3887_s19 + $0x90] sm:$0xff]   ;;  %v745_v0 = vld [vmem:[%s5180_s1 + $0x88] sm:$0x3] }
  0x27   : > { %3769 = vmatpush.bf16.msra.mxu3 %v3555_v29  ;;  %2208 = vmatpush.bf16.msra.mxu0 %v3555_v29  ;;  %v574_v52 = vmul.f32 %v4031_v49, %v516_v48  ;;  %v575_v59 = vmul.f32 %v4031_v49, %v517_v54  ;;  %v3741_v1 = vld [vmem:[%s3887_s19 + $0x60] sm:$0xff]   ;;  %v742_v4 = vld [vmem:[%s5180_s1 + $0x70] sm:$0x3]  ;;  %v3648_v5 = vunpack.c.l.bf16 %v3743_v63 }
  0x28   : > { %789 = vperm.xlu1 %3797, %v729_v8   ;;  %v748_v3 = vld [vmem:[%s5180_s1 + $0xa0] sm:$0x3]  ;;  %v3640_v7 = vunpack.c.l.bf16 %v3741_v1  ;;  %v361_v27 = vld [vmem:[%s3887_s19 + $0x6c] sm:$0xff]  }
  0x29   : > { %919 = vperm.xlu2 %3798, %v755_v9   ;;  %784 = vperm.xlu0 %3796, %v728_v10   ;;  %v632_v58 = vadd.f32 %v4041_v53, %v574_v52  ;;  %v633_v62 = vadd.f32 %v4041_v53, %v575_v59  ;;  %v482_v10 = vsub.f32 %v3648_v5, %v4004_v39  ;;  %v766_v38 = vld [vmem:[%s5180_s1 + $0x130] sm:$0x3]  ;;  %v769_v5 = vld [vmem:[%s5180_s1 + $0x148] sm:$0x3] }
  0x2a   : > { %3770 = vmatpush.bf16.msra.mxu1 %v3554_v32  ;;  %3771 = vmatpush.bf16.msra.mxu2 %v3554_v32 }
  0x2b   : > { %3772 = vmatpush.bf16.msra.mxu3 %v3554_v32  ;;  %2209 = vmatpush.bf16.msra.mxu0 %v3554_v32  ;;  %v686_v60 = vmax.f32 %v632_v58, 0.0  ;;  %v687_v6 = vmax.f32 %v633_v62, 0.0 }
  0x2e   : > { %3773 = vmatpush.bf16.msra.mxu1 %v3553_v35  ;;  %3774 = vmatpush.bf16.msra.mxu2 %v3553_v35 }
  0x2f   : > { %3775 = vmatpush.bf16.msra.mxu3 %v3553_v35  ;;  %2210 = vmatpush.bf16.msra.mxu0 %v3553_v35 }
  0x30   : > { %979 = vperm.xlu1 %3797, %v767_v11   ;;  %v3649_v11 = vunpack.c.h.bf16 %v3743_v63 }
  0x31   : > { %984 = vperm.xlu2 %3798, %v768_v12   ;;  %924 = vperm.xlu0 %3796, %v756_v13   ;;  %v470_v13 = vsub.f32 %v3640_v7, %v4004_v39 }
  0x32   : > { %3776 = vmatpush.bf16.msra.mxu1 %v3552_v40  ;;  %3777 = vmatpush.bf16.msra.mxu2 %v3552_v40 }
  0x33   : > { %3778 = vmatpush.bf16.msra.mxu3 %v3552_v40  ;;  %2211 = vmatpush.bf16.msra.mxu0 %v3552_v40  ;;  %v760_v40 = vld [vmem:[%s5180_s1 + $0x100] sm:$0x3] }
  0x36   : > { %3779 = vmatpush.bf16.msra.mxu1 %v3551_v45  ;;  %3780 = vmatpush.bf16.msra.mxu2 %v3551_v45 }
  0x37   : > { %3781 = vmatpush.bf16.msra.mxu3 %v3551_v45  ;;  %2212 = vmatpush.bf16.msra.mxu0 %v3551_v45 }
  0x38   : > { %864 = vperm.xlu1 %3797, %v744_v14   ;;  %v3641_v14 = vunpack.c.h.bf16 %v3741_v1 }
  0x39   : > { %799 = vperm.xlu2 %3798, %v731_v15   ;;  %859 = vperm.xlu0 %3796, %v743_v16   ;;  %v754_v15 = vld [vmem:[%s5180_s1 + $0xd0] sm:$0x3] }
  0x3a   : > { %3782 = vmatpush.bf16.msra.mxu1 %v3550_v51  ;;  %3783 = vmatpush.bf16.msra.mxu2 %v3550_v51 }
  0x3b   : > { %3784 = vmatpush.bf16.msra.mxu3 %v3550_v51  ;;  %2213 = vmatpush.bf16.msra.mxu0 %v3550_v51 }
  0x40   : > { %934 = vperm.xlu1 %3797, %v758_v17  }
  0x41   : > { %939 = vperm.xlu2 %3798, %v759_v18   ;;  %804 = vperm.xlu0 %3796, %v732_v19   ;;  %v757_v18 = vld [vmem:[%s5180_s1 + $0xe8] sm:$0x3]  ;;  %v751_v19 = vld [vmem:[%s5180_s1 + $0xb8] sm:$0x3] }
  0x48   : > { %999 = vperm.xlu1 %3797, %v771_v20   ;;  %v540_v20 = vmul.f32 %v4013_v42, %v482_v10 }
  0x49   : > { %874 = vperm.xlu2 %3798, %v746_v21   ;;  %994 = vperm.xlu0 %3796, %v770_v22   ;;  %v483_v21 = vsub.f32 %v3649_v11, %v4004_v39  ;;  %v3623_v22 = vld [vmem:[%s3887_s19] sm:$0xff]  }
  0x4a   : > { %v3624_v33 = vunpack.c.l.bf16 %v3623_v22  ;;  %v350_v11 = vld [vmem:[%s3887_s19 + $0x3c] sm:$0xff]  }
  0x4b   : > { %v541_v32 = vmul.f32 %v4013_v42, %v483_v21  ;;  %v404_v21 = vunpack.c.h.bf16 %v350_v11 }
  0x4d   : > { %v599_v45 = vmul.f32 %v4031_v49, %v541_v32 }
  0x4f   : > { %v657_v59 = vadd.f32 %v4041_v53, %v599_v45 }
  0x50   : > { %814 = vperm.xlu1 %3797, %v734_v24   ;;  %v528_v24 = vmul.f32 %v4013_v42, %v470_v13 }
  0x51   : > { %819 = vperm.xlu2 %3798, %v735_v25   ;;  %879 = vperm.xlu0 %3796, %v747_v26   ;;  %v471_v25 = vsub.f32 %v3641_v14, %v4004_v39 }
  0x53   : > { %v529_v35 = vmul.f32 %v4013_v42, %v471_v25 }
  0x55   : > { %v587_v48 = vmul.f32 %v4031_v49, %v529_v35 }
  0x57   : > { %v645_v63 = vadd.f32 %v4041_v53, %v587_v48 }
  0x58   : > { %954 = vperm.xlu1 %3797, %v762_v28   ;;  %v3625_v28 = vunpack.c.h.bf16 %v3623_v22  ;;  %v3581_v22 = vld [vmem:[%s5185_s6 + $0xf8] sm:$0xff] }
  0x59   : > { %1009 = vperm.xlu2 %3798, %v773_v30   ;;  %949 = vperm.xlu0 %3796, %v761_v31   ;;  %v598_v30 = vmul.f32 %v4031_v49, %v540_v20  ;;  %v374_v31 = vld [vmem:[%s3887_s19 + $0x9c] sm:$0xff]   ;;  %v699_v13 = vmax.f32 %v645_v63, 0.0 }
  0x5a   : > { %v428_v41 = vunpack.c.h.bf16 %v374_v31  ;;  %v447_v43 = vsub.f32 %v3625_v28, %v4004_v39  ;;  %2473 = vmatpush.bf16.msrb.mxu3 %v3581_v22  ;;  %v780_v22 = vld [vmem:[%s5180_s1 + $0x1a0] sm:$0xff] }
  0x5c   : > { %v486_v52 = vsub.f32 %v428_v41, %v4004_v39  ;;  %v505_v54 = vmul.f32 %v4013_v42, %v447_v43  ;;  %v777_v41 = vld [vmem:[%s5180_s1 + $0x188] sm:$0xff] }
  0x60   : > { %889 = vperm.xlu1 %3797, %v749_v34   ;;  %v586_v34 = vmul.f32 %v4031_v49, %v528_v24  ;;  %v3572_v24 = vld [vmem:[%s5185_s6 + $0xb0] sm:$0xff] }
  0x61   : > { %894 = vperm.xlu2 %3798, %v750_v36   ;;  %1014 = vperm.xlu0 %3796, %v774_v37   ;;  %v415_v36 = vunpack.c.l.bf16 %v361_v27  ;;  %v763_v37 = vld [vmem:[%s5180_s1 + $0x118] sm:$0x3] }
  0x63   : > { %v473_v50 = vsub.f32 %v415_v36, %v4004_v39  ;;  %v403_v36 = vunpack.c.l.bf16 %v350_v11 }
  0x65   : > { %v531_v1 = vmul.f32 %v4013_v42, %v473_v50  ;;  %v462_v50 = vsub.f32 %v404_v21, %v4004_v39 }
  0x68   : > { %834 = vperm.xlu1 %3797, %v738_v44   ;;  %v656_v44 = vadd.f32 %v4041_v53, %v598_v30 }
  0x69   : > { %794 = vperm.xlu2 %3798, %v730_v46   ;;  %829 = vperm.xlu0 %3796, %v737_v47   ;;  %v446_v46 = vsub.f32 %v3624_v33, %v4004_v39  ;;  %v644_v47 = vadd.f32 %v4041_v53, %v586_v34 }
  0x6b   : > { %v698_v62 = vmax.f32 %v644_v47, 0.0  ;;  %v776_v47 = vld [vmem:[%s5180_s1 + $0x180] sm:$0xff] }
  0x70   : > { %824 = vperm.xlu1 %3797, %v736_v55   ;;  %v3573_v55 = vld [vmem:[%s5185_s6 + $0xb8] sm:$0xff] }
  0x71   : > { %839 = vperm.xlu2 %3798, %v739_v56   ;;  %809 = vperm.xlu0 %3796, %v733_v57   ;;  %v710_v56 = vmax.f32 %v656_v44, 0.0 }
  0x72   : > { %2384 = vmatpush.bf16.msrb.mxu2 %v3573_v55 }
  0x73   : > { %v845_v61 = vpop.permute.xlu2 %844 }
  0x74   : > { %v1064_v2 = vmul.f32 %v845_v61, %v686_v60  ;;  %v504_v60 = vmul.f32 %v4013_v42, %v446_v46  ;;  %v427_v61 = vunpack.c.l.bf16 %v374_v31  ;;  %v778_v46 = vld [vmem:[%s5180_s1 + $0x190] sm:$0x3] }
  0x76   : > { %v1118_v8 = vpack.c.bf16 %v1064_v2, %v1064_v2  ;;  %v772_v2 = vld [vmem:[%s5180_s1 + $0x160] sm:$0x3]  ;;  %v485_v10 = vsub.f32 %v427_v61, %v4004_v39  ;;  %2385 = vmatpush.bf16.msrb.mxu2 %v3572_v24 }
  0x78   : > { %869 = vperm.xlu1 %3797, %v745_v0   ;;  %v1200_v16 = vunpack.c.l.b16 %v1118_v8  ;;  %v416_v0 = vunpack.c.h.bf16 %v361_v27  ;;  %v711_v8 = vmax.f32 %v657_v59, 0.0  ;;  %v543_v32 = vmul.f32 %v4013_v42, %v485_v10 }
  0x79   : > { %884 = vperm.xlu2 %3798, %v748_v3   ;;  %854 = vperm.xlu0 %3796, %v742_v4   ;;  %v544_v3 = vmul.f32 %v4013_v42, %v486_v52  ;;  %v775_v4 = vld [vmem:[%s5180_s1 + $0x178] sm:$0x3] }
  0x7a   : > { %v474_v14 = vsub.f32 %v416_v0, %v4004_v39  ;;  %v601_v55 = vmul.f32 %v4031_v49, %v543_v32  ;;  %v4219_v32 = vld [vmem:[%s3887_s19 + $0x48] sm:$0xff]  }
  0x7b   : > { %v850_v9 = vpop.permute.xlu2 %849 }
  0x7c   : > { %v1065_v12 = vmul.f32 %v850_v9, %v687_v6  ;;  %v563_v6 = vmul.f32 %v4031_v49, %v505_v54  ;;  %v562_v9 = vmul.f32 %v4031_v49, %v504_v60  ;;  %v532_v35 = vmul.f32 %v4013_v42, %v474_v14 }
  0x7d   : > { %v461_v60 = vsub.f32 %v403_v36, %v4004_v39  ;;  %v659_v11 = vadd.f32 %v4041_v53, %v601_v55 }
  0x7e   : > { %v1119_v17 = vpack.c.bf16 %v1065_v12, %v1065_v12  ;;  %v621_v20 = vadd.f32 %v4041_v53, %v563_v6  ;;  %v620_v31 = vadd.f32 %v4041_v53, %v562_v9  ;;  %v590_v59 = vmul.f32 %v4031_v49, %v532_v35  ;;  %v3564_v6 = vld [vmem:[%s5185_s6 + $0x70] sm:$0xff] }
  0x80   : > { %v1201_v23 = vunpack.c.l.b16 %v1119_v17  ;;  %914 = vperm.xlu1 %3797, %v754_v15   ;;  %v589_v15 = vmul.f32 %v4031_v49, %v531_v1  ;;  %v4141_v17 = vld [vmem:[%s3887_s19 + $0x78] sm:$0xff]   ;;  %v675_v48 = vmax.f32 %v621_v20, 0.0  ;;  %v674_v54 = vmax.f32 %v620_v31, 0.0 }
  0x81   : > { %929 = vperm.xlu2 %3798, %v757_v18   ;;  %899 = vperm.xlu0 %3796, %v751_v19   ;;  %v602_v18 = vmul.f32 %v4031_v49, %v544_v3  ;;  %v3645_v43 = vunpack.c.h.bf16 %v4141_v17  ;;  %v520_v3 = vmul.f32 %v4013_v42, %v462_v50  ;;  %v3588_v50 = vld [vmem:[%s5185_s6 + $0x130] sm:$0xff] }
  0x82   : > { %v4083_v26 = vpack.c.b16 %v1201_v23, %v1200_v16  ;;  %v4138_v16 = vld [vmem:[%s3887_s19 + $0xc] sm:$0xff]   ;;  %v3565_v23 = vld [vmem:[%s5185_s6 + $0x78] sm:$0xff] }
  0x83   : > { %v4086_v29 = vpop.permute.xlu2 %919  ;;  %2295 = vmatpush.bf16.msrb.mxu1 %v3565_v23  ;;  %v660_v44 = vadd.f32 %v4041_v53, %v602_v18  ;;  %v477_v63 = vsub.f32 %v3645_v43, %v4004_v39  ;;  %v519_v18 = vmul.f32 %v4013_v42, %v461_v60 }
  0x84   : > { %2234 = vmatmul.bf16.vlgmr.msra.gmra.mxu1 %v4083_v26 }
  0x85   : > { %v535_v21 = vmul.f32 %v4013_v42, %v477_v63  ;;  %v577_v36 = vmul.f32 %v4031_v49, %v519_v18 }
  0x87   : > { %2296 = vmatpush.bf16.msrb.mxu1 %v3564_v6  ;;  %v635_v63 = vadd.f32 %v4041_v53, %v577_v36 }
  0x88   : > { %959 = vperm.xlu1 %3797, %v763_v37   ;;  %v647_v37 = vadd.f32 %v4041_v53, %v589_v15  ;;  %v648_v15 = vadd.f32 %v4041_v53, %v590_v59  ;;  %v3570_v59 = vld [vmem:[%s5185_s6 + $0xa0] sm:$0xff] }
  0x89   : > { %974 = vperm.xlu2 %3798, %v766_v38   ;;  %944 = vperm.xlu0 %3796, %v760_v40   ;;  %v391_v40 = vunpack.c.l.bf16 %v4138_v16 }
  0x8a   : > { %v965_v51 = vpop.permute.xlu1 %964  ;;  %v701_v0 = vmax.f32 %v647_v37, 0.0  ;;  %v702_v35 = vmax.f32 %v648_v15, 0.0 }
  0x8b   : > { %v905_v57 = vpop.permute.xlu0 %904  ;;  %v4115_v58 = vpop.permute.xlu2 %984  ;;  %v1088_v7 = vmul.f32 %v965_v51, %v710_v56 }
  0x8c   : > { %v1076_v12 = vmul.f32 %v905_v57, %v698_v62  ;;  %v449_v62 = vsub.f32 %v391_v40, %v4004_v39  ;;  %v1079_v23 = vmul.f32 %v4086_v29, %v701_v0  ;;  %v713_v29 = vmax.f32 %v659_v11, 0.0 }
  0x8d   : > { %v1142_v25 = vpack.c.bf16 %v1088_v7, %v1088_v7  ;;  %v714_v7 = vmax.f32 %v660_v44, 0.0 }
  0x8e   : > { %v1130_v33 = vpack.c.bf16 %v1076_v12, %v1076_v12  ;;  %v3644_v12 = vunpack.c.l.bf16 %v4141_v17  ;;  %v507_v20 = vmul.f32 %v4013_v42, %v449_v62  ;;  %v1133_v43 = vpack.c.bf16 %v1079_v23, %v1079_v23 }
  0x8f   : > { %v1216_v51 = vunpack.c.l.b16 %v1142_v25  ;;  %v779_v25 = vld [vmem:[%s5180_s1 + $0x198] sm:$0xff] }
  0x90   : > { %1004 = vperm.xlu1 %3797, %v772_v2   ;;  %v1208_v56 = vunpack.c.l.b16 %v1130_v33  ;;  %v476_v33 = vsub.f32 %v3644_v12, %v4004_v39  ;;  %v565_v40 = vmul.f32 %v4031_v49, %v507_v20 }
  0x91   : > { %1019 = vperm.xlu2 %3798, %v775_v4   ;;  %989 = vperm.xlu0 %3796, %v769_v5   ;;  %v3580_v4 = vld [vmem:[%s5185_s6 + $0xf0] sm:$0xff]  ;;  %v3589_v5 = vld [vmem:[%s5185_s6 + $0x138] sm:$0xff] }
  0x92   : > { %v970_v19 = vpop.permute.xlu1 %969  ;;  %2474 = vmatpush.bf16.msrb.mxu3 %v3580_v4  ;;  %2562 = vmatpush.bf16.msrb.mxu0 %v3589_v5 }
  0x93   : > { %v1089_v27 = vmul.f32 %v970_v19, %v711_v8  ;;  %v910_v28 = vpop.permute.xlu0 %909  ;;  %v4154_v30 = vpop.permute.xlu2 %799  ;;  %v392_v19 = vunpack.c.h.bf16 %v4138_v16  ;;  %v781_v16 = vld [vmem:[%s5180_s1 + $0x1a8] sm:$0x3] }
  0x94   : > { %v1077_v34 = vmul.f32 %v910_v28, %v699_v13  ;;  %v3571_v13 = vld [vmem:[%s5185_s6 + $0xa8] sm:$0xff]  ;;  %v1092_v28 = vmul.f32 %v4115_v58, %v714_v7  ;;  %v4228_v58 = vld [vmem:[%s3887_s19 + $0x18] sm:$0xff]   ;;  %v1210_v7 = vunpack.c.l.b16 %v1133_v43 }
  0x95   : > { %v1143_v38 = vpack.c.bf16 %v1089_v27, %v1089_v27  ;;  %v578_v27 = vmul.f32 %v4031_v49, %v520_v3  ;;  %2386 = vmatpush.bf16.msrb.mxu2 %v3571_v13  ;;  %v450_v37 = vsub.f32 %v392_v19, %v4004_v39  ;;  %v623_v3 = vadd.f32 %v4041_v53, %v565_v40 }
  0x96   : > { %v1131_v45 = vpack.c.bf16 %v1077_v34, %v1077_v34  ;;  %v3629_v6 = vunpack.c.h.bf16 %v4228_v58  ;;  %2563 = vmatpush.bf16.msrb.mxu0 %v3588_v50  ;;  %v689_v19 = vmax.f32 %v635_v63, 0.0 }
  0x97   : > { %v1217_v52 = vunpack.c.l.b16 %v1143_v38  ;;  %v3744_v38 = vld [vmem:[%s3887_s19 + $0xa8] sm:$0xff]   ;;  %v508_v0 = vmul.f32 %v4013_v42, %v450_v37  ;;  %v677_v23 = vmax.f32 %v623_v3, 0.0 }
  0x98   : > { %v1209_v57 = vunpack.c.l.b16 %v1131_v45  ;;  %1029 = vperm.xlu1 %3797, %v777_v41   ;;  %v593_v41 = vmul.f32 %v4031_v49, %v535_v21  ;;  %v3636_v45 = vunpack.c.l.bf16 %v4219_v32 }
  0x99   : > { %v4176_v61 = vpack.c.b16 %v1217_v52, %v1216_v51  ;;  %1034 = vperm.xlu2 %3798, %v778_v46   ;;  %1024 = vperm.xlu0 %3796, %v776_v47   ;;  %v636_v47 = vadd.f32 %v4041_v53, %v578_v27  ;;  %v3563_v51 = vld [vmem:[%s5185_s6 + $0x68] sm:$0xff]  ;;  %v1146_v52 = vpack.c.bf16 %v1092_v28, %v1092_v28  ;;  %v3628_v27 = vunpack.c.l.bf16 %v4228_v58 }
  0x9a   : > { %v4180_v1 = vpack.c.b16 %v1209_v57, %v1208_v56  ;;  %v790_v2 = vpop.permute.xlu1 %789  ;;  %v534_v56 = vmul.f32 %v4013_v42, %v476_v33  ;;  %v3653_v57 = vunpack.c.h.bf16 %v3744_v38  ;;  %v651_v4 = vadd.f32 %v4041_v53, %v593_v41  ;;  %2297 = vmatpush.bf16.msrb.mxu1 %v3563_v51  ;;  %2387 = vmatpush.bf16.msrb.mxu2 %v3570_v59 }
  0x9b   : > { %v4192_v8 = vpop.permute.xlu2 %939  ;;  %v1053_v9 = vmul.f32 %v790_v2, %v675_v48  ;;  %v785_v10 = vpop.permute.xlu0 %784  ;;  %2274 = vmatmul.bf16.vlgmr.msra.gmra.mxu3 %v4176_v61  ;;  %v3579_v48 = vld [vmem:[%s5185_s6 + $0xe8] sm:$0xff]  ;;  %v3652_v2 = vunpack.c.l.bf16 %v3744_v38  ;;  %v690_v11 = vmax.f32 %v636_v47, 0.0  ;;  %v1219_v12 = vunpack.c.l.b16 %v1146_v52 }
  0x9c   : > { %5215 = vst [vmem:[#allocation2_spill] sm:$0xff] %v4180_v1  ;;  %v1052_v14 = vmul.f32 %v785_v10, %v674_v54  ;;  %2254 = vmatmul.bf16.vlgmr.msra.gmra.mxu2 %v4180_v1  ;;  %2475 = vmatpush.bf16.msrb.mxu3 %v3579_v48  ;;  %v489_v15 = vsub.f32 %v3653_v57, %v4004_v39  ;;  %v705_v28 = vmax.f32 %v651_v4, 0.0  ;;  %v3637_v38 = vunpack.c.h.bf16 %v4219_v32  ;;  %v3578_v48 = vld [vmem:[%s5185_s6 + $0xe0] sm:$0xff]  ;;  %v3587_v32 = vld [vmem:[%s5185_s6 + $0x128] sm:$0xff]  ;;  %v4304_v4 = vld [vmem:[%s3887_s19 + $0xb4] sm:$0xff]  }
  0x9d   : > { %v1107_v17 = vpack.c.bf16 %v1053_v9, %v1053_v9  ;;  %v464_v9 = vsub.f32 %v3636_v45, %v4004_v39  ;;  %v566_v20 = vmul.f32 %v4031_v49, %v508_v0  ;;  %v488_v21 = vsub.f32 %v3652_v2, %v4004_v39  ;;  %2564 = vmatpush.bf16.msrb.mxu0 %v3587_v32 }
  0x9e   : > { %v1106_v24 = vpack.c.bf16 %v1052_v14, %v1052_v14  ;;  %v592_v14 = vmul.f32 %v4031_v49, %v534_v56  ;;  %v1055_v58 = vmul.f32 %v4154_v30, %v677_v23  ;;  %v452_v47 = vsub.f32 %v3628_v27, %v4004_v39  ;;  %v3562_v30 = vld [vmem:[%s5185_s6 + $0x60] sm:$0xff] }
  0x9f   : > { %v1193_v31 = vunpack.c.l.b16 %v1107_v17  ;;  %v624_v36 = vadd.f32 %v4041_v53, %v566_v20  ;;  %v546_v37 = vmul.f32 %v4013_v42, %v488_v21  ;;  %v1083_v50 = vmul.f32 %v4192_v8, %v705_v28  ;;  %v368_v8 = vld [vmem:[%s3887_s19 + $0x84] sm:$0xff]   ;;  %2298 = vmatpush.bf16.msrb.mxu1 %v3562_v30 }
  0xa0   : > { %v1192_v34 = vunpack.c.l.b16 %v1106_v24  ;;  %1044 = vperm.xlu1 %3797, %v780_v22   ;;  %v453_v22 = vsub.f32 %v3629_v6, %v4004_v39  ;;  %v522_v24 = vmul.f32 %v4013_v42, %v464_v9  ;;  %v650_v33 = vadd.f32 %v4041_v53, %v592_v14  ;;  %2476 = vmatpush.bf16.msrb.mxu3 %v3578_v48  ;;  %v4307_v6 = vld [vmem:[%s3887_s19 + $0x54] sm:$0xff]  }
  0xa1   : > { %1049 = vperm.xlu2 %3798, %v781_v16   ;;  %1039 = vperm.xlu0 %3796, %v779_v25   ;;  %v678_v57 = vmax.f32 %v624_v36, 0.0  ;;  %v604_v59 = vmul.f32 %v4031_v49, %v546_v37  ;;  %v1109_v0 = vpack.c.bf16 %v1055_v58, %v1055_v58  ;;  %v1137_v9 = vpack.c.bf16 %v1083_v50, %v1083_v50 }
  0xa2   : > { %v4230_v44 = vpack.c.b16 %v1193_v31, %v1192_v34  ;;  %v980_v46 = vpop.permute.xlu1 %979  ;;  %v547_v34 = vmul.f32 %v4013_v42, %v489_v15  ;;  %v511_v40 = vmul.f32 %v4013_v42, %v453_v22  ;;  %v580_v43 = vmul.f32 %v4031_v49, %v522_v24 }
  0xa3   : > { %v1091_v54 = vmul.f32 %v980_v46, %v713_v29  ;;  %v925_v55 = vpop.permute.xlu0 %924  ;;  %v4247_v60 = vpop.permute.xlu2 %874  ;;  %v704_v52 = vmax.f32 %v650_v33, 0.0  ;;  %v422_v14 = vunpack.c.h.bf16 %v368_v8  ;;  %v421_v20 = vunpack.c.l.bf16 %v368_v8  ;;  %v3586_v33 = vld [vmem:[%s5185_s6 + $0x120] sm:$0xff] }
  0xa4   : > { %v1080_v62 = vmul.f32 %v925_v55, %v702_v35  ;;  %2214 = vmatmul.bf16.vlgmr.msra.gmra.mxu0 %v4230_v44  ;;  %v3569_v55 = vld [vmem:[%s5185_s6 + $0x98] sm:$0xff]  ;;  %v569_v63 = vmul.f32 %v4031_v49, %v511_v40  ;;  %v4299_v2 = vadd.f32 %v4041_v53, %v580_v43  ;;  %v433_v22 = vunpack.c.l.bf16 %v4304_v4  ;;  %v3568_v40 = vld [vmem:[%s5185_s6 + $0x90] sm:$0xff] }
  0xa5   : > { %v1145_v5 = vpack.c.bf16 %v1091_v54, %v1091_v54  ;;  %v605_v54 = vmul.f32 %v4031_v49, %v547_v34  ;;  %2388 = vmatpush.bf16.msrb.mxu2 %v3569_v55  ;;  %v410_v24 = vunpack.c.h.bf16 %v4307_v6  ;;  %v3561_v34 = vld [vmem:[%s5185_s6 + $0x58] sm:$0xff]  ;;  %2565 = vmatpush.bf16.msrb.mxu0 %v3586_v33  ;;  %v409_v55 = vunpack.c.l.bf16 %v4307_v6 }
  0xa6   : > { %v1134_v10 = vpack.c.bf16 %v1080_v62, %v1080_v62  ;;  %v465_v62 = vsub.f32 %v3637_v38, %v4004_v39  ;;  %v627_v21 = vadd.f32 %v4041_v53, %v569_v63  ;;  %v480_v38 = vsub.f32 %v422_v14, %v4004_v39  ;;  %2299 = vmatpush.bf16.msrb.mxu1 %v3561_v34  ;;  %v3567_v63 = vld [vmem:[%s5185_s6 + $0x88] sm:$0xff] }
  0xa7   : > { %v1218_v13 = vunpack.c.l.b16 %v1145_v5  ;;  %v491_v48 = vsub.f32 %v433_v22, %v4004_v39  ;;  %v468_v30 = vsub.f32 %v410_v24, %v4004_v39  ;;  %v467_v14 = vsub.f32 %v409_v55, %v4004_v39  ;;  %v3566_v24 = vld [vmem:[%s5185_s6 + $0x80] sm:$0xff] }
  0xa8   : > { %v1211_v18 = vunpack.c.l.b16 %v1134_v10  ;;  %v538_v8 = vmul.f32 %v4013_v42, %v480_v38 }
  0xa9   : > { %v4260_v17 = vpack.c.b16 %v1219_v12, %v1218_v13  ;;  %v663_v12 = vadd.f32 %v4041_v53, %v605_v54  ;;  %v336_v13 = vld [vmem:[%s3887_s19 + $0x8] sm:$0x1]  ;;  %2389 = vmatpush.bf16.msrb.mxu2 %v3568_v40 }
  0xaa   : > { %v4264_v16 = vpack.c.b16 %v1211_v18, %v1210_v7  ;;  %v865_v25 = vpop.permute.xlu1 %864  ;;  %v510_v7 = vmul.f32 %v4013_v42, %v452_v47  ;;  %v662_v18 = vadd.f32 %v4041_v53, %v604_v59  ;;  %v390_v28 = vunpack.c.l.bf16 %v336_v13 }
  0xab   : > { %v1068_v31 = vmul.f32 %v865_v25, %v690_v11  ;;  %v860_v29 = vpop.permute.xlu0 %859  ;;  %2279 = vmatmul.bf16.gmra.mxu3 %v4260_v17  ;;  %v4277_v45 = vpop.permute.xlu2 %819  ;;  %v1194_v25 = vunpack.c.l.b16 %v1109_v0  ;;  %v717_v37 = vmax.f32 %v663_v12, 0.0  ;;  %v479_v47 = vsub.f32 %v421_v20, %v4004_v39 }
  0xac   : > { %v1067_v35 = vmul.f32 %v860_v29, %v689_v19  ;;  %2259 = vmatmul.bf16.gmra.mxu2 %v4264_v16  ;;  %v523_v19 = vmul.f32 %v4013_v42, %v465_v62  ;;  %v3577_v29 = vld [vmem:[%s5185_s6 + $0xd8] sm:$0xff]  ;;  %v716_v43 = vmax.f32 %v662_v18, 0.0  ;;  %v3560_v18 = vld [vmem:[%s5185_s6 + $0x50] sm:$0xff]  ;;  %v596_v22 = vmul.f32 %v4031_v49, %v538_v8 }
  0xad   : > { %v1122_v41 = vpack.c.bf16 %v1068_v31, %v1068_v31  ;;  %v568_v31 = vmul.f32 %v4031_v49, %v510_v7  ;;  %2477 = vmatpush.bf16.msrb.mxu3 %v3577_v29  ;;  %v537_v6 = vmul.f32 %v4013_v42, %v479_v47  ;;  %v549_v7 = vmul.f32 %v4013_v42, %v491_v48  ;;  %v3575_v47 = vld [vmem:[%s5185_s6 + $0xc8] sm:$0xff] }
  0xae   : > { %v1121_v46 = vpack.c.bf16 %v1067_v35, %v1067_v35  ;;  %v1213_v35 = vunpack.c.l.b16 %v1137_v9  ;;  %v526_v9 = vmul.f32 %v4013_v42, %v468_v30  ;;  %2390 = vmatpush.bf16.msrb.mxu2 %v3567_v63  ;;  %2300 = vmatpush.bf16.msrb.mxu1 %v3560_v18  ;;  %v3559_v48 = vld [vmem:[%s5185_s6 + $0x48] sm:$0xff] }
  0xaf   : > { %v1203_v51 = vunpack.c.l.b16 %v1122_v41  ;;  %v626_v54 = vadd.f32 %v4041_v53, %v568_v31 }
  0xb0   : > { %v1202_v56 = vunpack.c.l.b16 %v1121_v46  ;;  %v581_v46 = vmul.f32 %v4031_v49, %v523_v19 }
  0xb1   : > { %v680_v13 = vmax.f32 %v626_v54, 0.0 }
  0xb2   : > { %v4301_v3 = vpack.c.b16 %v1203_v51, %v1202_v56  ;;  %v935_v5 = vpop.permute.xlu1 %934  ;;  %v692_v56 = vmax.f32 %v4299_v2, 0.0  ;;  %v434_v2 = vunpack.c.h.bf16 %v4304_v4  ;;  %v3585_v4 = vld [vmem:[%s5185_s6 + $0x118] sm:$0xff]  ;;  %2391 = vmatpush.bf16.msrb.mxu2 %v3566_v24  ;;  %2301 = vmatpush.bf16.msrb.mxu1 %v3559_v48 }
  0xb3   : > { %v1082_v10 = vmul.f32 %v935_v5, %v704_v52  ;;  %v805_v11 = vpop.permute.xlu0 %804  ;;  %v4332_v41 = vpop.permute.xlu2 %1009  ;;  %v448_v52 = vsub.f32 %v390_v28, %v4004_v39  ;;  %v639_v5 = vadd.f32 %v4041_v53, %v581_v46  ;;  %v595_v28 = vmul.f32 %v4031_v49, %v537_v6  ;;  %2566 = vmatpush.bf16.msrb.mxu0 %v3585_v4  ;;  %v339_v4 = vld [vmem:[%s3887_s19 + $0x14] sm:$0x1] }
  0xb4   : > { %5216 = vst [vmem:[#allocation3_spill] sm:$0xff] %v4301_v3  ;;  %v1056_v15 = vmul.f32 %v805_v11, %v678_v57  ;;  %2239 = vmatmul.bf16.gmra.mxu1 %v4301_v3  ;;  %v681_v57 = vmax.f32 %v627_v21, 0.0  ;;  %v1070_v19 = vmul.f32 %v4247_v60, %v692_v56  ;;  %v492_v31 = vsub.f32 %v434_v2, %v4004_v39 }
  0xb5   : > { %v1136_v23 = vpack.c.bf16 %v1082_v10, %v1082_v10  ;;  %v506_v12 = vmul.f32 %v4013_v42, %v448_v52  ;;  %v607_v60 = vmul.f32 %v4031_v49, %v549_v7  ;;  %v654_v46 = vadd.f32 %v4041_v53, %v596_v22 }
  0xb6   : > { %v1110_v27 = vpack.c.bf16 %v1056_v15, %v1056_v15  ;;  %v3576_v15 = vld [vmem:[%s5185_s6 + $0xd0] sm:$0xff]  ;;  %v1059_v20 = vmul.f32 %v4277_v45, %v681_v57  ;;  %v584_v45 = vmul.f32 %v4031_v49, %v526_v9  ;;  %v1124_v38 = vpack.c.bf16 %v1070_v19, %v1070_v19  ;;  %v3574_v9 = vld [vmem:[%s5185_s6 + $0xc0] sm:$0xff] }
  0xb7   : > { %v1212_v36 = vunpack.c.l.b16 %v1136_v23  ;;  %v344_v23 = vld [vmem:[%s3887_s19 + $0x24] sm:$0xff]   ;;  %2478 = vmatpush.bf16.msrb.mxu3 %v3576_v15  ;;  %v564_v34 = vmul.f32 %v4031_v49, %v506_v12  ;;  %v550_v52 = vmul.f32 %v4013_v42, %v492_v31  ;;  %v665_v55 = vadd.f32 %v4041_v53, %v607_v60 }
  0xb8   : > { %v1195_v58 = vunpack.c.l.b16 %v1110_v27  ;;  %v693_v27 = vmax.f32 %v639_v5, 0.0  ;;  %v1113_v40 = vpack.c.bf16 %v1059_v20, %v1059_v20  ;;  %v397_v54 = vunpack.c.l.bf16 %v344_v23 }
  0xb9   : > { %v4337_v32 = vpack.c.b16 %v1213_v35, %v1212_v36  ;;  %v525_v36 = vmul.f32 %v4013_v42, %v467_v14  ;;  %v642_v56 = vadd.f32 %v4041_v53, %v584_v45  ;;  %v1204_v5 = vunpack.c.l.b16 %v1124_v38 }
  0xba   : > { %v4340_v50 = vpack.c.b16 %v1195_v58, %v1194_v25  ;;  %v1000_v51 = vpop.permute.xlu1 %999  ;;  %v1197_v6 = vunpack.c.l.b16 %v1113_v40  ;;  %v708_v7 = vmax.f32 %v654_v46, 0.0  ;;  %v455_v14 = vsub.f32 %v397_v54, %v4004_v39  ;;  %v342_v54 = vld [vmem:[%s3887_s19 + $0x20] sm:$0x1] }
  0xbb   : > { %v1095_v59 = vmul.f32 %v1000_v51, %v717_v37  ;;  %v995_v62 = vpop.permute.xlu0 %994  ;;  %v4379_v29 = vpop.permute.xlu2 %894  ;;  %v398_v37 = vunpack.c.h.bf16 %v344_v23  ;;  %v653_v51 = vadd.f32 %v4041_v53, %v595_v28  ;;  %2479 = vmatpush.bf16.msrb.mxu3 %v3575_v47  ;;  %v583_v8 = vmul.f32 %v4031_v49, %v525_v36  ;;  %v3583_v28 = vld [vmem:[%s5185_s6 + $0x108] sm:$0xff] }
  0xbc   : > { %v1094_v0 = vmul.f32 %v995_v62, %v716_v43  ;;  %2219 = vmatmul.bf16.gmra.mxu0 %v4340_v50  ;;  %2264 = vmatmul.bf16.gmra.mxu2 %v4337_v32  ;;  %v719_v22 = vmax.f32 %v665_v55, 0.0  ;;  %v696_v23 = vmax.f32 %v642_v56, 0.0 }
  0xbd   : > { %v1149_v10 = vpack.c.bf16 %v1095_v59, %v1095_v59  ;;  %v622_v59 = vadd.f32 %v4041_v53, %v564_v34  ;;  %v456_v63 = vsub.f32 %v398_v37, %v4004_v39  ;;  %v707_v12 = vmax.f32 %v653_v51, 0.0 }
  0xbe   : > { %v1148_v11 = vpack.c.bf16 %v1094_v0, %v1094_v0  ;;  %v3584_v0 = vld [vmem:[%s5185_s6 + $0x110] sm:$0xff]  ;;  %v641_v20 = vadd.f32 %v4041_v53, %v583_v8  ;;  %v513_v34 = vmul.f32 %v4013_v42, %v455_v14  ;;  %v1074_v46 = vmul.f32 %v4379_v29, %v696_v23 }
  0xbf   : > { %v1221_v21 = vunpack.c.l.b16 %v1149_v10  ;;  %v3558_v10 = vld [vmem:[%s5185_s6 + $0x40] sm:$0xff]  ;;  %2567 = vmatpush.bf16.msrb.mxu0 %v3584_v0  ;;  %2480 = vmatpush.bf16.msrb.mxu3 %v3574_v9  ;;  %v676_v24 = vmax.f32 %v622_v59, 0.0  ;;  %v396_v29 = vunpack.c.l.bf16 %v342_v54 }
  0xc0   : > { %v1220_v25 = vunpack.c.l.b16 %v1148_v11  ;;  %2302 = vmatpush.bf16.msrb.mxu1 %v3558_v10  ;;  %v695_v38 = vmax.f32 %v641_v20, 0.0 }
  0xc1   : > { %v454_v14 = vsub.f32 %v396_v29, %v4004_v39 }
  0xc2   : > { %v4381_v33 = vpack.c.b16 %v1221_v21, %v1220_v25  ;;  %v815_v35 = vpop.permute.xlu1 %814  ;;  %v514_v21 = vmul.f32 %v4013_v42, %v456_v63 }
  0xc3   : > { %v1058_v58 = vmul.f32 %v815_v35, %v680_v13  ;;  %v880_v43 = vpop.permute.xlu0 %879  ;;  %v608_v13 = vmul.f32 %v4031_v49, %v550_v52  ;;  %v795_v31 = vpop.permute.xlu2 %794  ;;  %v393_v35 = vunpack.c.l.bf16 %v339_v4  ;;  %2568 = vmatpush.bf16.msrb.mxu0 %v3583_v28  ;;  %v571_v52 = vmul.f32 %v4031_v49, %v513_v34  ;;  %v3582_v4 = vld [vmem:[%s5185_s6 + $0x100] sm:$0xff] }
  0xc4   : > { %v1071_v30 = vmul.f32 %v880_v43, %v693_v27  ;;  %2284 = vmatmul.bf16.gmra.mxu3 %v4381_v33  ;;  %v572_v40 = vmul.f32 %v4031_v49, %v514_v21  ;;  %v1097_v43 = vmul.f32 %v4332_v41, %v719_v22  ;;  %v1054_v47 = vmul.f32 %v795_v31, %v676_v24 }
  0xc5   : > { %v1112_v57 = vpack.c.bf16 %v1058_v58, %v1058_v58  ;;  %v666_v45 = vadd.f32 %v4041_v53, %v608_v13  ;;  %v3605_v58 = vld [vmem:[%s5185_s6 + $0x1b8] sm:$0xff]  ;;  %v451_v55 = vsub.f32 %v393_v35, %v4004_v39 }
  0xc6   : > { %v1125_v62 = vpack.c.bf16 %v1071_v30, %v1071_v30  ;;  %2740 = vmatpush.bf16.msra.mxu2 %v3605_v58  ;;  %v630_v59 = vadd.f32 %v4041_v53, %v572_v40  ;;  %v1108_v8 = vpack.c.bf16 %v1054_v47, %v1054_v47  ;;  %v1151_v0 = vpack.c.bf16 %v1097_v43, %v1097_v43  ;;  %v3621_v43 = vld [vmem:[%s5185_s6 + $0x238] sm:$0xff] }
  0xc7   : > { %v1196_v2 = vunpack.c.l.b16 %v1112_v57  ;;  %v720_v51 = vmax.f32 %v666_v45, 0.0  ;;  %2569 = vmatpush.bf16.msrb.mxu0 %v3582_v4  ;;  %v3604_v4 = vld [vmem:[%s5185_s6 + $0x1b0] sm:$0xff] }
  0xc8   : > { %v1205_v11 = vunpack.c.l.b16 %v1125_v62  ;;  %v1128_v62 = vpack.c.bf16 %v1074_v46, %v1074_v46  ;;  %v684_v10 = vmax.f32 %v630_v59, 0.0  ;;  %v1222_v20 = vunpack.c.l.b16 %v1151_v0 }
  0xc9   : > { %v4411_v15 = vpack.c.b16 %v1197_v6, %v1196_v2  ;;  %v629_v6 = vadd.f32 %v4041_v53, %v571_v52  ;;  %v509_v2 = vmul.f32 %v4013_v42, %v451_v55  ;;  %v3597_v42 = vld [vmem:[%s5185_s6 + $0x178] sm:$0xff]  ;;  %v1306_v0 = vshrl.u32 %v4230_v44, 16 }
  0xca   : > { %v4414_v18 = vpack.c.b16 %v1205_v11, %v1204_v5  ;;  %v955_v19 = vpop.permute.xlu1 %954  ;;  %v1207_v11 = vunpack.c.l.b16 %v1128_v62  ;;  %2651 = vmatpush.bf16.msra.mxu1 %v3597_v42  ;;  %2741 = vmatpush.bf16.msra.mxu2 %v3604_v4 }
  0xcb   : > { %v1086_v25 = vmul.f32 %v955_v19, %v708_v7  ;;  %v950_v27 = vpop.permute.xlu0 %949  ;;  %v3613_v19 = vld [vmem:[%s5185_s6 + $0x1f8] sm:$0xff]  ;;  %v683_v22 = vmax.f32 %v629_v6, 0.0  ;;  %v567_v23 = vmul.f32 %v4031_v49, %v509_v2  ;;  %2918 = vmatpush.bf16.msra.mxu0 %v3621_v43 }
  0xcc   : > { %5217 = vst [vmem:[#allocation4_spill] sm:$0xff] %v4414_v18  ;;  %v1085_v60 = vmul.f32 %v950_v27, %v707_v12  ;;  %2224 = vmatmul.bf16.gmra.mxu0 %v4411_v15  ;;  %2244 = vmatmul.bf16.gmra.mxu1 %v4414_v18  ;;  %v1272_v12 = vunpack.c.l.b16 %v1108_v8 }
  0xcd   : > { %v1140_v36 = vpack.c.bf16 %v1086_v25, %v1086_v25  ;;  %2829 = vmatpush.bf16.msra.mxu3 %v3613_v19  ;;  %v625_v35 = vadd.f32 %v4041_v53, %v567_v23  ;;  %v4495_v23 = vld [vmem:[%s5183_s4] ss:$0 sm:$0xff] }
  0xce   : > { %v1139_v37 = vpack.c.bf16 %v1085_v60, %v1085_v60  ;;  %v1288_v27 = vpack.c.b16 %v1272_v12, %v1272_v12  ;;  %v4458_v60 = vld [vmem:[%s5182_s3] ss:$0 sm:$0xff] }
  0xcf   : > { %v1215_v48 = vunpack.c.l.b16 %v1140_v36  ;;  %v512_v45 = vmul.f32 %v4458_v60, %v454_v14  ;;  %v679_v47 = vmax.f32 %v625_v35, 0.0 }
  0xd0   : > { %v1214_v30 = vunpack.c.l.b16 %v1139_v37  ;;  %v1313_v54 = vshll.u32 %v1288_v27, 16 }
  0xd1   : > { %v570_v58 = vmul.f32 %v4031_v49, %v512_v45  ;;  %v3596_v45 = vld [vmem:[%s5185_s6 + $0x170] sm:$0xff] }
  0xd2   : > { %v4434_v56 = vpack.c.b16 %v1215_v48, %v1214_v30  ;;  %v890_v57 = vpop.permute.xlu1 %889  ;;  %v1514_v48 = vrot.slane %v4230_v44, 1  ;;  %v1308_v30 = vshll.u32 %v4230_v44, 16  ;;  %2652 = vmatpush.bf16.msra.mxu1 %v3596_v45 }
  0xd3   : > { %v1073_v41 = vmul.f32 %v890_v57, %v695_v38  ;;  %v1015_v63 = vpop.permute.xlu0 %1014  ;;  %v1515_v38 = vrot.slane %v1288_v27, 1  ;;  %v628_v55 = vadd.f32 %v4041_v53, %v570_v58  ;;  %v4480_v53 = vld [vmem:[%s5181_s2] ss:$0 sm:$0xff]  ;;  %v1517_v27 = vrot.slane %v4340_v50, 1 }
  0xd4   : > { %v1098_v5 = vmul.f32 %v1015_v63, %v720_v51  ;;  %2269 = vmatmul.bf16.gmra.mxu2 %v4434_v56  ;;  %v345_v51 = vld [vmem:[%s3887_s19 + $0x2c] sm:$0x1]  ;;  %v1310_v8 = vrot.slane %v1308_v30, 1  ;;  %v1315_v63 = vrot.slane %v1313_v54, 1 }
  0xd5   : > { %v1127_v7 = vpack.c.bf16 %v1073_v41, %v1073_v41  ;;  %v1516_v49 = vsel %vm1513_vm0, %v1514_v48, %v1515_v38  ;;  %v399_v62 = vunpack.c.l.bf16 %v345_v51  ;;  %v682_v29 = vmax.f32 %v628_v55, 0.0  ;;  %v3620_v48 = vld [vmem:[%s5185_s6 + $0x230] sm:$0xff] }
  0xd6   : > { %v1152_v9 = vpack.c.bf16 %v1098_v5, %v1098_v5  ;;  %2919 = vmatpush.bf16.msra.mxu0 %v3620_v48 }
  0xd7   : > { %v1206_v13 = vunpack.c.l.b16 %v1127_v7  ;;  %v457_v2 = vsub.f32 %v399_v62, %v4480_v53  ;;  %v1311_v7 = vor.u32 %v1310_v8, %v1306_v0  ;;  %v1330_v62 = vshrl.u32 %v4411_v15, 16  ;;  %v351_v8 = vld [vmem:[%s3887_s19 + $0x44] sm:$0x1] }
  0xd8   : > { %v1223_v21 = vunpack.c.l.b16 %v1152_v9  ;;  %v1320_v9 = vshll.u32 %v4340_v50, 16  ;;  %v405_v0 = vunpack.c.l.bf16 %v351_v8 }
  0xd9   : > { %v4451_v24 = vpack.c.b16 %v1207_v11, %v1206_v13  ;;  %v1316_v12 = vsel %vm1304_vm1, %v1311_v7, %v1315_v63  ;;  %v515_v44 = vmul.f32 %v4458_v60, %v457_v2  ;;  %v1520_v63 = vrot.slane %v4411_v15, 1 }
  0xda   : > { %v4453_v39 = vpack.c.b16 %v1223_v21, %v1222_v20  ;;  %v835_v25 = vpop.permute.xlu1 %834  ;;  %v1322_v14 = vrot.slane %v1320_v9, 1  ;;  %v1318_v21 = vshrl.u32 %v4340_v50, 16  ;;  %v463_v9 = vsub.f32 %v405_v0, %v4480_v53 }
  0xdb   : > { %5218 = vst [vmem:[#allocation5_spill] sm:$0xff] %v4451_v24  ;;  %v1062_v28 = vmul.f32 %v835_v25, %v684_v10  ;;  %v830_v31 = vpop.permute.xlu0 %829  ;;  %v573_v25 = vmul.f32 %v4495_v23, %v515_v44  ;;  %v3603_v44 = vld [vmem:[%s5185_s6 + $0x1a8] sm:$0xff] }
  0xdc   : > { %v1061_v34 = vmul.f32 %v830_v31, %v683_v22  ;;  %2249 = vmatmul.bf16.gmra.mxu1 %v4451_v24  ;;  %2289 = vmatmul.bf16.gmra.mxu3 %v4453_v39  ;;  %v348_v22 = vld [vmem:[%s3887_s19 + $0x38] sm:$0x1]  ;;  %v3612_v31 = vld [vmem:[%s5185_s6 + $0x1f0] sm:$0xff] }
  0xdd   : > { %v1116_v36 = vpack.c.bf16 %v1062_v28, %v1062_v28  ;;  %v1323_v28 = vor.u32 %v1322_v14, %v1318_v21  ;;  %v402_v35 = vunpack.c.l.bf16 %v348_v22  ;;  %2830 = vmatpush.bf16.msra.mxu3 %v3612_v31  ;;  %v521_v14 = vmul.f32 %v4458_v60, %v463_v9  ;;  %2742 = vmatpush.bf16.msra.mxu2 %v3603_v44 }
  0xde   : > { %v1115_v37 = vpack.c.bf16 %v1061_v34, %v1061_v34 }
  0xdf   : > { %v1199_v40 = vunpack.c.l.b16 %v1116_v36  ;;  %v460_v58 = vsub.f32 %v402_v35, %v4480_v53 }
  0xe0   : > { %v1198_v46 = vunpack.c.l.b16 %v1115_v37 }
  0xe1   : > { %v518_v51 = vmul.f32 %v4458_v60, %v460_v58 }
  0xe2   : > { %v4471_v52 = vpack.c.b16 %v1199_v40, %v1198_v46  ;;  %v825_v5 = vpop.permute.xlu1 %824  ;;  %v1332_v46 = vshll.u32 %v4411_v15, 16 }
  0xe3   : > { %v810_v57 = vpop.permute.xlu0 %809  ;;  %v1060_v11 = vmul.f32 %v825_v5, %v682_v29 }
  0xe4   : > { %v1057_v59 = vmul.f32 %v810_v57, %v679_v47  ;;  %2229 = vmatmul.bf16.gmra.mxu0 %v4471_v52  ;;  %2392 = vmatmul.bf16.vlgmr.msrb.gmra.mxu2 %v1516_v49  ;;  %v840_v47 = vpop.permute.xlu2 %839  ;;  %v1334_v55 = vrot.slane %v1332_v46, 1  ;;  %v1342_v22 = vshrl.u32 %v4471_v52, 16  ;;  %v1523_v31 = vrot.slane %v4471_v52, 1  ;;  %v3619_v46 = vld [vmem:[%s5185_s6 + $0x228] sm:$0xff] }
  0xe5   : > { %v1114_v19 = vpack.c.bf16 %v1060_v11, %v1060_v11  ;;  %v1344_v11 = vshll.u32 %v4471_v52, 16  ;;  %2920 = vmatpush.bf16.msra.mxu0 %v3619_v46 }
  0xe6   : > { %v1111_v41 = vpack.c.bf16 %v1057_v59, %v1057_v59  ;;  %v576_v59 = vmul.f32 %v4495_v23, %v518_v51  ;;  %v1335_v29 = vor.u32 %v1334_v55, %v1330_v62 }
  0xe7   : > { %v1274_v34 = vunpack.c.l.b16 %v1114_v19  ;;  %v1346_v19 = vrot.slane %v1344_v11, 1 }
  0xe8   : > { %v1273_v6 = vunpack.c.l.b16 %v1111_v41 }
  0xe9   : > { %v1290_v40 = vpack.c.b16 %v1274_v34, %v1274_v34  ;;  %v1347_v45 = vor.u32 %v1346_v19, %v1342_v22 }
  0xea   : > { %v1289_v10 = vpack.c.b16 %v1273_v6, %v1273_v6  ;;  %v870_v51 = vpop.permute.xlu1 %869 }
  0xeb   : > { %v1337_v30 = vshll.u32 %v1290_v40, 16  ;;  %v1521_v49 = vrot.slane %v1290_v40, 1 }
  0xec   : > { %v1325_v13 = vshll.u32 %v1289_v10, 16  ;;  %2303 = vmatmul.bf16.vlgmr.msrb.gmra.mxu1 %v1316_v12  ;;  %2481 = vmatmul.bf16.vlgmr.msrb.gmra.mxu3 %v4340_v50  ;;  %v1518_v20 = vrot.slane %v1289_v10, 1  ;;  %v4513_v50 = vld [vmem:[%s5184_s5] ss:$0 sm:$0xff]  ;;  %v855_v12 = vpop.permute.xlu0 %854  ;;  %v885_v22 = vpop.permute.xlu2 %884 }
  0xed   : > { %v631_v38 = vadd.f32 %v4513_v50, %v573_v25  ;;  %v1339_v57 = vrot.slane %v1337_v30, 1  ;;  %v634_v5 = vadd.f32 %v4513_v50, %v576_v59  ;;  %v4529_v6 = vsel %vm1513_vm0, %v1520_v63, %v1521_v49  ;;  %v354_v25 = vld [vmem:[%s3887_s19 + $0x50] sm:$0x1] }
  0xee   : > { %v1327_v42 = vrot.slane %v1325_v13, 1  ;;  %v4506_v36 = vsel %vm1513_vm0, %v1517_v27, %v1518_v20  ;;  %v3595_v20 = vld [vmem:[%s5185_s6 + $0x168] sm:$0xff]  ;;  %v579_v27 = vmul.f32 %v4495_v23, %v521_v14  ;;  %v1354_v59 = vshrl.u32 %v4083_v26, 16 }
  0xef   : > { %v685_v43 = vmax.f32 %v631_v38, 0.0  ;;  %v4532_v2 = vsel %vm1304_vm1, %v1335_v29, %v1339_v57  ;;  %v688_v10 = vmax.f32 %v634_v5, 0.0  ;;  %2653 = vmatpush.bf16.msra.mxu1 %v3595_v20  ;;  %v357_v5 = vld [vmem:[%s3887_s19 + $0x5c] sm:$0x1] }
  0xf0   : > { %v1328_v37 = vsel %vm1304_vm1, %v1323_v28, %v1327_v42  ;;  %v3611_v42 = vld [vmem:[%s5185_s6 + $0x1e8] sm:$0xff]  ;;  %v637_v38 = vadd.f32 %v4513_v50, %v579_v27  ;;  %v1368_v27 = vshll.u32 %v4301_v3, 16 }
  0xf1   : > { %v1063_v54 = vmul.f32 %v840_v47, %v685_v43  ;;  %v1066_v4 = vmul.f32 %v855_v12, %v688_v10  ;;  %2831 = vmatpush.bf16.msra.mxu3 %v3611_v42  ;;  %v411_v12 = vunpack.c.l.bf16 %v357_v5 }
  0xf2   : > { %v691_v48 = vmax.f32 %v637_v38, 0.0  ;;  %v1370_v38 = vrot.slane %v1368_v27, 1 }
  0xf3   : > { %v1117_v41 = vpack.c.bf16 %v1063_v54, %v1063_v54  ;;  %v1120_v28 = vpack.c.bf16 %v1066_v4, %v1066_v4  ;;  %v1356_v54 = vshll.u32 %v4083_v26, 16  ;;  %v469_v20 = vsub.f32 %v411_v12, %v4480_v53 }
  0xf4   : > { %2397 = vmatmul.bf16.gmra.mxu2 %v4506_v36  ;;  %2570 = vmatmul.bf16.vlgmr.msrb.gmra.mxu0 %v1328_v37  ;;  %v1069_v57 = vmul.f32 %v870_v51, %v691_v48 }
  0xf5   : > { %v1275_v7 = vunpack.c.l.b16 %v1117_v41  ;;  %v1276_v40 = vunpack.c.l.b16 %v1120_v28  ;;  %v1358_v62 = vrot.slane %v1356_v54, 1  ;;  %v3602_v28 = vld [vmem:[%s5185_s6 + $0x1a0] sm:$0xff] }
  0xf6   : > { %v1123_v41 = vpack.c.bf16 %v1069_v57, %v1069_v57  ;;  %2743 = vmatpush.bf16.msra.mxu2 %v3602_v28 }
  0xf7   : > { %v1291_v13 = vpack.c.b16 %v1275_v7, %v1275_v7  ;;  %v1292_v30 = vpack.c.b16 %v1276_v40, %v1276_v40  ;;  %v1526_v7 = vrot.slane %v4083_v26, 1  ;;  %v1359_v9 = vor.u32 %v1358_v62, %v1354_v59 }
  0xf8   : > { %v1277_v11 = vunpack.c.l.b16 %v1123_v41  ;;  %v1366_v40 = vshrl.u32 %v4301_v3, 16 }
  0xf9   : > { %v1349_v21 = vshll.u32 %v1291_v13, 16  ;;  %v1524_v35 = vrot.slane %v1291_v13, 1  ;;  %v1361_v49 = vshll.u32 %v1292_v30, 16  ;;  %v1527_v29 = vrot.slane %v1292_v30, 1  ;;  %v360_v30 = vld [vmem:[%s3887_s19 + $0x68] sm:$0x1] }
  0xfa   : > { %v1293_v42 = vpack.c.b16 %v1277_v11, %v1277_v11  ;;  %v1371_v59 = vor.u32 %v1370_v38, %v1366_v40  ;;  %v414_v62 = vunpack.c.l.bf16 %v360_v30  ;;  %v363_v40 = vld [vmem:[%s3887_s19 + $0x74] sm:$0x1]  ;;  %v1532_v30 = vrot.slane %v4414_v18, 1 }
  0xfb   : > { %v1351_v34 = vrot.slane %v1349_v21, 1  ;;  %v4556_v58 = vsel %vm1513_vm0, %v1523_v31, %v1524_v35  ;;  %v1363_v63 = vrot.slane %v1361_v49, 1  ;;  %v4579_v13 = vsel %vm1513_vm0, %v1526_v7, %v1527_v29  ;;  %v3610_v35 = vld [vmem:[%s5185_s6 + $0x1e0] sm:$0xff] }
  0xfc   : > { %2308 = vmatmul.bf16.gmra.mxu1 %v1328_v37  ;;  %2486 = vmatmul.bf16.gmra.mxu3 %v4411_v15  ;;  %v408_v37 = vunpack.c.l.bf16 %v354_v25  ;;  %5219 = vst [vmem:[#allocation6_spill] sm:$0xff] %v4579_v13  ;;  %v1530_v48 = vrot.slane %v1293_v42, 1  ;;  %v1529_v49 = vrot.slane %v4301_v3, 1  ;;  %v3618_v7 = vld [vmem:[%s5185_s6 + $0x220] sm:$0xff] }
  0xfd   : > { %v4559_v43 = vsel %vm1304_vm1, %v1347_v45, %v1351_v34  ;;  %v4582_v44 = vsel %vm1304_vm1, %v1359_v9, %v1363_v63  ;;  %v1373_v45 = vshll.u32 %v1293_v42, 16  ;;  %v527_v34 = vmul.f32 %v4458_v60, %v469_v20  ;;  %2832 = vmatpush.bf16.msra.mxu3 %v3610_v35  ;;  %2921 = vmatpush.bf16.msra.mxu0 %v3618_v7 }
  0xfe   : > { %v466_v47 = vsub.f32 %v408_v37, %v4480_v53  ;;  %v3594_v37 = vld [vmem:[%s5185_s6 + $0x160] sm:$0xff]  ;;  %v4622_v29 = vsel %vm1513_vm0, %v1529_v49, %v1530_v48  ;;  %v1380_v42 = vshll.u32 %v4414_v18, 16  ;;  %v1378_v35 = vshrl.u32 %v4414_v18, 16 }
  0xff   : > { %2654 = vmatpush.bf16.msra.mxu1 %v3594_v37  ;;  %v585_v51 = vmul.f32 %v4495_v23, %v527_v34  ;;  %5222 = vst [vmem:[#allocation9_spill] sm:$0xff] %v4622_v29  ;;  %v417_v49 = vunpack.c.l.bf16 %v363_v40  ;;  %v3609_v40 = vld [vmem:[%s5185_s6 + $0x1d8] sm:$0xff] }
 0x100   : > { %v524_v55 = vmul.f32 %v4458_v60, %v466_v47  ;;  %v1375_v47 = vrot.slane %v1373_v45, 1  ;;  %v1382_v34 = vrot.slane %v1380_v42, 1 }
 0x101   : > { %v4586_v14 = vpop.f32.mrf.mxu1  ;;  %v643_v41 = vadd.f32 %v4513_v50, %v585_v51  ;;  %2833 = vmatpush.bf16.msra.mxu3 %v3609_v40 }
 0x102   : > { %v582_v8 = vmul.f32 %v4495_v23, %v524_v55  ;;  %v4625_v5 = vsel %vm1304_vm1, %v1371_v59, %v1375_v47  ;;  %v1383_v51 = vor.u32 %v1382_v34, %v1378_v35  ;;  %v3601_v35 = vld [vmem:[%s5185_s6 + $0x198] sm:$0xff] }
 0x103   : > { %5223 = vst [vmem:[#allocation10_spill] sm:$0xff] %v4625_v5  ;;  %v697_v11 = vmax.f32 %v643_v41, 0.0  ;;  %2744 = vmatpush.bf16.msra.mxu2 %v3601_v35 }
 0x104   : > { %2402 = vmatmul.bf16.gmra.mxu2 %v4529_v6  ;;  %2575 = vmatmul.bf16.gmra.mxu0 %v4532_v2  ;;  %v640_v10 = vadd.f32 %v4513_v50, %v582_v8 }
 0x106   : > { %v694_v19 = vmax.f32 %v640_v10, 0.0  ;;  %v472_v10 = vsub.f32 %v414_v62, %v4480_v53 }
 0x108   : > { %v1072_v31 = vmul.f32 %v885_v22, %v694_v19  ;;  %v900_v19 = vpop.permute.xlu0 %899  ;;  %v530_v27 = vmul.f32 %v4458_v60, %v472_v10 }
 0x109   : > { %v4611_v54 = vpop.f32.mrf.mxu1  ;;  %v1075_v28 = vmul.f32 %v900_v19, %v697_v11  ;;  %v475_v11 = vsub.f32 %v417_v49, %v4480_v53 }
 0x10a   : > { %v1126_v46 = vpack.c.bf16 %v1072_v31, %v1072_v31 }
 0x10b   : > { %v1129_v47 = vpack.c.bf16 %v1075_v28, %v1075_v28  ;;  %v1392_v28 = vshll.u32 %v4451_v24, 16  ;;  %v533_v34 = vmul.f32 %v4458_v60, %v475_v11 }
 0x10c   : > { %2313 = vmatmul.bf16.gmra.mxu1 %v4532_v2  ;;  %2491 = vmatmul.bf16.gmra.mxu3 %v4471_v52  ;;  %v1278_v8 = vunpack.c.l.b16 %v1126_v46  ;;  %v588_v46 = vmul.f32 %v4495_v23, %v530_v27 }
 0x10d   : > { %v1279_v62 = vunpack.c.l.b16 %v1129_v47 }
 0x10e   : > { %v1294_v9 = vpack.c.b16 %v1278_v8, %v1278_v8  ;;  %v646_v59 = vadd.f32 %v4513_v50, %v588_v46  ;;  %v3593_v46 = vld [vmem:[%s5185_s6 + $0x158] sm:$0xff] }
 0x10f   : > { %v1295_v42 = vpack.c.b16 %v1279_v62, %v1279_v62  ;;  %2655 = vmatpush.bf16.msra.mxu1 %v3593_v46  ;;  %v930_v46 = vpop.permute.xlu2 %929 }
 0x110   : > { %v1385_v22 = vshll.u32 %v1294_v9, 16  ;;  %v1533_v38 = vrot.slane %v1294_v9, 1  ;;  %v700_v19 = vmax.f32 %v646_v59, 0.0 }
 0x111   : > { %v1536_v62 = vrot.slane %v1295_v42, 1 }
 0x112   : > { %v1387_v37 = vrot.slane %v1385_v22, 1  ;;  %v4653_v8 = vsel %vm1513_vm0, %v1532_v30, %v1533_v38  ;;  %v915_v22 = vpop.permute.xlu1 %914  ;;  %v1397_v38 = vshll.u32 %v1295_v42, 16  ;;  %v1394_v30 = vrot.slane %v1392_v28, 1 }
 0x113   : > { %5225 = vst [vmem:[#allocation12_spill] sm:$0xff] %v4653_v8 }
 0x114   : > { %2407 = vmatmul.bf16.gmra.mxu2 %v4556_v58  ;;  %2580 = vmatmul.bf16.gmra.mxu0 %v4559_v43  ;;  %v4656_v41 = vsel %vm1304_vm1, %v1383_v51, %v1387_v37  ;;  %v1078_v37 = vmul.f32 %v915_v22, %v700_v19  ;;  %v591_v51 = vmul.f32 %v4495_v23, %v533_v34  ;;  %v1399_v59 = vrot.slane %v1397_v38, 1  ;;  %v3617_v38 = vld [vmem:[%s5185_s6 + $0x218] sm:$0xff] }
 0x115   : > { %5226 = vst [vmem:[#allocation13_spill] sm:$0xff] %v4656_v41  ;;  %v1390_v22 = vshrl.u32 %v4451_v24, 16  ;;  %2922 = vmatpush.bf16.msra.mxu0 %v3617_v38 }
 0x116   : > { %v1132_v49 = vpack.c.bf16 %v1078_v37, %v1078_v37  ;;  %v649_v35 = vadd.f32 %v4513_v50, %v591_v51 }
 0x117   : > { %v1395_v28 = vor.u32 %v1394_v30, %v1390_v22  ;;  %v1404_v22 = vshll.u32 %v4180_v1, 16 }
 0x118   : > { %v1280_v34 = vunpack.c.l.b16 %v1132_v49  ;;  %v703_v30 = vmax.f32 %v649_v35, 0.0 }
 0x119   : > { %v4699_v42 = vsel %vm1304_vm1, %v1395_v28, %v1399_v59  ;;  %v1406_v35 = vrot.slane %v1404_v22, 1 }
 0x11a   : > { %5231 = vst [vmem:[#allocation18_spill] sm:$0xff] %v4699_v42  ;;  %v1296_v51 = vpack.c.b16 %v1280_v34, %v1280_v34  ;;  %v1081_v28 = vmul.f32 %v930_v46, %v703_v30  ;;  %v369_v46 = vld [vmem:[%s3887_s19 + $0x8c] sm:$0x1] }
 0x11c   : > { %2318 = vmatmul.bf16.gmra.mxu1 %v4559_v43  ;;  %2496 = vmatmul.bf16.gmra.mxu3 %v4083_v26  ;;  %v1135_v34 = vpack.c.bf16 %v1081_v28, %v1081_v28  ;;  %v1539_v38 = vrot.slane %v1296_v51, 1  ;;  %v423_v28 = vunpack.c.l.bf16 %v369_v46 }
 0x11e   : > { %v4588_v4 = vpop.f32.mrf.mxu3  ;;  %v1281_v22 = vunpack.c.l.b16 %v1135_v34 }
 0x11f   : > { %v4573_v0 = vpop.f32.mrf.mxu2  ;;  %5220 = vst [vmem:[#allocation7_spill] sm:$0xff] %v4588_v4 }
 0x121   : > { %v4593_v25 = vpop.f32.mrf.mxu0 }
 0x124   : > { %2412 = vmatmul.bf16.gmra.mxu2 %v4579_v13  ;;  %2585 = vmatmul.bf16.gmra.mxu0 %v4582_v44  ;;  %v1541_v13 = vrot.slane %v4264_v16, 1 }
 0x126   : > { %v4613_v55 = vpop.f32.mrf.mxu3 }
 0x127   : > { %v4591_v21 = vpop.f32.mrf.mxu2  ;;  %5221 = vst [vmem:[#allocation8_spill] sm:$0xff] %v4613_v55 }
 0x129   : > { %v4619_v63 = vpop.f32.mrf.mxu0 }
 0x12c   : > { %2323 = vmatmul.bf16.gmra.mxu1 %v4582_v44  ;;  %2501 = vmatmul.bf16.gmra.mxu3 %v4301_v3 }
 0x12e   : > { %v4636_v20 = vpop.f32.mrf.mxu3 }
 0x12f   : > { %v4615_v57 = vpop.f32.mrf.mxu2  ;;  %5224 = vst [vmem:[#allocation11_spill] sm:$0xff] %v4636_v20 }
 0x131   : > { %v4633_v12 = vpop.f32.mrf.mxu1 }
 0x134   : > { %2417 = vmatmul.bf16.gmra.mxu2 %v4622_v29  ;;  %2590 = vmatmul.bf16.gmra.mxu0 %v4625_v5  ;;  %v481_v29 = vsub.f32 %v423_v28, %v4480_v53 }
 0x136   : > { %v4658_v7 = vpop.f32.mrf.mxu3  ;;  %v539_v46 = vmul.f32 %v4458_v60, %v481_v29 }
 0x137   : > { %v4639_v31 = vpop.f32.mrf.mxu2  ;;  %5227 = vst [vmem:[#allocation14_spill] sm:$0xff] %v4658_v7  ;;  %v366_v7 = vld [vmem:[%s3887_s19 + $0x80] sm:$0x1] }
 0x138   : > { %v420_v40 = vunpack.c.l.bf16 %v366_v7 }
 0x139   : > { %v4641_v45 = vpop.f32.mrf.mxu0  ;;  %v4648_v48 = vpop.f32.mrf.mxu1 }
 0x13a   : > { %v478_v7 = vsub.f32 %v420_v40, %v4480_v53 }
 0x13c   : > { %2328 = vmatmul.bf16.gmra.mxu1 %v4625_v5  ;;  %2506 = vmatmul.bf16.gmra.mxu3 %v4414_v18 }
 0x13f   : > { %v4662_v9 = vpop.f32.mrf.mxu2 }
 0x141   : > { %v4664_v10 = vpop.f32.mrf.mxu0 }
 0x144   : > { %2422 = vmatmul.bf16.gmra.mxu2 %v4653_v8  ;;  %2595 = vmatmul.bf16.gmra.mxu0 %v4656_v41  ;;  %v536_v8 = vmul.f32 %v4458_v60, %v478_v7 }
 0x147   : > { %v4682_v47 = vpop.f32.mrf.mxu3  ;;  %v4685_v11 = vpop.f32.mrf.mxu2 }
 0x148   : > { %5228 = vst [vmem:[#allocation15_spill] sm:$0xff] %v4682_v47  ;;  %v1535_v47 = vrot.slane %v4451_v24, 1 }
 0x149   : > { %v4667_v27 = vpop.f32.mrf.mxu1  ;;  %5229 = vst [vmem:[#allocation16_spill] sm:$0xff] %v4685_v11  ;;  %v4687_v19 = vpop.f32.mrf.mxu0 }
 0x14a   : > { %v4696_v37 = vsel %vm1513_vm0, %v1535_v47, %v1536_v62 }
 0x14b   : > { %5230 = vst [vmem:[#allocation17_spill] sm:$0xff] %v4696_v37 }
 0x14c   : > { %2333 = vmatmul.bf16.gmra.mxu1 %v4656_v41  ;;  %2511 = vmatmul.bf16.gmra.mxu3 %v4451_v24  ;;  %v1402_v41 = vshrl.u32 %v4180_v1, 16 }
 0x14e   : > { %v1407_v4 = vor.u32 %v1406_v35, %v1402_v41  ;;  %v945_v35 = vpop.permute.xlu0 %944 }
 0x14f   : > { %v4707_v49 = vpop.f32.mrf.mxu3 }
 0x150   : > { %5232 = vst [vmem:[#allocation19_spill] sm:$0xff] %v4707_v49  ;;  %v594_v49 = vmul.f32 %v4495_v23, %v536_v8 }
 0x151   : > { %v4691_v20 = vpop.f32.mrf.mxu1  ;;  %v4711_v59 = vpop.f32.mrf.mxu0 }
 0x154   : > { %2427 = vmatmul.bf16.gmra.mxu2 %v4696_v37  ;;  %2600 = vmatmul.bf16.gmra.mxu0 %v4699_v42  ;;  %v1409_v37 = vshll.u32 %v1296_v51, 16 }
 0x156   : > { %v1411_v40 = vrot.slane %v1409_v37, 1  ;;  %v652_v37 = vadd.f32 %v4513_v50, %v594_v49 }
 0x157   : > { %v4709_v47 = vpop.f32.mrf.mxu2 }
 0x158   : > { %5233 = vst [vmem:[#allocation20_spill] sm:$0xff] %v4709_v47  ;;  %v4736_v51 = vsel %vm1304_vm1, %v1407_v4, %v1411_v40  ;;  %v706_v18 = vmax.f32 %v652_v37, 0.0  ;;  %v3600_v40 = vld [vmem:[%s5185_s6 + $0x190] sm:$0xff] }
 0x159   : > { %v4713_v62 = vpop.f32.mrf.mxu1  ;;  %5237 = vst [vmem:[#allocation24_spill] sm:$0xff] %v4736_v51  ;;  %v3608_v37 = vld [vmem:[%s5185_s6 + $0x1d0] sm:$0xff]  ;;  %2745 = vmatpush.bf16.msra.mxu2 %v3600_v40 }
 0x15a   : > { %2834 = vmatpush.bf16.msra.mxu3 %v3608_v37 }
 0x15c   : > { %2338 = vmatmul.bf16.gmra.mxu1 %v4699_v42  ;;  %2516 = vmatmul.bf16.gmra.mxu3 %v4180_v1  ;;  %v1538_v42 = vrot.slane %v4180_v1, 1 }
 0x15e   : > { %v4733_v8 = vsel %vm1513_vm0, %v1538_v42, %v1539_v38  ;;  %v1416_v42 = vshll.u32 %v4264_v16, 16 }
 0x15f   : > { %v4720_v24 = vpop.f32.mrf.mxu2  ;;  %v4722_v55 = vpop.f32.mrf.mxu3  ;;  %5236 = vst [vmem:[#allocation23_spill] sm:$0xff] %v4733_v8 }
 0x160   : > { %5234 = vst [vmem:[#allocation21_spill] sm:$0xff] %v4720_v24 }
 0x161   : > { %5235 = vst [vmem:[#allocation22_spill] sm:$0xff] %v4722_v55  ;;  %v4726_v30 = vpop.f32.mrf.mxu0  ;;  %v4728_v7 = vpop.f32.mrf.mxu1  ;;  %v1297_v55 = vpack.c.b16 %v1281_v22, %v1281_v22  ;;  %v1084_v22 = vmul.f32 %v945_v35, %v706_v18  ;;  %v372_v35 = vld [vmem:[%s3887_s19 + $0x98] sm:$0x1] }
 0x163   : > { %v1421_v38 = vshll.u32 %v1297_v55, 16  ;;  %v1542_v29 = vrot.slane %v1297_v55, 1 }
 0x164   : > { %2432 = vmatmul.bf16.gmra.mxu2 %v4733_v8  ;;  %2605 = vmatmul.bf16.gmra.mxu0 %v4736_v51  ;;  %v597_v8 = vmul.f32 %v4495_v23, %v539_v46 }
 0x165   : > { %v1423_v18 = vrot.slane %v1421_v38, 1  ;;  %v4768_v37 = vsel %vm1513_vm0, %v1541_v13, %v1542_v29 }
 0x166   : > { %v655_v38 = vadd.f32 %v4513_v50, %v597_v8  ;;  %v960_v8 = vpop.permute.xlu1 %959 }
 0x167   : > { %v4741_v1 = vpop.f32.mrf.mxu3  ;;  %v2393_v41 = vpop.f32.mrf.mxu2 }
 0x168   : > { %5238 = vst [vmem:[#allocation25_spill] sm:$0xff] %v4741_v1  ;;  %v1414_v1 = vshrl.u32 %v4264_v16, 16 }
 0x169   : > { %v4743_v34 = vpop.f32.mrf.mxu0  ;;  %v2304_v49 = vpop.f32.mrf.mxu1 }
 0x16a   : > { %v2305_v4 = vadd.f32 %v2304_v49, %v4593_v25  ;;  %v3592_v25 = vld [vmem:[%s5185_s6 + $0x150] sm:$0xff]  ;;  %v1418_v49 = vrot.slane %v1416_v42, 1  ;;  %v426_v42 = vunpack.c.l.bf16 %v372_v35 }
 0x16b   : > { %2656 = vmatpush.bf16.msra.mxu1 %v3592_v25  ;;  %v1428_v25 = vshll.u32 %v4337_v32, 16 }
 0x16c   : > { %2343 = vmatmul.bf16.gmra.mxu1 %v4736_v51  ;;  %2521 = vmatmul.bf16.gmra.mxu3 %v4264_v16  ;;  %v2394_v28 = vadd.f32 %v2393_v41, %v2305_v4  ;;  %v1138_v41 = vpack.c.bf16 %v1084_v22, %v1084_v22  ;;  %v1419_v3 = vor.u32 %v1418_v49, %v1414_v1  ;;  %v3616_v1 = vld [vmem:[%s5185_s6 + $0x210] sm:$0xff] }
 0x16d   : > { %2923 = vmatpush.bf16.msra.mxu0 %v3616_v1 }
 0x16e   : > { %v1282_v55 = vunpack.c.l.b16 %v1138_v41  ;;  %v4771_v46 = vsel %vm1304_vm1, %v1419_v3, %v1423_v18 }
 0x16f   : > { %v2395_v4 = vpop.f32.mrf.mxu2  ;;  %v2482_v51 = vpop.f32.mrf.mxu3 }
 0x170   : > { %v2483_v24 = vadd.f32 %v2482_v51, %v2394_v28 }
 0x171   : > { %v2306_v5 = vpop.f32.mrf.mxu1  ;;  %v2571_v47 = vpop.f32.mrf.mxu0 }
 0x172   : > { %v2307_v40 = vadd.f32 %v2306_v5, %v4619_v63  ;;  %v4764_v11 = vadd.f32 %v2571_v47, %v2483_v24  ;;  %v484_v24 = vsub.f32 %v426_v42, %v4480_v53  ;;  %v709_v63 = vmax.f32 %v655_v38, 0.0 }
 0x173   : > { %v1298_v5 = vpack.c.b16 %v1282_v55, %v1282_v55  ;;  %v1430_v42 = vrot.slane %v1428_v25, 1 }
 0x174   : > { %2437 = vmatmul.bf16.gmra.mxu2 %v4768_v37  ;;  %2610 = vmatmul.bf16.gmra.mxu0 %v4771_v46  ;;  %v2396_v51 = vadd.f32 %v2395_v4, %v2307_v40  ;;  %v542_v49 = vmul.f32 %v4458_v60, %v484_v24  ;;  %v1087_v35 = vmul.f32 %v960_v8, %v709_v63  ;;  %v1544_v8 = vrot.slane %v4337_v32, 1 }
 0x175   : > { %v1433_v41 = vshll.u32 %v1298_v5, 16 }
 0x176   : > { %v600_v40 = vmul.f32 %v4495_v23, %v542_v49  ;;  %v1141_v38 = vpack.c.bf16 %v1087_v35, %v1087_v35 }
 0x177   : > { %v2398_v47 = vpop.f32.mrf.mxu2  ;;  %v2484_v13 = vpop.f32.mrf.mxu3  ;;  %v1435_v55 = vrot.slane %v1433_v41, 1 }
 0x178   : > { %v2485_v22 = vadd.f32 %v2484_v13, %v2396_v51  ;;  %v1545_v51 = vrot.slane %v1298_v5, 1  ;;  %v1426_v13 = vshrl.u32 %v4337_v32, 16  ;;  %v1283_v49 = vunpack.c.l.b16 %v1141_v38 }
 0x179   : > { %v2309_v3 = vpop.f32.mrf.mxu1  ;;  %v2573_v28 = vpop.f32.mrf.mxu0 }
 0x17a   : > { %v2310_v18 = vadd.f32 %v2309_v3, %v4641_v45  ;;  %v4782_v29 = vadd.f32 %v2573_v28, %v2485_v22  ;;  %v375_v45 = vld [vmem:[%s3887_s19 + $0xa4] sm:$0x1]  ;;  %v1431_v28 = vor.u32 %v1430_v42, %v1426_v13  ;;  %v4795_v5 = vsel %vm1513_vm0, %v1544_v8, %v1545_v51 }
 0x17b   : > { %v1440_v51 = vshll.u32 %v4434_v56, 16 }
 0x17c   : > { %5239 = vst [vmem:[#allocation26_spill] sm:$0xff] %v4782_v29  ;;  %2348 = vmatmul.bf16.gmra.mxu1 %v4771_v46  ;;  %2526 = vmatmul.bf16.gmra.mxu3 %v4337_v32  ;;  %v2399_v4 = vadd.f32 %v2398_v47, %v2310_v18  ;;  %v658_v29 = vadd.f32 %v4513_v50, %v600_v40  ;;  %v429_v18 = vunpack.c.l.bf16 %v375_v45 }
 0x17d   : > { %v4798_v35 = vsel %vm1304_vm1, %v1431_v28, %v1435_v55  ;;  %v1299_v40 = vpack.c.b16 %v1283_v49, %v1283_v49  ;;  %v1442_v49 = vrot.slane %v1440_v51, 1 }
 0x17e   : > { %v712_v42 = vmax.f32 %v658_v29, 0.0  ;;  %v3599_v29 = vld [vmem:[%s5185_s6 + $0x188] sm:$0xff] }
 0x17f   : > { %v2400_v1 = vpop.f32.mrf.mxu2  ;;  %v2487_v24 = vpop.f32.mrf.mxu3  ;;  %2746 = vmatpush.bf16.msra.mxu2 %v3599_v29 }
 0x180   : > { %v2488_v22 = vadd.f32 %v2487_v24, %v2399_v4  ;;  %v975_v4 = vpop.permute.xlu2 %974 }
 0x181   : > { %v2311_v3 = vpop.f32.mrf.mxu1  ;;  %v2576_v63 = vpop.f32.mrf.mxu0 }
 0x182   : > { %v2312_v47 = vadd.f32 %v2311_v3, %v4664_v10  ;;  %v4792_v25 = vadd.f32 %v2576_v63, %v2488_v22  ;;  %v487_v10 = vsub.f32 %v429_v18, %v4480_v53  ;;  %v1090_v3 = vmul.f32 %v975_v4, %v712_v42  ;;  %v378_v42 = vld [vmem:[%s3887_s19 + $0xb0] sm:$0x1] }
 0x183   : > { %v1548_v4 = vrot.slane %v1299_v40, 1  ;;  %v432_v51 = vunpack.c.l.bf16 %v378_v42 }
 0x184   : > { %5240 = vst [vmem:[#allocation27_spill] sm:$0xff] %v4792_v25  ;;  %2442 = vmatmul.bf16.gmra.mxu2 %v4795_v5  ;;  %2615 = vmatmul.bf16.gmra.mxu0 %v4798_v35  ;;  %v2401_v41 = vadd.f32 %v2400_v1, %v2312_v47  ;;  %v1445_v1 = vshll.u32 %v1299_v40, 16  ;;  %v545_v8 = vmul.f32 %v4458_v60, %v487_v10  ;;  %v3607_v47 = vld [vmem:[%s5185_s6 + $0x1c8] sm:$0xff] }
 0x185   : > { %v1144_v18 = vpack.c.bf16 %v1090_v3, %v1090_v3  ;;  %2835 = vmatpush.bf16.msra.mxu3 %v3607_v47 }
 0x186   : > { %v603_v10 = vmul.f32 %v4495_v23, %v545_v8 }
 0x187   : > { %v2403_v24 = vpop.f32.mrf.mxu2  ;;  %v2489_v13 = vpop.f32.mrf.mxu3 }
 0x188   : > { %v2490_v38 = vadd.f32 %v2489_v13, %v2401_v41  ;;  %v1447_v41 = vrot.slane %v1445_v1, 1  ;;  %v1284_v1 = vunpack.c.l.b16 %v1144_v18  ;;  %v661_v40 = vadd.f32 %v4513_v50, %v603_v10 }
 0x189   : > { %v2314_v45 = vpop.f32.mrf.mxu1  ;;  %v2578_v22 = vpop.f32.mrf.mxu0 }
 0x18a   : > { %v2315_v55 = vadd.f32 %v2314_v45, %v4687_v19  ;;  %v4805_v63 = vadd.f32 %v2578_v22, %v2490_v38  ;;  %v3591_v19 = vld [vmem:[%s5185_s6 + $0x148] sm:$0xff]  ;;  %v1438_v38 = vshrl.u32 %v4434_v56, 16  ;;  %v715_v18 = vmax.f32 %v661_v40, 0.0 }
 0x18b   : > { %2657 = vmatpush.bf16.msra.mxu1 %v3591_v19  ;;  %v1300_v19 = vpack.c.b16 %v1284_v1, %v1284_v1 }
 0x18c   : > { %5241 = vst [vmem:[#allocation28_spill] sm:$0xff] %v4805_v63  ;;  %2353 = vmatmul.bf16.gmra.mxu1 %v4798_v35  ;;  %2531 = vmatmul.bf16.gmra.mxu3 %v4434_v56  ;;  %v2404_v28 = vadd.f32 %v2403_v24, %v2315_v55  ;;  %v1547_v63 = vrot.slane %v4434_v56, 1  ;;  %v1443_v25 = vor.u32 %v1442_v49, %v1438_v38 }
 0x18d   : > { %v490_v49 = vsub.f32 %v432_v51, %v4480_v53  ;;  %v1551_v1 = vrot.slane %v1300_v19, 1 }
 0x18e   : > { %v4828_v8 = vsel %vm1513_vm0, %v1547_v63, %v1548_v4  ;;  %v4831_v47 = vsel %vm1304_vm1, %v1443_v25, %v1447_v41  ;;  %v990_v4 = vpop.permute.xlu0 %989 }
 0x18f   : > { %v2405_v13 = vpop.f32.mrf.mxu2  ;;  %v2492_v24 = vpop.f32.mrf.mxu3 }
 0x190   : > { %v2493_v45 = vadd.f32 %v2492_v24, %v2404_v28  ;;  %v1452_v24 = vshll.u32 %v4176_v61, 16 }
 0x191   : > { %v2316_v22 = vpop.f32.mrf.mxu1  ;;  %v2581_v55 = vpop.f32.mrf.mxu0 }
 0x192   : > { %v2317_v3 = vadd.f32 %v2316_v22, %v4711_v59  ;;  %v4824_v29 = vadd.f32 %v2581_v55, %v2493_v45  ;;  %v3615_v59 = vld [vmem:[%s5185_s6 + $0x208] sm:$0xff]  ;;  %v1457_v45 = vshll.u32 %v1300_v19, 16  ;;  %v548_v22 = vmul.f32 %v4458_v60, %v490_v49 }
 0x193   : > { %2924 = vmatpush.bf16.msra.mxu0 %v3615_v59  ;;  %v1093_v55 = vmul.f32 %v990_v4, %v715_v18  ;;  %v1550_v18 = vrot.slane %v4176_v61, 1 }
 0x194   : > { %5242 = vst [vmem:[#allocation29_spill] sm:$0xff] %v4824_v29  ;;  %2447 = vmatmul.bf16.gmra.mxu2 %v4828_v8  ;;  %2620 = vmatmul.bf16.gmra.mxu0 %v4831_v47  ;;  %v2406_v28 = vadd.f32 %v2405_v13, %v2317_v3  ;;  %v1454_v3 = vrot.slane %v1452_v24, 1  ;;  %v1459_v40 = vrot.slane %v1457_v45, 1  ;;  %v606_v59 = vmul.f32 %v4495_v23, %v548_v22 }
 0x195   : > { %v4855_v45 = vsel %vm1513_vm0, %v1550_v18, %v1551_v1 }
 0x196   : > { %v664_v19 = vadd.f32 %v4513_v50, %v606_v59  ;;  %v1005_v59 = vpop.permute.xlu1 %1004 }
 0x197   : > { %v2408_v42 = vpop.f32.mrf.mxu2  ;;  %v2494_v63 = vpop.f32.mrf.mxu3 }
 0x198   : > { %v2495_v25 = vadd.f32 %v2494_v63, %v2406_v28  ;;  %v381_v28 = vld [vmem:[%s3887_s19 + $0xbc] sm:$0x1]  ;;  %v1147_v63 = vpack.c.bf16 %v1093_v55, %v1093_v55 }
 0x199   : > { %v2319_v41 = vpop.f32.mrf.mxu1  ;;  %v2583_v10 = vpop.f32.mrf.mxu0 }
 0x19a   : > { %v2320_v13 = vadd.f32 %v2319_v41, %v4726_v30  ;;  %v4841_v38 = vadd.f32 %v2583_v10, %v2495_v25  ;;  %v1450_v25 = vshrl.u32 %v4176_v61, 16 }
 0x19c   : > { %5243 = vst [vmem:[#allocation30_spill] sm:$0xff] %v4841_v38  ;;  %2358 = vmatmul.bf16.gmra.mxu1 %v4831_v47  ;;  %2536 = vmatmul.bf16.gmra.mxu3 %v4176_v61  ;;  %v2409_v51 = vadd.f32 %v2408_v42, %v2320_v13  ;;  %v1455_v4 = vor.u32 %v1454_v3, %v1450_v25  ;;  %v435_v38 = vunpack.c.l.bf16 %v381_v28  ;;  %v1285_v13 = vunpack.c.l.b16 %v1147_v63 }
 0x19e   : > { %v4858_v22 = vsel %vm1304_vm1, %v1455_v4, %v1459_v40  ;;  %v1301_v3 = vpack.c.b16 %v1285_v13, %v1285_v13  ;;  %v3745_v4 = vld [vmem:[%s3887_s19 + $0xc0] sm:$0xff]  }
 0x19f   : > { %v2410_v29 = vpop.f32.mrf.mxu2  ;;  %v2497_v30 = vpop.f32.mrf.mxu3 }
 0x1a0   : > { %v2498_v41 = vadd.f32 %v2497_v30, %v2409_v51  ;;  %v493_v51 = vsub.f32 %v435_v38, %v4480_v53  ;;  %v1469_v18 = vshll.u32 %v1301_v3, 16 }
 0x1a1   : > { %v2321_v10 = vpop.f32.mrf.mxu1  ;;  %v2586_v49 = vpop.f32.mrf.mxu0 }
 0x1a2   : > { %v2322_v42 = vadd.f32 %v2321_v10, %v4743_v34  ;;  %v4851_v24 = vadd.f32 %v2586_v49, %v2498_v41  ;;  %v718_v34 = vmax.f32 %v664_v19, 0.0  ;;  %v1464_v41 = vshll.u32 %v4260_v17, 16 }
 0x1a3   : > { %v551_v40 = vmul.f32 %v4458_v60, %v493_v51  ;;  %v3606_v60 = vld [vmem:[%s5185_s6 + $0x1c0] sm:$0xff]  ;;  %v3656_v51 = vunpack.c.l.bf16 %v3745_v4 }
 0x1a4   : > { %5244 = vst [vmem:[#allocation31_spill] sm:$0xff] %v4851_v24  ;;  %2452 = vmatmul.bf16.gmra.mxu2 %v4855_v45  ;;  %2625 = vmatmul.bf16.gmra.mxu0 %v4858_v22  ;;  %v2411_v55 = vadd.f32 %v2410_v29, %v2322_v42  ;;  %v3598_v29 = vld [vmem:[%s5185_s6 + $0x180] sm:$0xff]  ;;  %v1096_v38 = vmul.f32 %v1005_v59, %v718_v34  ;;  %v1466_v19 = vrot.slane %v1464_v41, 1  ;;  %v1553_v41 = vrot.slane %v4260_v17, 1  ;;  %v384_v24 = vld [vmem:[%s3887_s19 + $0xc8] sm:$0x1] }
 0x1a5   : > { %2747 = vmatpush.bf16.msra.mxu2 %v3598_v29  ;;  %v609_v13 = vmul.f32 %v4495_v23, %v551_v40  ;;  %2836 = vmatpush.bf16.msra.mxu3 %v3606_v60 }
 0x1a6   : > { %v1150_v34 = vpack.c.bf16 %v1096_v38, %v1096_v38 }
 0x1a7   : > { %v2413_v28 = vpop.f32.mrf.mxu2  ;;  %v2499_v30 = vpop.f32.mrf.mxu3  ;;  %v667_v40 = vadd.f32 %v4513_v50, %v609_v13 }
 0x1a8   : > { %v2500_v63 = vadd.f32 %v2499_v30, %v2411_v55  ;;  %v3657_v55 = vunpack.c.h.bf16 %v3745_v4  ;;  %v1471_v30 = vrot.slane %v1469_v18, 1  ;;  %v494_v18 = vsub.f32 %v3656_v51, %v4480_v53  ;;  %v1020_v13 = vpop.permute.xlu2 %1019 }
 0x1a9   : > { %v2324_v25 = vpop.f32.mrf.mxu1  ;;  %v2588_v1 = vpop.f32.mrf.mxu0 }
 0x1aa   : > { %v2325_v10 = vadd.f32 %v2324_v25, %v4586_v14  ;;  %v4866_v49 = vadd.f32 %v2588_v1, %v2500_v63  ;;  %v3590_v14 = vld [vmem:[%s5185_s6 + $0x140] sm:$0xff]  ;;  %v1462_v25 = vshrl.u32 %v4260_v17, 16  ;;  %v495_v4 = vsub.f32 %v3657_v55, %v4480_v53 }
 0x1ab   : > { %2658 = vmatpush.bf16.msra.mxu1 %v3590_v14  ;;  %v721_v55 = vmax.f32 %v667_v40, 0.0  ;;  %v4904_v53 = vld [vmem:[%s5182_s3] ss:$0 sm:$0xff] }
 0x1ac   : > { %5245 = vst [vmem:[#allocation32_spill] sm:$0xff] %v4866_v49  ;;  %2363 = vmatmul.bf16.gmra.mxu1 %v4858_v22  ;;  %2541 = vmatmul.bf16.gmra.mxu3 %v4260_v17  ;;  %v2414_v42 = vadd.f32 %v2413_v28, %v2325_v10  ;;  %v1554_v28 = vrot.slane %v1301_v3, 1  ;;  %v1467_v29 = vor.u32 %v1466_v19, %v1462_v25  ;;  %v1286_v3 = vunpack.c.l.b16 %v1150_v34 }
 0x1ad   : > { %5246 = vst [vmem:[#allocation33_spill] sm:$0xff] %v4904_v53  ;;  %v553_v51 = vmul.f32 %v4904_v53, %v495_v4 }
 0x1ae   : > { %v4891_v14 = vsel %vm1513_vm0, %v1553_v41, %v1554_v28  ;;  %v1302_v34 = vpack.c.b16 %v1286_v3, %v1286_v3  ;;  %v1476_v41 = vshll.u32 %v4381_v33, 16 }
 0x1af   : > { %v2415_v59 = vpop.f32.mrf.mxu2  ;;  %v2502_v63 = vpop.f32.mrf.mxu3  ;;  %v611_v40 = vmul.f32 %v4495_v23, %v553_v51 }
 0x1b0   : > { %v2503_v1 = vadd.f32 %v2502_v63, %v2414_v42  ;;  %v4894_v42 = vsel %vm1304_vm1, %v1467_v29, %v1471_v30  ;;  %v552_v30 = vmul.f32 %v4904_v53, %v494_v18  ;;  %v1099_v29 = vmul.f32 %v1020_v13, %v721_v55 }
 0x1b1   : > { %v2326_v10 = vpop.f32.mrf.mxu1  ;;  %v2591_v49 = vpop.f32.mrf.mxu0  ;;  %v1481_v3 = vshll.u32 %v1302_v34, 16  ;;  %v669_v13 = vadd.f32 %v4513_v50, %v611_v40  ;;  %v1557_v51 = vrot.slane %v1302_v34, 1 }
 0x1b2   : > { %v2327_v60 = vadd.f32 %v2326_v10, %v4611_v54  ;;  %v4887_v38 = vadd.f32 %v2591_v49, %v2503_v1  ;;  %v3614_v54 = vld [vmem:[%s5185_s6 + $0x200] sm:$0xff]  ;;  %v438_v49 = vunpack.c.l.bf16 %v384_v24  ;;  %v610_v18 = vmul.f32 %v4495_v23, %v552_v30 }
 0x1b3   : > { %2925 = vmatpush.bf16.msra.mxu0 %v3614_v54  ;;  %v4911_v24 = vld [vmem:[%s5181_s2] ss:$0 sm:$0xff]  ;;  %v1483_v55 = vrot.slane %v1481_v3, 1  ;;  %v723_v3 = vmax.f32 %v669_v13, 0.0 }
 0x1b4   : > { %2457 = vmatmul.bf16.gmra.mxu2 %v4891_v14  ;;  %2630 = vmatmul.bf16.gmra.mxu0 %v4894_v42  ;;  %v2416_v19 = vadd.f32 %v2415_v59, %v2327_v60  ;;  %v496_v25 = vsub.f32 %v438_v49, %v4911_v24  ;;  %v1478_v49 = vrot.slane %v1476_v41, 1  ;;  %v4929_v30 = vld [vmem:[%s5183_s4] ss:$0 sm:$0xff] }
 0x1b5   : > { %5248 = vst [vmem:[#allocation35_spill] sm:$0xff] %v4929_v30 }
 0x1b6   : > { %v554_v54 = vmul.f32 %v4904_v53, %v496_v25 }
 0x1b7   : > { %v2418_v28 = vpop.f32.mrf.mxu2  ;;  %v2504_v59 = vpop.f32.mrf.mxu3 }
 0x1b8   : > { %v2505_v63 = vadd.f32 %v2504_v59, %v2416_v19  ;;  %v1153_v59 = vpack.c.bf16 %v1099_v29, %v1099_v29  ;;  %v1556_v29 = vrot.slane %v4381_v33, 1 }
 0x1b9   : > { %v2329_v1 = vpop.f32.mrf.mxu1  ;;  %v2593_v10 = vpop.f32.mrf.mxu0 }
 0x1ba   : > { %v2330_v4 = vadd.f32 %v2329_v1, %v4633_v12  ;;  %v4917_v60 = vadd.f32 %v2593_v10, %v2505_v63  ;;  %v668_v12 = vadd.f32 %v4513_v50, %v610_v18  ;;  %v1474_v10 = vshrl.u32 %v4381_v33, 16 }
 0x1bb   : > { %v1287_v34 = vunpack.c.l.b16 %v1153_v59 }
 0x1bc   : > { %5247 = vst [vmem:[#allocation34_spill] sm:$0xff] %v4917_v60  ;;  %2368 = vmatmul.bf16.gmra.mxu1 %v4894_v42  ;;  %2546 = vmatmul.bf16.gmra.mxu3 %v4381_v33  ;;  %v2419_v19 = vadd.f32 %v2418_v28, %v2330_v4  ;;  %v612_v28 = vmul.f32 %v4929_v30, %v554_v54  ;;  %v722_v18 = vmax.f32 %v668_v12, 0.0  ;;  %v1030_v60 = vpop.permute.xlu1 %1029  ;;  %v1025_v54 = vpop.permute.xlu0 %1024 }
 0x1bd   : > { %v1479_v40 = vor.u32 %v1478_v49, %v1474_v10  ;;  %v1303_v13 = vpack.c.b16 %v1287_v34, %v1287_v34 }
 0x1be   : > { %v1100_v12 = vmul.f32 %v1025_v54, %v722_v18 }
 0x1bf   : > { %v2420_v63 = vpop.f32.mrf.mxu2  ;;  %v2507_v1 = vpop.f32.mrf.mxu3 }
 0x1c0   : > { %v2508_v23 = vadd.f32 %v2507_v1, %v2419_v19  ;;  %v4937_v19 = vsel %vm1513_vm0, %v1556_v29, %v1557_v51  ;;  %v4940_v1 = vsel %vm1304_vm1, %v1479_v40, %v1483_v55  ;;  %v1101_v51 = vmul.f32 %v1030_v60, %v723_v3 }
 0x1c1   : > { %v2331_v25 = vpop.f32.mrf.mxu1  ;;  %v2596_v41 = vpop.f32.mrf.mxu0  ;;  %5250 = vst [vmem:[#allocation37_spill] sm:$0xff] %v4937_v19  ;;  %v1488_v40 = vshll.u32 %v4453_v39, 16  ;;  %v1154_v53 = vpack.c.bf16 %v1100_v12, %v1100_v12  ;;  %v1560_v3 = vrot.slane %v1303_v13, 1  ;;  %v1559_v12 = vrot.slane %v4453_v39, 1 }
 0x1c2   : > { %v2332_v50 = vadd.f32 %v2331_v25, %v4648_v48  ;;  %v4934_v4 = vadd.f32 %v2596_v41, %v2508_v23  ;;  %v4947_v48 = vld [vmem:[%s5184_s5] ss:$0 sm:$0xff]  ;;  %v1155_v30 = vpack.c.bf16 %v1101_v51, %v1101_v51 }
 0x1c3   : > { %5251 = vst [vmem:[#allocation38_spill] sm:$0xff] %v4947_v48  ;;  %v670_v59 = vadd.f32 %v4947_v48, %v612_v28  ;;  %v1490_v34 = vrot.slane %v1488_v40, 1 }
 0x1c4   : > { %5249 = vst [vmem:[#allocation36_spill] sm:$0xff] %v4934_v4  ;;  %2462 = vmatmul.bf16.gmra.mxu2 %v4937_v19  ;;  %2635 = vmatmul.bf16.gmra.mxu0 %v4940_v1  ;;  %v2421_v49 = vadd.f32 %v2420_v63, %v2332_v50  ;;  %v1035_v4 = vpop.permute.xlu2 %1034  ;;  %v1493_v19 = vshll.u32 %v1303_v13, 16  ;;  %v1581_v54 = vunpack.c.l.b16 %v1155_v30  ;;  %v4964_v30 = vsel %vm1513_vm0, %v1559_v12, %v1560_v3 }
 0x1c5   : > { %v724_v25 = vmax.f32 %v670_v59, 0.0 }
 0x1c6   : > { %v1495_v18 = vrot.slane %v1493_v19, 1 }
 0x1c7   : > { %v2423_v10 = vpop.f32.mrf.mxu2  ;;  %v2509_v55 = vpop.f32.mrf.mxu3  ;;  %v1102_v28 = vmul.f32 %v1035_v4, %v724_v25 }
 0x1c8   : > { %v2510_v23 = vadd.f32 %v2509_v55, %v2421_v49  ;;  %v1580_v49 = vunpack.c.l.b16 %v1154_v53 }
 0x1c9   : > { %v2334_v41 = vpop.f32.mrf.mxu1  ;;  %v2598_v29 = vpop.f32.mrf.mxu0 }
 0x1ca   : > { %v2335_v63 = vadd.f32 %v2334_v41, %v4667_v27  ;;  %v4952_v50 = vadd.f32 %v2598_v29, %v2510_v23  ;;  %v1486_v27 = vshrl.u32 %v4453_v39, 16  ;;  %v1156_v41 = vpack.c.bf16 %v1102_v28, %v1102_v28 }
 0x1cb   : > { %v4961_v4 = vpack.c.b16 %v1581_v54, %v1580_v49 }
 0x1cc   : > { %5252 = vst [vmem:[#allocation39_spill] sm:$0xff] %v4952_v50  ;;  %2373 = vmatmul.bf16.gmra.mxu1 %v4940_v1  ;;  %2551 = vmatmul.bf16.gmra.mxu3 %v4453_v39  ;;  %v2424_v60 = vadd.f32 %v2423_v10, %v2335_v63  ;;  %v1491_v50 = vor.u32 %v1490_v34, %v1486_v27  ;;  %v1585_v13 = vunpack.c.l.b16 %v1156_v41 }
 0x1cd   : > { %v1588_v49 = vshrl.u32 %v4961_v4, 16 }
 0x1ce   : > { %v4967_v53 = vsel %vm1304_vm1, %v1491_v50, %v1495_v18 }
 0x1cf   : > { %v2425_v59 = vpop.f32.mrf.mxu2  ;;  %v2512_v55 = vpop.f32.mrf.mxu3 }
 0x1d0   : > { %v2513_v23 = vadd.f32 %v2512_v55, %v2424_v60  ;;  %v4972_v60 = vpack.c.b16 %v1585_v13, %v1585_v13 }
 0x1d1   : > { %v2336_v29 = vpop.f32.mrf.mxu1  ;;  %v2601_v51 = vpop.f32.mrf.mxu0 }
 0x1d2   : > { %v2337_v48 = vadd.f32 %v2336_v29, %v4691_v20  ;;  %v4959_v10 = vadd.f32 %v2601_v51, %v2513_v23  ;;  %v1590_v20 = vshll.u32 %v4961_v4, 16  ;;  %v1595_v18 = vshll.u32 %v4972_v60, 16 }
 0x1d4   : > { %2467 = vmatmul.bf16.gmra.mxu2 %v4964_v30  ;;  %2640 = vmatmul.bf16.gmra.mxu0 %v4967_v53  ;;  %v2426_v19 = vadd.f32 %v2425_v59, %v2337_v48  ;;  %v1592_v50 = vrot.slane %v1590_v20, 1  ;;  %v1597_v41 = vrot.slane %v1595_v18, 1 }
 0x1d6   : > { %v1593_v27 = vor.u32 %v1592_v50, %v1588_v49 }
 0x1d7   : > { %v2428_v25 = vpop.f32.mrf.mxu2  ;;  %v2514_v40 = vpop.f32.mrf.mxu3 }
 0x1d8   : > { %v2515_v63 = vadd.f32 %v2514_v40, %v2426_v19  ;;  %v4985_v19 = vsel %vm1304_vm1, %v1593_v27, %v1597_v41 }
 0x1d9   : > { %v2339_v28 = vpop.f32.mrf.mxu1  ;;  %v2603_v34 = vpop.f32.mrf.mxu0 }
 0x1da   : > { %v2340_v3 = vadd.f32 %v2339_v28, %v4713_v62  ;;  %v4975_v54 = vadd.f32 %v2603_v34, %v2515_v63 }
 0x1dc   : > { %2378 = vmatmul.bf16.gmra.mxu1 %v4967_v53  ;;  %2556 = vmatmul.bf16.gmra.mxu3 %v4961_v4  ;;  %v2429_v48 = vadd.f32 %v2428_v25, %v2340_v3 }
 0x1df   : > { %v2430_v59 = vpop.f32.mrf.mxu2  ;;  %v2517_v55 = vpop.f32.mrf.mxu3 }
 0x1e0   : > { %v2518_v23 = vadd.f32 %v2517_v55, %v2429_v48 }
 0x1e1   : > { %v2341_v29 = vpop.f32.mrf.mxu1  ;;  %v2606_v51 = vpop.f32.mrf.mxu0 }
 0x1e2   : > { %v2342_v62 = vadd.f32 %v2341_v29, %v4728_v7  ;;  %v4982_v12 = vadd.f32 %v2606_v51, %v2518_v23 }
 0x1e4   : > { %2645 = vmatmul.bf16.gmra.mxu0 %v4985_v19  ;;  %2748 = vmatmul.bf16.vlgmr.msra.gmra.mxu2 %v4411_v15  ;;  %v2431_v13 = vadd.f32 %v2430_v59, %v2342_v62 }
 0x1e7   : > { %v2433_v25 = vpop.f32.mrf.mxu2  ;;  %v2519_v40 = vpop.f32.mrf.mxu3 }
 0x1e8   : > { %v2520_v20 = vadd.f32 %v2519_v40, %v2431_v13 }
 0x1e9   : > { %v2344_v63 = vpop.f32.mrf.mxu1  ;;  %v2608_v28 = vpop.f32.mrf.mxu0 }
 0x1ea   : > { %v2345_v34 = vadd.f32 %v2344_v63, %v4573_v0  ;;  %v4990_v3 = vadd.f32 %v2608_v28, %v2520_v20 }
 0x1ec   : > { %2659 = vmatmul.bf16.vlgmr.msra.gmra.mxu1 %v4506_v36  ;;  %2837 = vmatmul.bf16.vlgmr.msra.gmra.mxu3 %v4532_v2  ;;  %v2434_v7 = vadd.f32 %v2433_v25, %v2345_v34 }
 0x1ef   : > { %v2435_v50 = vpop.f32.mrf.mxu2  ;;  %v2522_v48 = vpop.f32.mrf.mxu3 }
 0x1f0   : > { %v2523_v18 = vadd.f32 %v2522_v48, %v2434_v7 }
 0x1f1   : > { %v2346_v49 = vpop.f32.mrf.mxu1  ;;  %v2611_v15 = vpop.f32.mrf.mxu0 }
 0x1f2   : > { %v2347_v59 = vadd.f32 %v2346_v49, %v4591_v21  ;;  %v4995_v55 = vadd.f32 %v2611_v15, %v2523_v18 }
 0x1f4   : > { %2753 = vmatmul.bf16.gmra.mxu2 %v4471_v52  ;;  %2926 = vmatmul.bf16.vlgmr.msra.gmra.mxu0 %v4529_v6  ;;  %v2436_v0 = vadd.f32 %v2435_v50, %v2347_v59 }
 0x1f7   : > { %v2438_v27 = vpop.f32.mrf.mxu2  ;;  %v2524_v23 = vpop.f32.mrf.mxu3 }
 0x1f8   : > { %v2525_v36 = vadd.f32 %v2524_v23, %v2436_v0  ;;  %v5253_v0 = vld [vmem:[#allocation16_spill] sm:$0xff] }
 0x1f9   : > { %v2349_v41 = vpop.f32.mrf.mxu1  ;;  %v2613_v2 = vpop.f32.mrf.mxu0 }
 0x1fa   : > { %v2350_v29 = vadd.f32 %v2349_v41, %v4615_v57  ;;  %v5000_v51 = vadd.f32 %v2613_v2, %v2525_v36  ;;  %v5254_v36 = vld [vmem:[#allocation3_spill] sm:$0xff]  ;;  %v5255_v41 = vld [vmem:[#allocation6_spill] sm:$0xff] }
 0x1fc   : > { %2664 = vmatmul.bf16.gmra.mxu1 %v4529_v6  ;;  %2842 = vmatmul.bf16.gmra.mxu3 %v4559_v43  ;;  %v2439_v21 = vadd.f32 %v2438_v27, %v2350_v29 }
 0x1ff   : > { %v2440_v62 = vpop.f32.mrf.mxu2  ;;  %v2527_v13 = vpop.f32.mrf.mxu3 }
 0x200   : > { %v2528_v52 = vadd.f32 %v2527_v13, %v2439_v21 }
 0x201   : > { %v2351_v25 = vpop.f32.mrf.mxu1  ;;  %v2616_v40 = vpop.f32.mrf.mxu0 }
 0x202   : > { %v2352_v20 = vadd.f32 %v2351_v25, %v4639_v31  ;;  %v5005_v63 = vadd.f32 %v2616_v40, %v2528_v52  ;;  %v5257_v25 = vld [vmem:[#allocation10_spill] sm:$0xff] }
 0x204   : > { %2758 = vmatmul.bf16.gmra.mxu2 %v4083_v26  ;;  %2931 = vmatmul.bf16.gmra.mxu0 %v4556_v58  ;;  %v2441_v57 = vadd.f32 %v2440_v62, %v2352_v20  ;;  %v5256_v62 = vld [vmem:[#allocation20_spill] sm:$0xff] }
 0x207   : > { %v2443_v28 = vpop.f32.mrf.mxu2  ;;  %v2529_v34 = vpop.f32.mrf.mxu3 }
 0x208   : > { %v2530_v6 = vadd.f32 %v2529_v34, %v2441_v57 }
 0x209   : > { %v2354_v7 = vpop.f32.mrf.mxu1  ;;  %v2618_v43 = vpop.f32.mrf.mxu0 }
 0x20a   : > { %v2355_v50 = vadd.f32 %v2354_v7, %v4662_v9  ;;  %v5010_v48 = vadd.f32 %v2618_v43, %v2530_v6  ;;  %v5258_v7 = vld [vmem:[#allocation21_spill] sm:$0xff] }
 0x20c   : > { %2669 = vmatmul.bf16.gmra.mxu1 %v4556_v58  ;;  %2847 = vmatmul.bf16.gmra.mxu3 %v4582_v44  ;;  %v2444_v31 = vadd.f32 %v2443_v28, %v2355_v50 }
 0x20f   : > { %v2445_v18 = vpop.f32.mrf.mxu2  ;;  %v2532_v49 = vpop.f32.mrf.mxu3 }
 0x210   : > { %v2533_v26 = vadd.f32 %v2532_v49, %v2444_v31  ;;  %v5259_v31 = vld [vmem:[#allocation4_spill] sm:$0xff] }
 0x211   : > { %v2356_v15 = vpop.f32.mrf.mxu1  ;;  %v2621_v59 = vpop.f32.mrf.mxu0 }
 0x212   : > { %v2357_v27 = vadd.f32 %v2356_v15, %v5253_v0  ;;  %v5015_v23 = vadd.f32 %v2621_v59, %v2533_v26 }
 0x214   : > { %2763 = vmatmul.bf16.gmra.mxu2 %v5254_v36  ;;  %2936 = vmatmul.bf16.gmra.mxu0 %v5255_v41  ;;  %v2446_v9 = vadd.f32 %v2445_v18, %v2357_v27  ;;  %v5260_v18 = vld [vmem:[#allocation9_spill] sm:$0xff]  ;;  %v5261_v36 = vld [vmem:[#allocation7_spill] sm:$0xff] }
 0x217   : > { %v2448_v2 = vpop.f32.mrf.mxu2  ;;  %v2534_v29 = vpop.f32.mrf.mxu3 }
 0x218   : > { %v2535_v58 = vadd.f32 %v2534_v29, %v2446_v9 }
 0x219   : > { %v2359_v21 = vpop.f32.mrf.mxu1  ;;  %v2623_v44 = vpop.f32.mrf.mxu0 }
 0x21a   : > { %v2360_v13 = vadd.f32 %v2359_v21, %v5256_v62  ;;  %v5020_v52 = vadd.f32 %v2623_v44, %v2535_v58 }
 0x21c   : > { %2674 = vmatmul.bf16.gmra.mxu1 %v5255_v41  ;;  %2852 = vmatmul.bf16.gmra.mxu3 %v5257_v25  ;;  %v2449_v40 = vadd.f32 %v2448_v2, %v2360_v13  ;;  %v5262_v2 = vld [vmem:[#allocation13_spill] sm:$0xff]  ;;  %v5263_v25 = vld [vmem:[#allocation8_spill] sm:$0xff] }
 0x21f   : > { %v2450_v20 = vpop.f32.mrf.mxu2  ;;  %v2537_v57 = vpop.f32.mrf.mxu3 }
 0x220   : > { %v2538_v28 = vadd.f32 %v2537_v57, %v2449_v40  ;;  %v5264_v57 = vld [vmem:[#allocation5_spill] sm:$0xff] }
 0x221   : > { %v2361_v34 = vpop.f32.mrf.mxu1  ;;  %v2626_v6 = vpop.f32.mrf.mxu0 }
 0x222   : > { %v2362_v43 = vadd.f32 %v2361_v34, %v5258_v7  ;;  %v5025_v50 = vadd.f32 %v2626_v6, %v2538_v28  ;;  %v5265_v28 = vld [vmem:[#allocation12_spill] sm:$0xff] }
 0x224   : > { %2768 = vmatmul.bf16.gmra.mxu2 %v5259_v31  ;;  %2941 = vmatmul.bf16.gmra.mxu0 %v5260_v18  ;;  %v2451_v49 = vadd.f32 %v2450_v20, %v2362_v43 }
 0x227   : > { %v2453_v26 = vpop.f32.mrf.mxu2  ;;  %v2539_v15 = vpop.f32.mrf.mxu3 }
 0x228   : > { %v2540_v59 = vadd.f32 %v2539_v15, %v2451_v49  ;;  %v5266_v49 = vld [vmem:[#allocation11_spill] sm:$0xff] }
 0x229   : > { %v2364_v0 = vpop.f32.mrf.mxu1  ;;  %v2628_v27 = vpop.f32.mrf.mxu0 }
 0x22a   : > { %v2365_v41 = vadd.f32 %v2364_v0, %v5261_v36  ;;  %v5030_v9 = vadd.f32 %v2628_v27, %v2540_v59  ;;  %v5267_v59 = vld [vmem:[#allocation18_spill] sm:$0xff] }
 0x22c   : > { %2679 = vmatmul.bf16.gmra.mxu1 %v5260_v18  ;;  %2857 = vmatmul.bf16.gmra.mxu3 %v5262_v2  ;;  %v2454_v29 = vadd.f32 %v2453_v26, %v2365_v41 }
 0x22f   : > { %v2455_v58 = vpop.f32.mrf.mxu2  ;;  %v2542_v21 = vpop.f32.mrf.mxu3 }
 0x230   : > { %v2543_v44 = vadd.f32 %v2542_v21, %v2454_v29 }
 0x231   : > { %v2366_v62 = vpop.f32.mrf.mxu1  ;;  %v2631_v13 = vpop.f32.mrf.mxu0 }
 0x232   : > { %v2367_v40 = vadd.f32 %v2366_v62, %v5263_v25  ;;  %v5035_v20 = vadd.f32 %v2631_v13, %v2543_v44  ;;  %v5269_v62 = vld [vmem:[#allocation2_spill] sm:$0xff]  ;;  %v5270_v13 = vld [vmem:[#allocation17_spill] sm:$0xff] }
 0x234   : > { %2773 = vmatmul.bf16.gmra.mxu2 %v5264_v57  ;;  %2946 = vmatmul.bf16.gmra.mxu0 %v5265_v28  ;;  %v2456_v34 = vadd.f32 %v2455_v58, %v2367_v40  ;;  %v5268_v58 = vld [vmem:[#allocation14_spill] sm:$0xff] }
 0x237   : > { %v2458_v6 = vpop.f32.mrf.mxu2  ;;  %v2544_v7 = vpop.f32.mrf.mxu3 }
 0x238   : > { %v2545_v43 = vadd.f32 %v2544_v7, %v2456_v34 }
 0x239   : > { %v2369_v31 = vpop.f32.mrf.mxu1  ;;  %v2633_v18 = vpop.f32.mrf.mxu0 }
 0x23a   : > { %v2370_v26 = vadd.f32 %v2369_v31, %v5266_v49  ;;  %v5040_v15 = vadd.f32 %v2633_v18, %v2545_v43  ;;  %v5272_v18 = vld [vmem:[#allocation24_spill] sm:$0xff] }
 0x23c   : > { %2684 = vmatmul.bf16.gmra.mxu1 %v5265_v28  ;;  %2862 = vmatmul.bf16.gmra.mxu3 %v5267_v59  ;;  %v2459_v0 = vadd.f32 %v2458_v6, %v2370_v26  ;;  %v5271_v6 = vld [vmem:[#allocation15_spill] sm:$0xff] }
 0x23f   : > { %v2460_v27 = vpop.f32.mrf.mxu2  ;;  %v2547_v36 = vpop.f32.mrf.mxu3 }
 0x240   : > { %v2548_v41 = vadd.f32 %v2547_v36, %v2459_v0 }
 0x241   : > { %v2371_v2 = vpop.f32.mrf.mxu1  ;;  %v2636_v29 = vpop.f32.mrf.mxu0 }
 0x242   : > { %v2372_v21 = vadd.f32 %v2371_v2, %v5268_v58  ;;  %v5045_v44 = vadd.f32 %v2636_v29, %v2548_v41  ;;  %v5274_v58 = vld [vmem:[#allocation23_spill] sm:$0xff] }
 0x244   : > { %2778 = vmatmul.bf16.gmra.mxu2 %v5269_v62  ;;  %2951 = vmatmul.bf16.gmra.mxu0 %v5270_v13  ;;  %v2461_v25 = vadd.f32 %v2460_v27, %v2372_v21  ;;  %v5273_v27 = vld [vmem:[#allocation19_spill] sm:$0xff] }
 0x247   : > { %v2463_v40 = vpop.f32.mrf.mxu2  ;;  %v2549_v57 = vpop.f32.mrf.mxu3 }
 0x248   : > { %v2550_v28 = vadd.f32 %v2549_v57, %v2461_v25 }
 0x249   : > { %v2374_v34 = vpop.f32.mrf.mxu1  ;;  %v2638_v7 = vpop.f32.mrf.mxu0 }
 0x24a   : > { %v2375_v43 = vadd.f32 %v2374_v34, %v5271_v6  ;;  %v5050_v31 = vadd.f32 %v2638_v7, %v2550_v28 }
 0x24c   : > { %2689 = vmatmul.bf16.gmra.mxu1 %v5270_v13  ;;  %2867 = vmatmul.bf16.gmra.mxu3 %v5272_v18  ;;  %v2464_v49 = vadd.f32 %v2463_v40, %v2375_v43  ;;  %v5275_v40 = vld [vmem:[#allocation22_spill] sm:$0xff] }
 0x24f   : > { %v2465_v26 = vpop.f32.mrf.mxu2  ;;  %v2552_v59 = vpop.f32.mrf.mxu3 }
 0x250   : > { %v2553_v0 = vadd.f32 %v2552_v59, %v2464_v49 }
 0x251   : > { %v2376_v36 = vpop.f32.mrf.mxu1  ;;  %v2641_v41 = vpop.f32.mrf.mxu0 }
 0x252   : > { %v2377_v2 = vadd.f32 %v2376_v36, %v5273_v27  ;;  %v5055_v29 = vadd.f32 %v2641_v41, %v2553_v0 }
 0x254   : > { %2783 = vmatmul.bf16.gmra.mxu2 %v4264_v16  ;;  %2956 = vmatmul.bf16.gmra.mxu0 %v5274_v58  ;;  %v2466_v21 = vadd.f32 %v2465_v26, %v2377_v2  ;;  %v5276_v26 = vld [vmem:[#allocation25_spill] sm:$0xff] }
 0x257   : > { %v2468_v62 = vpop.f32.mrf.mxu2  ;;  %v2554_v25 = vpop.f32.mrf.mxu3 }
 0x258   : > { %v2555_v13 = vadd.f32 %v2554_v25, %v2466_v21 }
 0x259   : > { %v2379_v57 = vpop.f32.mrf.mxu1  ;;  %v2643_v28 = vpop.f32.mrf.mxu0 }
 0x25a   : > { %v2380_v34 = vadd.f32 %v2379_v57, %v5275_v40  ;;  %v5060_v7 = vadd.f32 %v2643_v28, %v2555_v13 }
 0x25c   : > { %2694 = vmatmul.bf16.gmra.mxu1 %v5274_v58  ;;  %2872 = vmatmul.bf16.gmra.mxu3 %v4771_v46  ;;  %v2469_v6 = vadd.f32 %v2468_v62, %v2380_v34  ;;  %v5277_v34 = vld [vmem:[#allocation26_spill] sm:$0xff] }
 0x25f   : > { %v2470_v43 = vpop.f32.mrf.mxu2  ;;  %v2557_v18 = vpop.f32.mrf.mxu3 }
 0x260   : > { %v2558_v16 = vadd.f32 %v2557_v18, %v2469_v6 }
 0x261   : > { %v2381_v49 = vpop.f32.mrf.mxu1  ;;  %v2646_v59 = vpop.f32.mrf.mxu0 }
 0x262   : > { %v2382_v0 = vadd.f32 %v2381_v49, %v5276_v26  ;;  %v5065_v36 = vadd.f32 %v2646_v59, %v2558_v16  ;;  %v5278_v26 = vld [vmem:[#allocation27_spill] sm:$0xff] }
 0x264   : > { %2788 = vmatmul.bf16.gmra.mxu2 %v4337_v32  ;;  %2961 = vmatmul.bf16.gmra.mxu0 %v4768_v37  ;;  %v2471_v41 = vadd.f32 %v2470_v43, %v2382_v0 }
 0x267   : > { %v2559_v27 = vpop.f32.mrf.mxu3  ;;  %v2749_v2 = vpop.f32.mrf.mxu2 }
 0x268   : > { %v2560_v58 = vadd.f32 %v2559_v27, %v2471_v41 }
 0x269   : > { %v2648_v21 = vpop.f32.mrf.mxu0  ;;  %v2660_v46 = vpop.f32.mrf.mxu1 }
 0x26a   : > { %v5069_v62 = vadd.f32 %v2648_v21, %v2560_v58  ;;  %v2661_v25 = vadd.f32 %v2660_v46, %v4764_v11 }
 0x26c   : > { %2699 = vmatmul.bf16.gmra.mxu1 %v4768_v37  ;;  %2877 = vmatmul.bf16.gmra.mxu3 %v4798_v35  ;;  %v2750_v28 = vadd.f32 %v2749_v2, %v2661_v25 }
 0x26f   : > { %v2751_v13 = vpop.f32.mrf.mxu2  ;;  %v2838_v57 = vpop.f32.mrf.mxu3 }
 0x270   : > { %v2839_v43 = vadd.f32 %v2838_v57, %v2750_v28 }
 0x271   : > { %v2662_v32 = vpop.f32.mrf.mxu1  ;;  %v2927_v40 = vpop.f32.mrf.mxu0 }
 0x272   : > { %v2663_v6 = vadd.f32 %v2662_v32, %v5277_v34  ;;  %v2928_v16 = vadd.f32 %v2927_v40, %v2839_v43  ;;  %v5279_v40 = vld [vmem:[#allocation28_spill] sm:$0xff] }
 0x274   : > { %2793 = vmatmul.bf16.gmra.mxu2 %v4434_v56  ;;  %2966 = vmatmul.bf16.gmra.mxu0 %v4795_v5  ;;  %v2752_v18 = vadd.f32 %v2751_v13, %v2663_v6  ;;  %v3112_v27 = vmul.f32 %v2928_v16, %v2928_v16 }
 0x277   : > { %v2754_v37 = vpop.f32.mrf.mxu2  ;;  %v2840_v49 = vpop.f32.mrf.mxu3 }
 0x278   : > { %v2841_v35 = vadd.f32 %v2840_v49, %v2752_v18 }
 0x279   : > { %v2665_v59 = vpop.f32.mrf.mxu1  ;;  %v2929_v11 = vpop.f32.mrf.mxu0 }
 0x27a   : > { %v2666_v0 = vadd.f32 %v2665_v59, %v5278_v26  ;;  %v2930_v41 = vadd.f32 %v2929_v11, %v2841_v35  ;;  %v5280_v11 = vld [vmem:[#allocation29_spill] sm:$0xff] }
 0x27c   : > { %v3661_v2 = vpack.c.bf16 %v2930_v41, %v2928_v16  ;;  %v3072_v58 = vadd.f32 %v2930_v41, %v2928_v16  ;;  %v3113_v21 = vmul.f32 %v2930_v41, %v2930_v41  ;;  %2704 = vmatmul.bf16.gmra.mxu1 %v4795_v5  ;;  %2882 = vmatmul.bf16.gmra.mxu3 %v4831_v47 }
 0x27d   : > { %v2755_v46 = vadd.f32 %v2754_v37, %v2666_v0 }
 0x27e   : > { %3662 = vst [vmem:[%s3882_s16] sm:$0xff] %v3661_v2   ;;  %v3144_v56 = vadd.f32 %v3113_v21, %v3112_v27 }
 0x27f   : > { %v2756_v25 = vpop.f32.mrf.mxu2  ;;  %v2843_v13 = vpop.f32.mrf.mxu3 }
 0x280   : > { %v2844_v57 = vadd.f32 %v2843_v13, %v2755_v46 }
 0x281   : > { %v2667_v28 = vpop.f32.mrf.mxu1  ;;  %v2932_v32 = vpop.f32.mrf.mxu0 }
 0x282   : > { %v2668_v34 = vadd.f32 %v2667_v28, %v5279_v40  ;;  %v2933_v6 = vadd.f32 %v2932_v32, %v2844_v57  ;;  %v5281_v57 = vld [vmem:[#allocation30_spill] sm:$0xff] }
 0x284   : > { %v3073_v43 = vadd.f32 %v3072_v58, %v2933_v6  ;;  %v3114_v18 = vmul.f32 %v2933_v6, %v2933_v6  ;;  %2798 = vmatmul.bf16.gmra.mxu2 %v4176_v61  ;;  %2971 = vmatmul.bf16.gmra.mxu0 %v4828_v8  ;;  %v2757_v47 = vadd.f32 %v2756_v25, %v2668_v34 }
 0x286   : > { %v3145_v5 = vadd.f32 %v3144_v56, %v3114_v18 }
 0x287   : > { %v2759_v16 = vpop.f32.mrf.mxu2  ;;  %v2845_v49 = vpop.f32.mrf.mxu3 }
 0x288   : > { %v2846_v37 = vadd.f32 %v2845_v49, %v2757_v47 }
 0x289   : > { %v2670_v35 = vpop.f32.mrf.mxu1  ;;  %v2934_v59 = vpop.f32.mrf.mxu0 }
 0x28a   : > { %v2671_v26 = vadd.f32 %v2670_v35, %v5280_v11  ;;  %v2935_v0 = vadd.f32 %v2934_v59, %v2846_v37 }
 0x28c   : > { %v3666_v41 = vpack.c.bf16 %v2935_v0, %v2933_v6  ;;  %v3074_v27 = vadd.f32 %v3073_v43, %v2935_v0  ;;  %v3115_v2 = vmul.f32 %v2935_v0, %v2935_v0  ;;  %2709 = vmatmul.bf16.gmra.mxu1 %v4828_v8  ;;  %2887 = vmatmul.bf16.gmra.mxu3 %v4858_v22 }
 0x28d   : > { %v2760_v58 = vadd.f32 %v2759_v16, %v2671_v26  ;;  %v5282_v16 = vld [vmem:[#allocation31_spill] sm:$0xff] }
 0x28e   : > { %3746 = vst [vmem:[%s3882_s16 + $0x8] sm:$0xff] %v3666_v41   ;;  %v3146_v61 = vadd.f32 %v3145_v5, %v3115_v2 }
 0x28f   : > { %v2761_v21 = vpop.f32.mrf.mxu2  ;;  %v2848_v56 = vpop.f32.mrf.mxu3 }
 0x290   : > { %v2849_v46 = vadd.f32 %v2848_v56, %v2760_v58  ;;  %v5283_v58 = vld [vmem:[#allocation32_spill] sm:$0xff] }
 0x291   : > { %v2672_v25 = vpop.f32.mrf.mxu1  ;;  %v2937_v13 = vpop.f32.mrf.mxu0 }
 0x292   : > { %v2673_v28 = vadd.f32 %v2672_v25, %v5281_v57  ;;  %v2938_v32 = vadd.f32 %v2937_v13, %v2849_v46  ;;  %v386_v46 = vld [vmem:[%s3887_s19 + $0xcc] sm:$0xff]  }
 0x293   : > { %v440_v57 = vunpack.c.h.bf16 %v386_v46 }
 0x294   : > { %v3075_v40 = vadd.f32 %v3074_v27, %v2938_v32  ;;  %v3116_v34 = vmul.f32 %v2938_v32, %v2938_v32  ;;  %2803 = vmatmul.bf16.gmra.mxu2 %v4260_v17  ;;  %2976 = vmatmul.bf16.gmra.mxu0 %v4855_v45  ;;  %v2762_v22 = vadd.f32 %v2761_v21, %v2673_v28  ;;  %v439_v28 = vunpack.c.l.bf16 %v386_v46 }
 0x296   : > { %v3147_v8 = vadd.f32 %v3146_v61, %v3116_v34 }
 0x297   : > { %v2764_v6 = vpop.f32.mrf.mxu2  ;;  %v2850_v43 = vpop.f32.mrf.mxu3 }
 0x298   : > { %v2851_v18 = vadd.f32 %v2850_v43, %v2762_v22 }
 0x299   : > { %v2675_v5 = vpop.f32.mrf.mxu1  ;;  %v2939_v47 = vpop.f32.mrf.mxu0 }
 0x29a   : > { %v2676_v49 = vadd.f32 %v2675_v5, %v5282_v16  ;;  %v2940_v37 = vadd.f32 %v2939_v47, %v2851_v18  ;;  %v498_v5 = vsub.f32 %v440_v57, %v4911_v24 }
 0x29c   : > { %v3671_v35 = vpack.c.bf16 %v2940_v37, %v2938_v32  ;;  %v3076_v59 = vadd.f32 %v3075_v40, %v2940_v37  ;;  %v3117_v11 = vmul.f32 %v2940_v37, %v2940_v37  ;;  %2714 = vmatmul.bf16.gmra.mxu1 %v4855_v45  ;;  %2892 = vmatmul.bf16.gmra.mxu3 %v4894_v42 }
 0x29d   : > { %v2765_v26 = vadd.f32 %v2764_v6, %v2676_v49  ;;  %v387_v6 = vld [vmem:[%s3887_s19 + $0xd4] sm:$0x1] }
 0x29e   : > { %3747 = vst [vmem:[%s3882_s16 + $0x10] sm:$0xff] %v3671_v35   ;;  %v3148_v17 = vadd.f32 %v3147_v8, %v3117_v11  ;;  %v441_v37 = vunpack.c.l.bf16 %v387_v6  ;;  %v5284_v11 = vld [vmem:[#allocation33_spill] sm:$0xff] }
 0x29f   : > { %v2766_v0 = vpop.f32.mrf.mxu2  ;;  %v2853_v41 = vpop.f32.mrf.mxu3 }
 0x2a0   : > { %v2854_v27 = vadd.f32 %v2853_v41, %v2765_v26 }
 0x2a1   : > { %v2677_v2 = vpop.f32.mrf.mxu1  ;;  %v2942_v61 = vpop.f32.mrf.mxu0 }
 0x2a2   : > { %v2678_v21 = vadd.f32 %v2677_v2, %v5283_v58  ;;  %v2943_v56 = vadd.f32 %v2942_v61, %v2854_v27  ;;  %v499_v27 = vsub.f32 %v441_v37, %v4911_v24  ;;  %v5285_v58 = vld [vmem:[#allocation34_spill] sm:$0xff]  ;;  %v1040_v37 = vpop.permute.xlu0 %1039 }
 0x2a4   : > { %v3077_v25 = vadd.f32 %v3076_v59, %v2943_v56  ;;  %v3118_v13 = vmul.f32 %v2943_v56, %v2943_v56  ;;  %2808 = vmatmul.bf16.gmra.mxu2 %v4381_v33  ;;  %2981 = vmatmul.bf16.gmra.mxu0 %v4891_v14  ;;  %v2767_v42 = vadd.f32 %v2766_v0, %v2678_v21 }
 0x2a5   : > { %v497_v33 = vsub.f32 %v439_v28, %v4911_v24  ;;  %v5288_v24 = vld [vmem:[#allocation38_spill] sm:$0xff] }
 0x2a6   : > { %v3149_v45 = vadd.f32 %v3148_v17, %v3118_v13  ;;  %v556_v17 = vmul.f32 %v5284_v11, %v498_v5  ;;  %v5289_v5 = vld [vmem:[#allocation36_spill] sm:$0xff] }
 0x2a7   : > { %v2769_v32 = vpop.f32.mrf.mxu2  ;;  %v2855_v40 = vpop.f32.mrf.mxu3 }
 0x2a8   : > { %v2856_v34 = vadd.f32 %v2855_v40, %v2767_v42  ;;  %v557_v42 = vmul.f32 %v5284_v11, %v499_v27 }
 0x2a9   : > { %v2680_v8 = vpop.f32.mrf.mxu1  ;;  %v2944_v22 = vpop.f32.mrf.mxu0 }
 0x2aa   : > { %v2681_v43 = vadd.f32 %v2680_v8, %v4887_v38  ;;  %v2945_v18 = vadd.f32 %v2944_v22, %v2856_v34  ;;  %v555_v38 = vmul.f32 %v5284_v11, %v497_v33 }
 0x2ac   : > { %v3676_v47 = vpack.c.bf16 %v2945_v18, %v2943_v56  ;;  %v3078_v16 = vadd.f32 %v3077_v25, %v2945_v18  ;;  %v3119_v49 = vmul.f32 %v2945_v18, %v2945_v18  ;;  %2719 = vmatmul.bf16.gmra.mxu1 %v4891_v14  ;;  %2897 = vmatmul.bf16.gmra.mxu3 %v4940_v1  ;;  %v5286_v56 = vld [vmem:[#allocation35_spill] sm:$0xff] }
 0x2ad   : > { %v2770_v59 = vadd.f32 %v2769_v32, %v2681_v43  ;;  %v614_v1 = vmul.f32 %v5286_v56, %v556_v17  ;;  %v613_v46 = vmul.f32 %v5286_v56, %v555_v38  ;;  %v615_v6 = vmul.f32 %v5286_v56, %v557_v42 }
 0x2ae   : > { %3748 = vst [vmem:[%s3882_s16 + $0x18] sm:$0xff] %v3676_v47   ;;  %v3150_v35 = vadd.f32 %v3149_v45, %v3119_v49  ;;  %v5287_v45 = vld [vmem:[#allocation37_spill] sm:$0xff]  ;;  %v1045_v49 = vpop.permute.xlu1 %1044 }
 0x2af   : > { %v2771_v26 = vpop.f32.mrf.mxu2  ;;  %v2858_v0 = vpop.f32.mrf.mxu3  ;;  %v672_v32 = vadd.f32 %v5288_v24, %v614_v1  ;;  %v671_v40 = vadd.f32 %v5288_v24, %v613_v46  ;;  %v673_v17 = vadd.f32 %v5288_v24, %v615_v6  ;;  %v5290_v1 = vld [vmem:[#allocation39_spill] sm:$0xff] }
 0x2b0   : > { %v2859_v41 = vadd.f32 %v2858_v0, %v2770_v59 }
 0x2b1   : > { %v2682_v2 = vpop.f32.mrf.mxu1  ;;  %v2947_v61 = vpop.f32.mrf.mxu0  ;;  %v726_v47 = vmax.f32 %v672_v32, 0.0 }
 0x2b2   : > { %v2683_v21 = vadd.f32 %v2682_v2, %v5285_v58  ;;  %v2948_v14 = vadd.f32 %v2947_v61, %v2859_v41  ;;  %v727_v58 = vmax.f32 %v673_v17, 0.0 }
 0x2b3   : > { %v1104_v0 = vmul.f32 %v1045_v49, %v726_v47 }
 0x2b4   : > { %v3079_v25 = vadd.f32 %v3078_v16, %v2948_v14  ;;  %v3120_v13 = vmul.f32 %v2948_v14, %v2948_v14  ;;  %2813 = vmatmul.bf16.gmra.mxu2 %v4453_v39  ;;  %2986 = vmatmul.bf16.gmra.mxu0 %v5287_v45  ;;  %v2772_v28 = vadd.f32 %v2771_v26, %v2683_v21  ;;  %v725_v16 = vmax.f32 %v671_v40, 0.0 }
 0x2b6   : > { %v3151_v57 = vadd.f32 %v3150_v35, %v3120_v13  ;;  %v1103_v41 = vmul.f32 %v1040_v37, %v725_v16  ;;  %v1158_v13 = vpack.c.bf16 %v1104_v0, %v1104_v0 }
 0x2b7   : > { %v2774_v34 = vpop.f32.mrf.mxu2  ;;  %v2860_v8 = vpop.f32.mrf.mxu3 }
 0x2b8   : > { %v2861_v22 = vadd.f32 %v2860_v8, %v2772_v28  ;;  %v1607_v32 = vunpack.c.l.b16 %v1158_v13 }
 0x2b9   : > { %v2685_v43 = vpop.f32.mrf.mxu1  ;;  %v2949_v18 = vpop.f32.mrf.mxu0 }
 0x2ba   : > { %v2686_v39 = vadd.f32 %v2685_v43, %v5289_v5  ;;  %v2950_v33 = vadd.f32 %v2949_v18, %v2861_v22 }
 0x2bc   : > { %v3681_v35 = vpack.c.bf16 %v2950_v33, %v2948_v14  ;;  %v3080_v59 = vadd.f32 %v3079_v25, %v2950_v33  ;;  %v3121_v11 = vmul.f32 %v2950_v33, %v2950_v33  ;;  %2724 = vmatmul.bf16.gmra.mxu1 %v5287_v45  ;;  %2902 = vmatmul.bf16.gmra.mxu3 %v4967_v53  ;;  %v1050_v14 = vpop.permute.xlu2 %1049 }
 0x2bd   : > { %v2775_v26 = vadd.f32 %v2774_v34, %v2686_v39  ;;  %v1157_v45 = vpack.c.bf16 %v1103_v41, %v1103_v41 }
 0x2be   : > { %3749 = vst [vmem:[%s3882_s16 + $0x20] sm:$0xff] %v3681_v35   ;;  %v3152_v38 = vadd.f32 %v3151_v57, %v3121_v11  ;;  %v1105_v57 = vmul.f32 %v1050_v14, %v727_v58 }
 0x2bf   : > { %v2776_v27 = vpop.f32.mrf.mxu2  ;;  %v2863_v2 = vpop.f32.mrf.mxu3  ;;  %v1606_v40 = vunpack.c.l.b16 %v1157_v45 }
 0x2c0   : > { %v2864_v61 = vadd.f32 %v2863_v2, %v2775_v26  ;;  %v1159_v6 = vpack.c.bf16 %v1105_v57, %v1105_v57 }
 0x2c1   : > { %v2687_v21 = vpop.f32.mrf.mxu1  ;;  %v2952_v56 = vpop.f32.mrf.mxu0  ;;  %v1608_v33 = vpack.c.b16 %v1607_v32, %v1606_v40 }
 0x2c2   : > { %v2688_v46 = vadd.f32 %v2687_v21, %v5290_v1  ;;  %v2953_v25 = vadd.f32 %v2952_v56, %v2864_v61  ;;  %v1611_v37 = vunpack.c.l.b16 %v1159_v6 }
 0x2c3   : > { %v1616_v26 = vshll.u32 %v1608_v33, 16  ;;  %v1614_v1 = vshrl.u32 %v1608_v33, 16 }
 0x2c4   : > { %v3081_v53 = vadd.f32 %v3080_v59, %v2953_v25  ;;  %v3122_v42 = vmul.f32 %v2953_v25, %v2953_v25  ;;  %2818 = vmatmul.bf16.gmra.mxu2 %v4961_v4  ;;  %2991 = vmatmul.bf16.gmra.mxu0 %v4964_v30  ;;  %v2777_v24 = vadd.f32 %v2776_v27, %v2688_v46 }
 0x2c5   : > { %v1612_v41 = vpack.c.b16 %v1611_v37, %v1611_v37  ;;  %v1618_v58 = vrot.slane %v1616_v26, 1 }
 0x2c6   : > { %v3153_v28 = vadd.f32 %v3152_v38, %v3122_v42  ;;  %v1600_v38 = vrot.slane %v4961_v4, 1 }
 0x2c7   : > { %v2779_v34 = vpop.f32.mrf.mxu2  ;;  %v2865_v8 = vpop.f32.mrf.mxu3  ;;  %v1621_v14 = vshll.u32 %v1612_v41, 16  ;;  %v1619_v13 = vor.u32 %v1618_v58, %v1614_v1 }
 0x2c8   : > { %v2866_v22 = vadd.f32 %v2865_v8, %v2777_v24 }
 0x2c9   : > { %v2690_v43 = vpop.f32.mrf.mxu1  ;;  %v2954_v18 = vpop.f32.mrf.mxu0 }
 0x2ca   : > { %v2691_v5 = vadd.f32 %v2690_v43, %v4959_v10  ;;  %v2955_v39 = vadd.f32 %v2954_v18, %v2866_v22  ;;  %v1601_v10 = vrot.slane %v4972_v60, 1  ;;  %v1626_v18 = vrot.slane %v1608_v33, 1 }
 0x2cc   : > { %v3686_v47 = vpack.c.bf16 %v2955_v39, %v2953_v25  ;;  %v3082_v16 = vadd.f32 %v3081_v53, %v2955_v39  ;;  %v3123_v49 = vmul.f32 %v2955_v39, %v2955_v39  ;;  %2729 = vmatmul.bf16.gmra.mxu1 %v4964_v30  ;;  %2907 = vmatmul.bf16.gmra.mxu3 %v4985_v19  ;;  %v1623_v53 = vrot.slane %v1621_v14, 1 }
 0x2cd   : > { %v2780_v59 = vadd.f32 %v2779_v34, %v2691_v5  ;;  %v1602_v19 = vsel %vm1513_vm0, %v1600_v38, %v1601_v10  ;;  %v1627_v39 = vrot.slane %v1612_v41, 1 }
 0x2ce   : > { %3750 = vst [vmem:[%s3882_s16 + $0x28] sm:$0xff] %v3686_v47   ;;  %v3154_v35 = vadd.f32 %v3153_v28, %v3123_v49  ;;  %v1624_v24 = vsel %vm1304_vm1, %v1619_v13, %v1623_v53 }
 0x2cf   : > { %v2781_v11 = vpop.f32.mrf.mxu2  ;;  %v2868_v17 = vpop.f32.mrf.mxu3  ;;  %v1628_v37 = vsel %vm1513_vm0, %v1626_v18, %v1627_v39 }
 0x2d0   : > { %v2869_v0 = vadd.f32 %v2868_v17, %v2780_v59 }
 0x2d1   : > { %v2692_v27 = vpop.f32.mrf.mxu1  ;;  %v2957_v2 = vpop.f32.mrf.mxu0 }
 0x2d2   : > { %v2693_v61 = vadd.f32 %v2692_v27, %v4975_v54  ;;  %v2958_v30 = vadd.f32 %v2957_v2, %v2869_v0 }
 0x2d4   : > { %v3083_v21 = vadd.f32 %v3082_v16, %v2958_v30  ;;  %v3124_v56 = vmul.f32 %v2958_v30, %v2958_v30  ;;  %2823 = vmatmul.bf16.gmra.mxu2 %v1608_v33  ;;  %2996 = vmatmul.bf16.gmra.mxu0 %v1602_v19  ;;  %v2782_v46 = vadd.f32 %v2781_v11, %v2693_v61 }
 0x2d6   : > { %v3155_v4 = vadd.f32 %v3154_v35, %v3124_v56 }
 0x2d7   : > { %v2784_v25 = vpop.f32.mrf.mxu2  ;;  %v2870_v60 = vpop.f32.mrf.mxu3 }
 0x2d8   : > { %v2871_v45 = vadd.f32 %v2870_v60, %v2782_v46 }
 0x2d9   : > { %v2695_v42 = vpop.f32.mrf.mxu1  ;;  %v2959_v54 = vpop.f32.mrf.mxu0 }
 0x2da   : > { %v2696_v57 = vadd.f32 %v2695_v42, %v4982_v12  ;;  %v2960_v28 = vadd.f32 %v2959_v54, %v2871_v45 }
 0x2dc   : > { %v3691_v32 = vpack.c.bf16 %v2960_v28, %v2958_v30  ;;  %v3084_v40 = vadd.f32 %v3083_v21, %v2960_v28  ;;  %v3125_v34 = vmul.f32 %v2960_v28, %v2960_v28  ;;  %2734 = vmatmul.bf16.gmra.mxu1 %v1602_v19  ;;  %2912 = vmatmul.bf16.gmra.mxu3 %v1624_v24 }
 0x2dd   : > { %v2785_v22 = vadd.f32 %v2784_v25, %v2696_v57 }
 0x2de   : > { %3751 = vst [vmem:[%s3882_s16 + $0x30] sm:$0xff] %v3691_v32   ;;  %v3156_v8 = vadd.f32 %v3155_v4, %v3125_v34 }
 0x2df   : > { %v2786_v6 = vpop.f32.mrf.mxu2  ;;  %v2873_v43 = vpop.f32.mrf.mxu3 }
 0x2e0   : > { %v2874_v5 = vadd.f32 %v2873_v43, %v2785_v22 }
 0x2e1   : > { %v2697_v47 = vpop.f32.mrf.mxu1  ;;  %v2962_v16 = vpop.f32.mrf.mxu0 }
 0x2e2   : > { %v2698_v12 = vadd.f32 %v2697_v47, %v4990_v3  ;;  %v2963_v49 = vadd.f32 %v2962_v16, %v2874_v5 }
 0x2e4   : > { %v3085_v35 = vadd.f32 %v3084_v40, %v2963_v49  ;;  %v3126_v59 = vmul.f32 %v2963_v49, %v2963_v49  ;;  %3001 = vmatmul.bf16.gmra.mxu0 %v1628_v37  ;;  %v2787_v17 = vadd.f32 %v2786_v6, %v2698_v12 }
 0x2e6   : > { %v3157_v11 = vadd.f32 %v3156_v8, %v3126_v59 }
 0x2e7   : > { %v2789_v38 = vpop.f32.mrf.mxu2  ;;  %v2875_v26 = vpop.f32.mrf.mxu3 }
 0x2e8   : > { %v2876_v0 = vadd.f32 %v2875_v26, %v2787_v17 }
 0x2e9   : > { %v2700_v10 = vpop.f32.mrf.mxu1  ;;  %v2964_v33 = vpop.f32.mrf.mxu0 }
 0x2ea   : > { %v2701_v41 = vadd.f32 %v2700_v10, %v4995_v55  ;;  %v2965_v27 = vadd.f32 %v2964_v33, %v2876_v0 }
 0x2ec   : > { %v3696_v2 = vpack.c.bf16 %v2965_v27, %v2963_v49  ;;  %v3086_v61 = vadd.f32 %v3085_v35, %v2965_v27  ;;  %v3127_v3 = vmul.f32 %v2965_v27, %v2965_v27  ;;  %v2790_v19 = vadd.f32 %v2789_v38, %v2701_v41 }
 0x2ee   : > { %3752 = vst [vmem:[%s3882_s16 + $0x38] sm:$0xff] %v3696_v2   ;;  %v3158_v30 = vadd.f32 %v3157_v11, %v3127_v3 }
 0x2ef   : > { %v2791_v58 = vpop.f32.mrf.mxu2  ;;  %v2878_v21 = vpop.f32.mrf.mxu3 }
 0x2f0   : > { %v2879_v56 = vadd.f32 %v2878_v21, %v2790_v19 }
 0x2f1   : > { %v2702_v14 = vpop.f32.mrf.mxu1  ;;  %v2967_v1 = vpop.f32.mrf.mxu0 }
 0x2f2   : > { %v2703_v4 = vadd.f32 %v2702_v14, %v5000_v51  ;;  %v2968_v46 = vadd.f32 %v2967_v1, %v2879_v56 }
 0x2f4   : > { %v3087_v25 = vadd.f32 %v3086_v61, %v2968_v46  ;;  %v3128_v60 = vmul.f32 %v2968_v46, %v2968_v46  ;;  %v2792_v55 = vadd.f32 %v2791_v58, %v2703_v4 }
 0x2f6   : > { %v3159_v13 = vadd.f32 %v3158_v30, %v3128_v60 }
 0x2f7   : > { %v2794_v45 = vpop.f32.mrf.mxu2  ;;  %v2880_v53 = vpop.f32.mrf.mxu3 }
 0x2f8   : > { %v2881_v42 = vadd.f32 %v2880_v53, %v2792_v55 }
 0x2f9   : > { %v2705_v54 = vpop.f32.mrf.mxu1  ;;  %v2969_v57 = vpop.f32.mrf.mxu0 }
 0x2fa   : > { %v2706_v28 = vadd.f32 %v2705_v54, %v5005_v63  ;;  %v2970_v24 = vadd.f32 %v2969_v57, %v2881_v42 }
 0x2fc   : > { %v3701_v32 = vpack.c.bf16 %v2970_v24, %v2968_v46  ;;  %v3088_v40 = vadd.f32 %v3087_v25, %v2970_v24  ;;  %v3129_v34 = vmul.f32 %v2970_v24, %v2970_v24  ;;  %v2795_v51 = vadd.f32 %v2794_v45, %v2706_v28 }
 0x2fe   : > { %3753 = vst [vmem:[%s3882_s16 + $0x40] sm:$0xff] %v3701_v32   ;;  %v3160_v8 = vadd.f32 %v3159_v13, %v3129_v34 }
 0x2ff   : > { %v2796_v22 = vpop.f32.mrf.mxu2  ;;  %v2883_v6 = vpop.f32.mrf.mxu3 }
 0x300   : > { %v2884_v43 = vadd.f32 %v2883_v6, %v2795_v51 }
 0x301   : > { %v2707_v18 = vpop.f32.mrf.mxu1  ;;  %v2972_v5 = vpop.f32.mrf.mxu0 }
 0x302   : > { %v2708_v39 = vadd.f32 %v2707_v18, %v5010_v48  ;;  %v2973_v47 = vadd.f32 %v2972_v5, %v2884_v43 }
 0x304   : > { %v3089_v16 = vadd.f32 %v3088_v40, %v2973_v47  ;;  %v3130_v12 = vmul.f32 %v2973_v47, %v2973_v47  ;;  %v2797_v63 = vadd.f32 %v2796_v22, %v2708_v39 }
 0x306   : > { %v3161_v49 = vadd.f32 %v3160_v8, %v3130_v12 }
 0x307   : > { %v2799_v37 = vpop.f32.mrf.mxu2  ;;  %v2885_v35 = vpop.f32.mrf.mxu3 }
 0x308   : > { %v2886_v59 = vadd.f32 %v2885_v35, %v2797_v63 }
 0x309   : > { %v2710_v11 = vpop.f32.mrf.mxu1  ;;  %v2974_v17 = vpop.f32.mrf.mxu0 }
 0x30a   : > { %v2711_v38 = vadd.f32 %v2710_v11, %v5015_v23  ;;  %v2975_v26 = vadd.f32 %v2974_v17, %v2886_v59 }
 0x30c   : > { %v3706_v0 = vpack.c.bf16 %v2975_v26, %v2973_v47  ;;  %v3090_v10 = vadd.f32 %v3089_v16, %v2975_v26  ;;  %v3131_v33 = vmul.f32 %v2975_v26, %v2975_v26  ;;  %v2800_v48 = vadd.f32 %v2799_v37, %v2711_v38 }
 0x30e   : > { %3754 = vst [vmem:[%s3882_s16 + $0x48] sm:$0xff] %v3706_v0   ;;  %v3162_v41 = vadd.f32 %v3161_v49, %v3131_v33 }
 0x30f   : > { %v2801_v27 = vpop.f32.mrf.mxu2  ;;  %v2888_v2 = vpop.f32.mrf.mxu3 }
 0x310   : > { %v2889_v61 = vadd.f32 %v2888_v2, %v2800_v48 }
 0x311   : > { %v2712_v3 = vpop.f32.mrf.mxu1  ;;  %v2977_v30 = vpop.f32.mrf.mxu0 }
 0x312   : > { %v2713_v19 = vadd.f32 %v2712_v3, %v5020_v52  ;;  %v2978_v58 = vadd.f32 %v2977_v30, %v2889_v61 }
 0x314   : > { %v3091_v21 = vadd.f32 %v3090_v10, %v2978_v58  ;;  %v3132_v56 = vmul.f32 %v2978_v58, %v2978_v58  ;;  %v2802_v23 = vadd.f32 %v2801_v27, %v2713_v19 }
 0x316   : > { %v3163_v14 = vadd.f32 %v3162_v41, %v3132_v56 }
 0x317   : > { %v2804_v1 = vpop.f32.mrf.mxu2  ;;  %v2890_v4 = vpop.f32.mrf.mxu3 }
 0x318   : > { %v2891_v46 = vadd.f32 %v2890_v4, %v2802_v23 }
 0x319   : > { %v2715_v25 = vpop.f32.mrf.mxu1  ;;  %v2979_v60 = vpop.f32.mrf.mxu0 }
 0x31a   : > { %v2716_v13 = vadd.f32 %v2715_v25, %v5025_v50  ;;  %v2980_v55 = vadd.f32 %v2979_v60, %v2891_v46 }
 0x31c   : > { %v3711_v45 = vpack.c.bf16 %v2980_v55, %v2978_v58  ;;  %v3092_v53 = vadd.f32 %v3091_v21, %v2980_v55  ;;  %v3133_v42 = vmul.f32 %v2980_v55, %v2980_v55  ;;  %v2805_v52 = vadd.f32 %v2804_v1, %v2716_v13 }
 0x31e   : > { %3755 = vst [vmem:[%s3882_s16 + $0x50] sm:$0xff] %v3711_v45   ;;  %v3164_v54 = vadd.f32 %v3163_v14, %v3133_v42 }
 0x31f   : > { %v2806_v57 = vpop.f32.mrf.mxu2  ;;  %v2893_v28 = vpop.f32.mrf.mxu3 }
 0x320   : > { %v2894_v24 = vadd.f32 %v2893_v28, %v2805_v52 }
 0x321   : > { %v2717_v32 = vpop.f32.mrf.mxu1  ;;  %v2982_v40 = vpop.f32.mrf.mxu0 }
 0x322   : > { %v2718_v34 = vadd.f32 %v2717_v32, %v5030_v9  ;;  %v2983_v8 = vadd.f32 %v2982_v40, %v2894_v24 }
 0x324   : > { %v3093_v51 = vadd.f32 %v3092_v53, %v2983_v8  ;;  %v3134_v22 = vmul.f32 %v2983_v8, %v2983_v8  ;;  %v2807_v50 = vadd.f32 %v2806_v57, %v2718_v34 }
 0x326   : > { %v3165_v6 = vadd.f32 %v3164_v54, %v3134_v22 }
 0x327   : > { %v2809_v43 = vpop.f32.mrf.mxu2  ;;  %v2895_v18 = vpop.f32.mrf.mxu3 }
 0x328   : > { %v2896_v5 = vadd.f32 %v2895_v18, %v2807_v50 }
 0x329   : > { %v2720_v39 = vpop.f32.mrf.mxu1  ;;  %v2984_v47 = vpop.f32.mrf.mxu0 }
 0x32a   : > { %v2721_v16 = vadd.f32 %v2720_v39, %v5035_v20  ;;  %v2985_v12 = vadd.f32 %v2984_v47, %v2896_v5 }
 0x32c   : > { %v3716_v49 = vpack.c.bf16 %v2985_v12, %v2983_v8  ;;  %v3094_v63 = vadd.f32 %v3093_v51, %v2985_v12  ;;  %v3135_v37 = vmul.f32 %v2985_v12, %v2985_v12  ;;  %v2810_v9 = vadd.f32 %v2809_v43, %v2721_v16 }
 0x32e   : > { %3756 = vst [vmem:[%s3882_s16 + $0x58] sm:$0xff] %v3716_v49   ;;  %v3166_v35 = vadd.f32 %v3165_v6, %v3135_v37 }
 0x32f   : > { %v2811_v59 = vpop.f32.mrf.mxu2  ;;  %v2898_v11 = vpop.f32.mrf.mxu3 }
 0x330   : > { %v2899_v17 = vadd.f32 %v2898_v11, %v2810_v9 }
 0x331   : > { %v2722_v38 = vpop.f32.mrf.mxu1  ;;  %v2987_v26 = vpop.f32.mrf.mxu0 }
 0x332   : > { %v2723_v0 = vadd.f32 %v2722_v38, %v5040_v15  ;;  %v2988_v10 = vadd.f32 %v2987_v26, %v2899_v17 }
 0x334   : > { %v3095_v33 = vadd.f32 %v3094_v63, %v2988_v10  ;;  %v3136_v41 = vmul.f32 %v2988_v10, %v2988_v10  ;;  %v2812_v20 = vadd.f32 %v2811_v59, %v2723_v0 }
 0x336   : > { %v3167_v48 = vadd.f32 %v3166_v35, %v3136_v41 }
 0x337   : > { %v2814_v27 = vpop.f32.mrf.mxu2  ;;  %v2900_v2 = vpop.f32.mrf.mxu3 }
 0x338   : > { %v2901_v61 = vadd.f32 %v2900_v2, %v2812_v20 }
 0x339   : > { %v2725_v3 = vpop.f32.mrf.mxu1  ;;  %v2989_v30 = vpop.f32.mrf.mxu0 }
 0x33a   : > { %v2726_v19 = vadd.f32 %v2725_v3, %v5045_v44  ;;  %v2990_v58 = vadd.f32 %v2989_v30, %v2901_v61 }
 0x33c   : > { %v3721_v21 = vpack.c.bf16 %v2990_v58, %v2988_v10  ;;  %v3096_v56 = vadd.f32 %v3095_v33, %v2990_v58  ;;  %v3137_v14 = vmul.f32 %v2990_v58, %v2990_v58  ;;  %v2815_v15 = vadd.f32 %v2814_v27, %v2726_v19 }
 0x33e   : > { %3757 = vst [vmem:[%s3882_s16 + $0x60] sm:$0xff] %v3721_v21   ;;  %v3168_v23 = vadd.f32 %v3167_v48, %v3137_v14 }
 0x33f   : > { %v2816_v1 = vpop.f32.mrf.mxu2  ;;  %v2903_v4 = vpop.f32.mrf.mxu3 }
 0x340   : > { %v2904_v46 = vadd.f32 %v2903_v4, %v2815_v15 }
 0x341   : > { %v2727_v25 = vpop.f32.mrf.mxu1  ;;  %v2992_v60 = vpop.f32.mrf.mxu0 }
 0x342   : > { %v2728_v13 = vadd.f32 %v2727_v25, %v5050_v31  ;;  %v2993_v55 = vadd.f32 %v2992_v60, %v2904_v46 }
 0x344   : > { %v3097_v45 = vadd.f32 %v3096_v56, %v2993_v55  ;;  %v3138_v53 = vmul.f32 %v2993_v55, %v2993_v55  ;;  %v2817_v44 = vadd.f32 %v2816_v1, %v2728_v13 }
 0x346   : > { %v3169_v42 = vadd.f32 %v3168_v23, %v3138_v53 }
 0x347   : > { %v2819_v54 = vpop.f32.mrf.mxu2  ;;  %v2905_v52 = vpop.f32.mrf.mxu3 }
 0x348   : > { %v2906_v57 = vadd.f32 %v2905_v52, %v2817_v44  ;;  %v3071_v44 = vld [vmem:[%s5187_s8] sm:$0x1] }
 0x349   : > { %v2730_v28 = vpop.f32.mrf.mxu1  ;;  %v2994_v24 = vpop.f32.mrf.mxu0 }
 0x34a   : > { %v2731_v32 = vadd.f32 %v2730_v28, %v5055_v29  ;;  %v2995_v40 = vadd.f32 %v2994_v24, %v2906_v57  ;;  %v3111_v57 = vld [vmem:[%s5188_s9] sm:$0x1] }
 0x34c   : > { %v3726_v34 = vpack.c.bf16 %v2995_v40, %v2993_v55  ;;  %v3098_v8 = vadd.f32 %v3097_v45, %v2995_v40  ;;  %v3139_v51 = vmul.f32 %v2995_v40, %v2995_v40  ;;  %v2820_v31 = vadd.f32 %v2819_v54, %v2731_v32 }
 0x34e   : > { %3758 = vst [vmem:[%s3882_s16 + $0x68] sm:$0xff] %v3726_v34   ;;  %v3170_v22 = vadd.f32 %v3169_v42, %v3139_v51 }
 0x34f   : > { %v2908_v6 = vpop.f32.mrf.mxu3  ;;  %v2821_v50 = vpop.f32.mrf.mxu2 }
 0x350   : > { %v2909_v43 = vadd.f32 %v2908_v6, %v2820_v31 }
 0x351   : > { %v2732_v18 = vpop.f32.mrf.mxu1  ;;  %v2997_v5 = vpop.f32.mrf.mxu0 }
 0x352   : > { %v2733_v39 = vadd.f32 %v2732_v18, %v5060_v7  ;;  %v2998_v47 = vadd.f32 %v2997_v5, %v2909_v43 }
 0x354   : > { %v3099_v16 = vadd.f32 %v3098_v8, %v2998_v47  ;;  %v3140_v12 = vmul.f32 %v2998_v47, %v2998_v47  ;;  %v2822_v29 = vadd.f32 %v2821_v50, %v2733_v39 }
 0x356   : > { %v3171_v49 = vadd.f32 %v3170_v22, %v3140_v12 }
 0x357   : > { %v2910_v63 = vpop.f32.mrf.mxu3  ;;  %v2824_v17 = vpop.f32.mrf.mxu2 }
 0x358   : > { %v2911_v37 = vadd.f32 %v2910_v63, %v2822_v29 }
 0x359   : > { %v2735_v35 = vpop.f32.mrf.mxu1  ;;  %v2999_v9 = vpop.f32.mrf.mxu0 }
 0x35a   : > { %v2736_v59 = vadd.f32 %v2735_v35, %v5065_v36  ;;  %v3000_v11 = vadd.f32 %v2999_v9, %v2911_v37 }
 0x35c   : > { %v3731_v38 = vpack.c.bf16 %v3000_v11, %v2998_v47  ;;  %v3100_v26 = vadd.f32 %v3099_v16, %v3000_v11  ;;  %v3141_v0 = vmul.f32 %v3000_v11, %v3000_v11  ;;  %v2825_v7 = vadd.f32 %v2824_v17, %v2736_v59 }
 0x35e   : > { %3759 = vst [vmem:[%s3882_s16 + $0x70] sm:$0xff] %v3731_v38   ;;  %v3172_v10 = vadd.f32 %v3171_v49, %v3141_v0 }
 0x35f   : > { %v2913_v33 = vpop.f32.mrf.mxu3  ;;  %v2826_v30 = vpop.f32.mrf.mxu2 }
 0x360   : > { %v2914_v41 = vadd.f32 %v2913_v33, %v2825_v7 }
 0x361   : > { %v2737_v48 = vpop.f32.mrf.mxu1  ;;  %v3002_v20 = vpop.f32.mrf.mxu0 }
 0x362   : > { %v2738_v27 = vadd.f32 %v2737_v48, %v5069_v62  ;;  %v3003_v2 = vadd.f32 %v3002_v20, %v2914_v41 }
 0x364   : > { %v3101_v61 = vadd.f32 %v3100_v26, %v3003_v2  ;;  %v3142_v3 = vmul.f32 %v3003_v2, %v3003_v2  ;;  %v2827_v19 = vadd.f32 %v2826_v30, %v2738_v27 }
 0x366   : > { %v3173_v36 = vadd.f32 %v3172_v10, %v3142_v3 }
 0x367   : > { %v2915_v58 = vpop.f32.mrf.mxu3 }
 0x368   : > { %v2916_v21 = vadd.f32 %v2915_v58, %v2827_v19 }
 0x369   : > { %v3004_v56 = vpop.f32.mrf.mxu0 }
 0x36a   : > { %v3005_v14 = vadd.f32 %v3004_v56, %v2916_v21 }
 0x36c   : > { %v3736_v23 = vpack.c.bf16 %v3005_v14, %v3003_v2  ;;  %v3102_v15 = vadd.f32 %v3101_v61, %v3005_v14  ;;  %v3143_v1 = vmul.f32 %v3005_v14, %v3005_v14 }
 0x36e   : > { %3760 = vst [vmem:[%s3882_s16 + $0x78] sm:$0xff] %v3736_v23   ;;  %v3103_v4 = vrot.slane %v3102_v15, 4  ;;  %v3174_v46 = vadd.f32 %v3173_v36, %v3143_v1 }
 0x370   : > { %v3104_v25 = vadd.f32 %v3103_v4, %v3102_v15  ;;  %v3175_v60 = vrot.slane %v3174_v46, 4 }
 0x372   : > { %v3105_v13 = vrot.slane %v3104_v25, 2  ;;  %v3176_v62 = vadd.f32 %v3175_v60, %v3174_v46 }
 0x374   : > { %v3106_v55 = vadd.f32 %v3105_v13, %v3104_v25  ;;  %v3177_v45 = vrot.slane %v3176_v62, 2 }
 0x376   : > { %v3107_v53 = vrot.slane %v3106_v55, 1  ;;  %v3178_v42 = vadd.f32 %v3177_v45, %v3176_v62 }
 0x378   : > { %v3108_v54 = vadd.f32 %v3107_v53, %v3106_v55  ;;  %v3179_v52 = vrot.slane %v3178_v42, 1 }
 0x37a   : > { %v3109_v28 = vadd.f32 %v3108_v54, %v3071_v44  ;;  %v3180_v24 = vadd.f32 %v3179_v52, %v3178_v42 }
 0x37c   : > { %3110 = vst [vmem:[%s5187_s8] sm:$0x1] %v3109_v28  ;;  %v3181_v32 = vadd.f32 %v3180_v24, %v3111_v57 }
 0x37e   : > { %3182 = vst [vmem:[%s5188_s9] sm:$0x1] %v3181_v32 }
 0x37f PF: > { %s20_s30 = sadd.s32 1, %s3817_s30  }
 0x380   : > { %p17_p5 = scmp.ge.s32.totalorder %s20_s30, 4  }
 0x382   :  { %19 = sbr.rel (!%p17_p5) target bundleno = 1 (0x1), region = 98 }

</bundles_post_ra>
